<compile_context>
chip_gen: v7x
topology: tpu7x:2x2x1
jax: 0.10.0
libtpu: 0.0.40
codegen_flags: <defaults>
</compile_context>

<pallas_src>
import jax
import jax.numpy as jnp
from jax.experimental import pallas as pl
from jax.experimental.pallas import tpu as pltpu


# --------------------- init-time weight preparation (pure JAX) ----------------

def _conv_banded(w_oihw, w_in):
    """Fold a [O, C, KH, KW] conv weight into KH banded matmul matrices.

    A[ki, w*C + c, wo*O + o] = w[o, c, ki, w - wo]   if 0 <= w - wo < KW else 0
    so that  Y[ho, wo*O + o] = sum_ki  X[ki + ho, :] @ A[ki]
    equals the valid-padding stride-1 cross-correlation (PyTorch Conv2d).
    """
    o_dim, c_dim, kh, kw = w_oihw.shape
    wo_dim = w_in - kw + 1
    win = jnp.arange(w_in)
    wo = jnp.arange(wo_dim)
    kj = jnp.arange(kw)
    ind = (win[:, None, None] == wo[None, None, :] + kj[None, :, None])
    ind = ind.astype(jnp.float32)                      # [W, KW, Wo]
    a = jnp.einsum("wkv,ocik->iwcvo", ind, w_oihw.astype(jnp.float32))
    return a.reshape(kh, w_in * c_dim, wo_dim * o_dim)  # [KH, W*C, Wo*O]


def _pool_col_select(w, c):
    """One-hot [W*C, (W//2)*C] matrices picking even/odd column groups."""
    wp = w // 2
    wi = jnp.arange(w)[:, None, None, None]
    ci = jnp.arange(c)[None, :, None, None]
    qi = jnp.arange(wp)[None, None, :, None]
    cj = jnp.arange(c)[None, None, None, :]
    even = ((wi == 2 * qi) & (ci == cj)).astype(jnp.float32).reshape(w * c, wp * c)
    odd = ((wi == 2 * qi + 1) & (ci == cj)).astype(jnp.float32).reshape(w * c, wp * c)
    return even, odd


def prepare_params(params, compute_dtype=jnp.bfloat16):
    """PyTorch-layout params -> kernel operand tuple (run once, outside kernel)."""
    # stage 1: conv 3->6, k5, input 32x32
    a1 = _conv_banded(params["conv1_w"], 32).astype(compute_dtype)      # [5, 96, 168]
    b1 = jnp.tile(params["conv1_b"], 28).reshape(1, 28 * 6).astype(jnp.float32)
    t1e, t1o = _pool_col_select(28, 6)                                  # [168, 84]
    t1 = jnp.stack([t1e, t1o]).astype(compute_dtype)                    # [2, 168, 84]
    # stage 2: conv 6->16, k5, input 14x14
    a2 = _conv_banded(params["conv2_w"], 14).astype(compute_dtype)      # [5, 84, 160]
    b2 = jnp.tile(params["conv2_b"], 10).reshape(1, 10 * 16).astype(jnp.float32)
    t2e, t2o = _pool_col_select(10, 16)                                 # [160, 80]
    t2 = jnp.stack([t2e, t2o]).astype(compute_dtype)                    # [2, 160, 80]
    # fc1: PyTorch flatten order is (c, h, w); kernel activation layout is
    # rows=h, cols=(w, c) with c minor, so permute the 400 input rows once here.
    f1 = params["fc1_w"].reshape(120, 16, 5, 5)                         # [j, c, h, w]
    w1 = jnp.transpose(f1, (2, 3, 1, 0)).reshape(5, 5 * 16, 120).astype(compute_dtype)
    fb1 = params["fc1_b"].reshape(1, -1).astype(jnp.float32)
    w2 = params["fc2_w"].T.astype(compute_dtype)                        # [120, 84]
    fb2 = params["fc2_b"].reshape(1, -1).astype(jnp.float32)
    w3 = params["fc3_w"].T.astype(compute_dtype)                        # [84, classes]
    fb3 = params["fc3_b"].reshape(1, -1).astype(jnp.float32)
    return (a1, b1, t1, a2, b2, t2, w1, fb1, w2, fb2, w3, fb3)


# ------------------------------ fused Pallas kernel ----------------------------

def _lenet_kernel(x_ref,
                  a1_ref, b1_ref, t1_ref,
                  a2_ref, b2_ref, t2_ref,
                  w1_ref, fb1_ref, w2_ref, fb2_ref, w3_ref, fb3_ref,
                  sel_ref, o_ref):
    f32 = jnp.float32
    cdt = a1_ref.dtype                       # compute dtype (bf16)

    r0 = x_ref.shape[0]                      # Bt * 32 stacked input rows
    m1 = r0 - 4                              # conv1 output rows (stride 32/img)

    # ---- conv1 + ReLU: 5 banded matmuls, LHS rows read straight off the ref
    acc = None
    for ki in range(a1_ref.shape[0]):
        lhs = x_ref[pl.ds(ki, m1), :]                         # [m1, 96] bf16
        part = jnp.dot(lhs, a1_ref[ki], preferred_element_type=f32)
        acc = part if acc is None else acc + part
    y1 = jnp.maximum(acc + b1_ref[...], 0.0)                  # [m1, 168] f32

    # ---- pool1: row max on the VPU, column compaction as bf16 one-hot matmuls
    z1 = jnp.maximum(y1[:m1 - 1, :], y1[1:, :]).astype(cdt)   # [m1-1, 168]
    p1 = jnp.maximum(jnp.dot(z1, t1_ref[0], preferred_element_type=f32),
                     jnp.dot(z1, t1_ref[1], preferred_element_type=f32))
    p1 = p1.astype(cdt)                                       # [m1-1, 84]

    # ---- conv2 + ReLU (valid rows live at even per-image offsets -> step 2)
    m2 = (m1 - 1) - 8
    acc = None
    for ki in range(a2_ref.shape[0]):
        lhs = p1[2 * ki: 2 * ki + m2, :]                      # [m2, 84] bf16
        part = jnp.dot(lhs, a2_ref[ki], preferred_element_type=f32)
        acc = part if acc is None else acc + part
    y2 = jnp.maximum(acc + b2_ref[...], 0.0)                  # [m2, 160] f32

    # ---- pool2 (valid rows now at multiples of 4 within each image)
    z2 = jnp.maximum(y2[:m2 - 2, :], y2[2:, :]).astype(cdt)   # [m2-2, 160]
    p2 = jnp.maximum(jnp.dot(z2, t2_ref[0], preferred_element_type=f32),
                     jnp.dot(z2, t2_ref[1], preferred_element_type=f32))
    p2 = p2.astype(cdt)                                       # [m2-2, 80]

    # ---- fc1: banded over the 5 pooled spatial rows, still batched along M
    m3 = (m2 - 2) - 16
    acc = None
    for hh in range(w1_ref.shape[0]):
        lhs = p2[4 * hh: 4 * hh + m3, :]                      # [m3, 80] bf16
        part = jnp.dot(lhs, w1_ref[hh], preferred_element_type=f32)
        acc = part if acc is None else acc + part             # [m3, 120] f32

    # ---- compact to one row per image (rows b*32) with a one-hot bf16 matmul,
    #      then run the classifier at M = Bt and store one [Bt, classes] block.
    u = jnp.dot(sel_ref[...], acc.astype(cdt), preferred_element_type=f32)
    h1 = jnp.maximum(u + fb1_ref[...], 0.0)                   # [Bt, 120]
    h2 = jnp.dot(h1.astype(cdt), w2_ref[...], preferred_element_type=f32) + fb2_ref[...]
    h2 = jnp.maximum(h2, 0.0)                                 # [Bt, 84]
    logits = jnp.dot(h2.astype(cdt), w3_ref[...], preferred_element_type=f32) + fb3_ref[...]
    o_ref[0] = logits.astype(o_ref.dtype)                     # [Bt, classes]


# --------------------------------- wrapper -------------------------------------

def _full_spec(arr):
    """Whole (small, constant) array resident in VMEM for every grid step."""
    nd = arr.ndim
    return pl.BlockSpec(arr.shape, lambda i, _nd=nd: (0,) * _nd)


def lenet_forward(x_nchw, prepared, block_batch=16):
    n, c, h, w = x_nchw.shape
    assert (c, h, w) == (3, 32, 32), "LeNet-5 expects 3x32x32 inputs"
    classes = prepared[-1].shape[-1]
    cdt = prepared[0].dtype

    # Batch tile: amortize per-step overhead / fill the MXU, but keep >=2 grid
    # steps when possible so both v7x TensorCores get work.
    num_steps = pl.cdiv(n, block_batch)
    if n > 1:
        num_steps = max(num_steps, 2)
    bt = pl.cdiv(n, num_steps)
    n_pad = num_steps * bt

    # Only XLA glue: NCHW -> per-image [32, 96] channel-minor layout, stacked
    # along rows, fed as bf16 (halves the per-step HBM read).
    x = jnp.transpose(x_nchw, (0, 2, 3, 1)).reshape(n, h, w * c)
    if n_pad != n:
        x = jnp.concatenate(
            [x, jnp.zeros((n_pad - n, h, w * c), x.dtype)], axis=0)
    x2d = x.reshape(n_pad * h, w * c).astype(cdt)

    # One-hot selection picking the valid fc1 row (per-image offset 0, image
    # stride 32) out of the stacked/banded layout -> [bt, m3], bf16-exact.
    m1 = bt * h - 4
    m2 = m1 - 1 - 8
    m3 = m2 - 2 - 16
    sel = (jnp.arange(m3)[None, :] == (h * jnp.arange(bt))[:, None]).astype(cdt)

    in_specs = [pl.BlockSpec((bt * h, w * c), lambda i: (i, 0))]
    in_specs += [_full_spec(p) for p in prepared]
    in_specs += [_full_spec(sel)]

    out = pl.pallas_call(
        _lenet_kernel,
        out_shape=jax.ShapeDtypeStruct((num_steps, bt, classes), jnp.float32),
        grid=(num_steps,),
        in_specs=in_specs,
        out_specs=pl.BlockSpec((1, bt, classes), lambda i: (i, 0, 0)),
        compiler_params=pltpu.CompilerParams(
            dimension_semantics=("parallel",)),
    )(x2d, *prepared, sel)
    return out.reshape(n_pad, classes)[:n]


# ----------------- PyTorch-layout init + pure-JAX reference --------------------

def init_params(key, classes):
    ks = jax.random.split(key, 10)

    def w(k, shape, fan_in):
        return jax.random.normal(k, shape, jnp.float32) / jnp.sqrt(fan_in)

    return {
        "conv1_w": w(ks[0], (6, 3, 5, 5), 3 * 5 * 5),
        "conv1_b": w(ks[1], (6,), 3 * 5 * 5),
        "conv2_w": w(ks[2], (16, 6, 5, 5), 6 * 5 * 5),
        "conv2_b": w(ks[3], (16,), 6 * 5 * 5),
        "fc1_w": w(ks[4], (120, 400), 400),   # PyTorch [out, in] layout
        "fc1_b": w(ks[5], (120,), 400),
        "fc2_w": w(ks[6], (84, 120), 120),
        "fc2_b": w(ks[7], (84,), 120),
        "fc3_w": w(ks[8], (classes, 84), 84),
        "fc3_b": w(ks[9], (84,), 84) if False else w(ks[9], (classes,), 84),
    }


def lenet_reference(x_nchw, params):
    """Plain-XLA f32 reference (used only for an in-script sanity check)."""
    x = x_nchw.astype(jnp.float32)

    def conv(x, w, b):
        y = jax.lax.conv_general_dilated(
            x, w, (1, 1), "VALID", dimension_numbers=("NCHW", "OIHW", "NCHW"))
        return jax.nn.relu(y + b[None, :, None, None])

    def pool(x):
        return jax.lax.reduce_window(
            x, -jnp.inf, jax.lax.max, (1, 1, 2, 2), (1, 1, 2, 2), "VALID")

    x = pool(conv(x, params["conv1_w"], params["conv1_b"]))
    x = pool(conv(x, params["conv2_w"], params["conv2_b"]))
    x = x.reshape(x.shape[0], -1)
    x = jax.nn.relu(x @ params["fc1_w"].T + params["fc1_b"])
    x = jax.nn.relu(x @ params["fc2_w"].T + params["fc2_b"])
    return x @ params["fc3_w"].T + params["fc3_b"]


if __name__ == "__main__":
    classes = 10
    key = jax.random.PRNGKey(0)
    k_param, k_x = jax.random.split(key)

    params = init_params(k_param, classes)
    prepared = prepare_params(params)

    # LeNet needs 32x32 spatial input so the flatten yields 16*5*5 = 400.
    x = jax.random.normal(k_x, (8, 3, 32, 32), jnp.float32)   # NCHW like PyTorch

    out = jax.jit(lenet_forward)(x, prepared)
    out = jax.block_until_ready(out)
    assert out.shape == (8, classes), out.shape

    # Sanity check against the f32 XLA reference (bf16 MXU inputs -> loose tol).
    ref = lenet_reference(x, params)
    max_err = float(jnp.max(jnp.abs(out - ref)))
    assert max_err < 0.2, max_err

    print("KERNEL_OK")
</pallas_src>

<mosaic_0001>
module attributes {stable_mosaic.version = 11 : i64} {
  func.func @_lenet_kernel(%arg0: i32, %arg1: memref<128x96xbf16, #tpu.memory_space<vmem>>, %arg2: memref<5x96x168xbf16, #tpu.memory_space<vmem>>, %arg3: memref<1x168xf32, #tpu.memory_space<vmem>>, %arg4: memref<2x168x84xbf16, #tpu.memory_space<vmem>>, %arg5: memref<5x84x160xbf16, #tpu.memory_space<vmem>>, %arg6: memref<1x160xf32, #tpu.memory_space<vmem>>, %arg7: memref<2x160x80xbf16, #tpu.memory_space<vmem>>, %arg8: memref<5x80x120xbf16, #tpu.memory_space<vmem>>, %arg9: memref<1x120xf32, #tpu.memory_space<vmem>>, %arg10: memref<120x84xbf16, #tpu.memory_space<vmem>>, %arg11: memref<1x84xf32, #tpu.memory_space<vmem>>, %arg12: memref<84x10xbf16, #tpu.memory_space<vmem>>, %arg13: memref<1x10xf32, #tpu.memory_space<vmem>>, %arg14: memref<4x97xbf16, #tpu.memory_space<vmem>>, %arg15: memref<1x4x10xf32, #tpu.memory_space<vmem>>) attributes {dimension_semantics = [#tpu.dimension_semantics<parallel>], iteration_bounds = array<i64: 2>, scalar_prefetch = 0 : i64, scratch_operands = 0 : i64, tpu.core_type = #tpu.core_type<tc>, window_params = [{transform_indices = @transform_0, window_bounds = array<i64: 128, 96>}, {pipeline_mode = #tpu.pipeline_mode<synchronous>, transform_indices = @transform_1, window_bounds = array<i64: 5, 96, 168>}, {pipeline_mode = #tpu.pipeline_mode<synchronous>, transform_indices = @transform_2, window_bounds = array<i64: 1, 168>}, {pipeline_mode = #tpu.pipeline_mode<synchronous>, transform_indices = @transform_3, window_bounds = array<i64: 2, 168, 84>}, {pipeline_mode = #tpu.pipeline_mode<synchronous>, transform_indices = @transform_4, window_bounds = array<i64: 5, 84, 160>}, {pipeline_mode = #tpu.pipeline_mode<synchronous>, transform_indices = @transform_5, window_bounds = array<i64: 1, 160>}, {pipeline_mode = #tpu.pipeline_mode<synchronous>, transform_indices = @transform_6, window_bounds = array<i64: 2, 160, 80>}, {pipeline_mode = #tpu.pipeline_mode<synchronous>, transform_indices = @transform_7, window_bounds = array<i64: 5, 80, 120>}, {pipeline_mode = #tpu.pipeline_mode<synchronous>, transform_indices = @transform_8, window_bounds = array<i64: 1, 120>}, {pipeline_mode = #tpu.pipeline_mode<synchronous>, transform_indices = @transform_9, window_bounds = array<i64: 120, 84>}, {pipeline_mode = #tpu.pipeline_mode<synchronous>, transform_indices = @transform_10, window_bounds = array<i64: 1, 84>}, {pipeline_mode = #tpu.pipeline_mode<synchronous>, transform_indices = @transform_11, window_bounds = array<i64: 84, 10>}, {pipeline_mode = #tpu.pipeline_mode<synchronous>, transform_indices = @transform_12, window_bounds = array<i64: 1, 10>}, {pipeline_mode = #tpu.pipeline_mode<synchronous>, transform_indices = @transform_13, window_bounds = array<i64: 4, 97>}, {transform_indices = @transform_14, window_bounds = array<i64: 1, 4, 10>}]} {
    %c0 = arith.constant 0 : index
    %c0_0 = arith.constant 0 : index
    %0 = vector.load %arg1[%c0, %c0_0] : memref<128x96xbf16, #tpu.memory_space<vmem>>, vector<124x96xbf16>
    %c0_1 = arith.constant 0 : index
    %c0_2 = arith.constant 0 : index
    %c0_3 = arith.constant 0 : index
    %1 = vector.load %arg2[%c0_1, %c0_2, %c0_3] : memref<5x96x168xbf16, #tpu.memory_space<vmem>>, vector<1x96x168xbf16>
    %2 = vector.shape_cast %1 : vector<1x96x168xbf16> to vector<96x168xbf16>
    %cst = arith.constant dense<0.000000e+00> : vector<124x168xf32>
    %3 = tpu.matmul %0, %2, %cst {dimension_numbers = #tpu.dot_dimension_numbers<[1], [0], [0], [1], [0, 0, 1, 1], [], []>} : vector<124x96xbf16>, vector<96x168xbf16>, vector<124x168xf32> -> vector<124x168xf32>
    %c1 = arith.constant 1 : index
    %c0_4 = arith.constant 0 : index
    %4 = vector.load %arg1[%c1, %c0_4] : memref<128x96xbf16, #tpu.memory_space<vmem>>, vector<124x96xbf16>
    %c1_5 = arith.constant 1 : index
    %c0_6 = arith.constant 0 : index
    %c0_7 = arith.constant 0 : index
    %5 = vector.load %arg2[%c1_5, %c0_6, %c0_7] : memref<5x96x168xbf16, #tpu.memory_space<vmem>>, vector<1x96x168xbf16>
    %6 = vector.shape_cast %5 : vector<1x96x168xbf16> to vector<96x168xbf16>
    %cst_8 = arith.constant dense<0.000000e+00> : vector<124x168xf32>
    %7 = tpu.matmul %4, %6, %cst_8 {dimension_numbers = #tpu.dot_dimension_numbers<[1], [0], [0], [1], [0, 0, 1, 1], [], []>} : vector<124x96xbf16>, vector<96x168xbf16>, vector<124x168xf32> -> vector<124x168xf32>
    %8 = arith.addf %3, %7 : vector<124x168xf32>
    %c2 = arith.constant 2 : index
    %c0_9 = arith.constant 0 : index
    %9 = vector.load %arg1[%c2, %c0_9] : memref<128x96xbf16, #tpu.memory_space<vmem>>, vector<124x96xbf16>
    %c2_10 = arith.constant 2 : index
    %c0_11 = arith.constant 0 : index
    %c0_12 = arith.constant 0 : index
    %10 = vector.load %arg2[%c2_10, %c0_11, %c0_12] : memref<5x96x168xbf16, #tpu.memory_space<vmem>>, vector<1x96x168xbf16>
    %11 = vector.shape_cast %10 : vector<1x96x168xbf16> to vector<96x168xbf16>
    %cst_13 = arith.constant dense<0.000000e+00> : vector<124x168xf32>
    %12 = tpu.matmul %9, %11, %cst_13 {dimension_numbers = #tpu.dot_dimension_numbers<[1], [0], [0], [1], [0, 0, 1, 1], [], []>} : vector<124x96xbf16>, vector<96x168xbf16>, vector<124x168xf32> -> vector<124x168xf32>
    %13 = arith.addf %8, %12 : vector<124x168xf32>
    %c3 = arith.constant 3 : index
    %c0_14 = arith.constant 0 : index
    %14 = vector.load %arg1[%c3, %c0_14] : memref<128x96xbf16, #tpu.memory_space<vmem>>, vector<124x96xbf16>
    %c3_15 = arith.constant 3 : index
    %c0_16 = arith.constant 0 : index
    %c0_17 = arith.constant 0 : index
    %15 = vector.load %arg2[%c3_15, %c0_16, %c0_17] : memref<5x96x168xbf16, #tpu.memory_space<vmem>>, vector<1x96x168xbf16>
    %16 = vector.shape_cast %15 : vector<1x96x168xbf16> to vector<96x168xbf16>
    %cst_18 = arith.constant dense<0.000000e+00> : vector<124x168xf32>
    %17 = tpu.matmul %14, %16, %cst_18 {dimension_numbers = #tpu.dot_dimension_numbers<[1], [0], [0], [1], [0, 0, 1, 1], [], []>} : vector<124x96xbf16>, vector<96x168xbf16>, vector<124x168xf32> -> vector<124x168xf32>
    %18 = arith.addf %13, %17 : vector<124x168xf32>
    %c4 = arith.constant 4 : index
    %c0_19 = arith.constant 0 : index
    %19 = vector.load %arg1[%c4, %c0_19] : memref<128x96xbf16, #tpu.memory_space<vmem>>, vector<124x96xbf16>
    %c4_20 = arith.constant 4 : index
    %c0_21 = arith.constant 0 : index
    %c0_22 = arith.constant 0 : index
    %20 = vector.load %arg2[%c4_20, %c0_21, %c0_22] : memref<5x96x168xbf16, #tpu.memory_space<vmem>>, vector<1x96x168xbf16>
    %21 = vector.shape_cast %20 : vector<1x96x168xbf16> to vector<96x168xbf16>
    %cst_23 = arith.constant dense<0.000000e+00> : vector<124x168xf32>
    %22 = tpu.matmul %19, %21, %cst_23 {dimension_numbers = #tpu.dot_dimension_numbers<[1], [0], [0], [1], [0, 0, 1, 1], [], []>} : vector<124x96xbf16>, vector<96x168xbf16>, vector<124x168xf32> -> vector<124x168xf32>
    %23 = arith.addf %18, %22 : vector<124x168xf32>
    %c0_24 = arith.constant 0 : index
    %c0_25 = arith.constant 0 : index
    %24 = vector.load %arg3[%c0_24, %c0_25] : memref<1x168xf32, #tpu.memory_space<vmem>>, vector<1x168xf32>
    %25 = vector.broadcast %24 : vector<1x168xf32> to vector<124x168xf32>
    %26 = arith.addf %23, %25 : vector<124x168xf32>
    %cst_26 = arith.constant 0.000000e+00 : f32
    %27 = vector.broadcast %cst_26 : f32 to vector<124x168xf32>
    %28 = arith.maximumf %26, %27 : vector<124x168xf32>
    %29 = vector.extract_strided_slice %28 {offsets = [0, 0], sizes = [123, 168], strides = [1, 1]} : vector<124x168xf32> to vector<123x168xf32>
    %30 = vector.extract_strided_slice %28 {offsets = [1, 0], sizes = [123, 168], strides = [1, 1]} : vector<124x168xf32> to vector<123x168xf32>
    %31 = arith.maximumf %29, %30 : vector<123x168xf32>
    %32 = arith.truncf %31 : vector<123x168xf32> to vector<123x168xbf16>
    %c0_27 = arith.constant 0 : index
    %c0_28 = arith.constant 0 : index
    %c0_29 = arith.constant 0 : index
    %33 = vector.load %arg4[%c0_27, %c0_28, %c0_29] : memref<2x168x84xbf16, #tpu.memory_space<vmem>>, vector<1x168x84xbf16>
    %34 = vector.shape_cast %33 : vector<1x168x84xbf16> to vector<168x84xbf16>
    %cst_30 = arith.constant dense<0.000000e+00> : vector<123x84xf32>
    %35 = tpu.matmul %32, %34, %cst_30 {dimension_numbers = #tpu.dot_dimension_numbers<[1], [0], [0], [1], [0, 0, 1, 1], [], []>} : vector<123x168xbf16>, vector<168x84xbf16>, vector<123x84xf32> -> vector<123x84xf32>
    %c1_31 = arith.constant 1 : index
    %c0_32 = arith.constant 0 : index
    %c0_33 = arith.constant 0 : index
    %36 = vector.load %arg4[%c1_31, %c0_32, %c0_33] : memref<2x168x84xbf16, #tpu.memory_space<vmem>>, vector<1x168x84xbf16>
    %37 = vector.shape_cast %36 : vector<1x168x84xbf16> to vector<168x84xbf16>
    %cst_34 = arith.constant dense<0.000000e+00> : vector<123x84xf32>
    %38 = tpu.matmul %32, %37, %cst_34 {dimension_numbers = #tpu.dot_dimension_numbers<[1], [0], [0], [1], [0, 0, 1, 1], [], []>} : vector<123x168xbf16>, vector<168x84xbf16>, vector<123x84xf32> -> vector<123x84xf32>
    %39 = arith.maximumf %35, %38 : vector<123x84xf32>
    %40 = arith.truncf %39 : vector<123x84xf32> to vector<123x84xbf16>
    %41 = vector.extract_strided_slice %40 {offsets = [0, 0], sizes = [115, 84], strides = [1, 1]} : vector<123x84xbf16> to vector<115x84xbf16>
    %c0_35 = arith.constant 0 : index
    %c0_36 = arith.constant 0 : index
    %c0_37 = arith.constant 0 : index
    %42 = vector.load %arg5[%c0_35, %c0_36, %c0_37] : memref<5x84x160xbf16, #tpu.memory_space<vmem>>, vector<1x84x160xbf16>
    %43 = vector.shape_cast %42 : vector<1x84x160xbf16> to vector<84x160xbf16>
    %cst_38 = arith.constant dense<0.000000e+00> : vector<115x160xf32>
    %44 = tpu.matmul %41, %43, %cst_38 {dimension_numbers = #tpu.dot_dimension_numbers<[1], [0], [0], [1], [0, 0, 1, 1], [], []>} : vector<115x84xbf16>, vector<84x160xbf16>, vector<115x160xf32> -> vector<115x160xf32>
    %45 = vector.extract_strided_slice %40 {offsets = [2, 0], sizes = [115, 84], strides = [1, 1]} : vector<123x84xbf16> to vector<115x84xbf16>
    %c1_39 = arith.constant 1 : index
    %c0_40 = arith.constant 0 : index
    %c0_41 = arith.constant 0 : index
    %46 = vector.load %arg5[%c1_39, %c0_40, %c0_41] : memref<5x84x160xbf16, #tpu.memory_space<vmem>>, vector<1x84x160xbf16>
    %47 = vector.shape_cast %46 : vector<1x84x160xbf16> to vector<84x160xbf16>
    %cst_42 = arith.constant dense<0.000000e+00> : vector<115x160xf32>
    %48 = tpu.matmul %45, %47, %cst_42 {dimension_numbers = #tpu.dot_dimension_numbers<[1], [0], [0], [1], [0, 0, 1, 1], [], []>} : vector<115x84xbf16>, vector<84x160xbf16>, vector<115x160xf32> -> vector<115x160xf32>
    %49 = arith.addf %44, %48 : vector<115x160xf32>
    %50 = vector.extract_strided_slice %40 {offsets = [4, 0], sizes = [115, 84], strides = [1, 1]} : vector<123x84xbf16> to vector<115x84xbf16>
    %c2_43 = arith.constant 2 : index
    %c0_44 = arith.constant 0 : index
    %c0_45 = arith.constant 0 : index
    %51 = vector.load %arg5[%c2_43, %c0_44, %c0_45] : memref<5x84x160xbf16, #tpu.memory_space<vmem>>, vector<1x84x160xbf16>
    %52 = vector.shape_cast %51 : vector<1x84x160xbf16> to vector<84x160xbf16>
    %cst_46 = arith.constant dense<0.000000e+00> : vector<115x160xf32>
    %53 = tpu.matmul %50, %52, %cst_46 {dimension_numbers = #tpu.dot_dimension_numbers<[1], [0], [0], [1], [0, 0, 1, 1], [], []>} : vector<115x84xbf16>, vector<84x160xbf16>, vector<115x160xf32> -> vector<115x160xf32>
    %54 = arith.addf %49, %53 : vector<115x160xf32>
    %55 = vector.extract_strided_slice %40 {offsets = [6, 0], sizes = [115, 84], strides = [1, 1]} : vector<123x84xbf16> to vector<115x84xbf16>
    %c3_47 = arith.constant 3 : index
    %c0_48 = arith.constant 0 : index
    %c0_49 = arith.constant 0 : index
    %56 = vector.load %arg5[%c3_47, %c0_48, %c0_49] : memref<5x84x160xbf16, #tpu.memory_space<vmem>>, vector<1x84x160xbf16>
    %57 = vector.shape_cast %56 : vector<1x84x160xbf16> to vector<84x160xbf16>
    %cst_50 = arith.constant dense<0.000000e+00> : vector<115x160xf32>
    %58 = tpu.matmul %55, %57, %cst_50 {dimension_numbers = #tpu.dot_dimension_numbers<[1], [0], [0], [1], [0, 0, 1, 1], [], []>} : vector<115x84xbf16>, vector<84x160xbf16>, vector<115x160xf32> -> vector<115x160xf32>
    %59 = arith.addf %54, %58 : vector<115x160xf32>
    %60 = vector.extract_strided_slice %40 {offsets = [8, 0], sizes = [115, 84], strides = [1, 1]} : vector<123x84xbf16> to vector<115x84xbf16>
    %c4_51 = arith.constant 4 : index
    %c0_52 = arith.constant 0 : index
    %c0_53 = arith.constant 0 : index
    %61 = vector.load %arg5[%c4_51, %c0_52, %c0_53] : memref<5x84x160xbf16, #tpu.memory_space<vmem>>, vector<1x84x160xbf16>
    %62 = vector.shape_cast %61 : vector<1x84x160xbf16> to vector<84x160xbf16>
    %cst_54 = arith.constant dense<0.000000e+00> : vector<115x160xf32>
    %63 = tpu.matmul %60, %62, %cst_54 {dimension_numbers = #tpu.dot_dimension_numbers<[1], [0], [0], [1], [0, 0, 1, 1], [], []>} : vector<115x84xbf16>, vector<84x160xbf16>, vector<115x160xf32> -> vector<115x160xf32>
    %64 = arith.addf %59, %63 : vector<115x160xf32>
    %c0_55 = arith.constant 0 : index
    %c0_56 = arith.constant 0 : index
    %65 = vector.load %arg6[%c0_55, %c0_56] : memref<1x160xf32, #tpu.memory_space<vmem>>, vector<1x160xf32>
    %66 = vector.broadcast %65 : vector<1x160xf32> to vector<115x160xf32>
    %67 = arith.addf %64, %66 : vector<115x160xf32>
    %cst_57 = arith.constant 0.000000e+00 : f32
    %68 = vector.broadcast %cst_57 : f32 to vector<115x160xf32>
    %69 = arith.maximumf %67, %68 : vector<115x160xf32>
    %70 = vector.extract_strided_slice %69 {offsets = [0, 0], sizes = [113, 160], strides = [1, 1]} : vector<115x160xf32> to vector<113x160xf32>
    %71 = vector.extract_strided_slice %69 {offsets = [2, 0], sizes = [113, 160], strides = [1, 1]} : vector<115x160xf32> to vector<113x160xf32>
    %72 = arith.maximumf %70, %71 : vector<113x160xf32>
    %73 = arith.truncf %72 : vector<113x160xf32> to vector<113x160xbf16>
    %c0_58 = arith.constant 0 : index
    %c0_59 = arith.constant 0 : index
    %c0_60 = arith.constant 0 : index
    %74 = vector.load %arg7[%c0_58, %c0_59, %c0_60] : memref<2x160x80xbf16, #tpu.memory_space<vmem>>, vector<1x160x80xbf16>
    %75 = vector.shape_cast %74 : vector<1x160x80xbf16> to vector<160x80xbf16>
    %cst_61 = arith.constant dense<0.000000e+00> : vector<113x80xf32>
    %76 = tpu.matmul %73, %75, %cst_61 {dimension_numbers = #tpu.dot_dimension_numbers<[1], [0], [0], [1], [0, 0, 1, 1], [], []>} : vector<113x160xbf16>, vector<160x80xbf16>, vector<113x80xf32> -> vector<113x80xf32>
    %c1_62 = arith.constant 1 : index
    %c0_63 = arith.constant 0 : index
    %c0_64 = arith.constant 0 : index
    %77 = vector.load %arg7[%c1_62, %c0_63, %c0_64] : memref<2x160x80xbf16, #tpu.memory_space<vmem>>, vector<1x160x80xbf16>
    %78 = vector.shape_cast %77 : vector<1x160x80xbf16> to vector<160x80xbf16>
    %cst_65 = arith.constant dense<0.000000e+00> : vector<113x80xf32>
    %79 = tpu.matmul %73, %78, %cst_65 {dimension_numbers = #tpu.dot_dimension_numbers<[1], [0], [0], [1], [0, 0, 1, 1], [], []>} : vector<113x160xbf16>, vector<160x80xbf16>, vector<113x80xf32> -> vector<113x80xf32>
    %80 = arith.maximumf %76, %79 : vector<113x80xf32>
    %81 = arith.truncf %80 : vector<113x80xf32> to vector<113x80xbf16>
    %82 = vector.extract_strided_slice %81 {offsets = [0, 0], sizes = [97, 80], strides = [1, 1]} : vector<113x80xbf16> to vector<97x80xbf16>
    %c0_66 = arith.constant 0 : index
    %c0_67 = arith.constant 0 : index
    %c0_68 = arith.constant 0 : index
    %83 = vector.load %arg8[%c0_66, %c0_67, %c0_68] : memref<5x80x120xbf16, #tpu.memory_space<vmem>>, vector<1x80x120xbf16>
    %84 = vector.shape_cast %83 : vector<1x80x120xbf16> to vector<80x120xbf16>
    %cst_69 = arith.constant dense<0.000000e+00> : vector<97x120xf32>
    %85 = tpu.matmul %82, %84, %cst_69 {dimension_numbers = #tpu.dot_dimension_numbers<[1], [0], [0], [1], [0, 0, 1, 1], [], []>} : vector<97x80xbf16>, vector<80x120xbf16>, vector<97x120xf32> -> vector<97x120xf32>
    %86 = vector.extract_strided_slice %81 {offsets = [4, 0], sizes = [97, 80], strides = [1, 1]} : vector<113x80xbf16> to vector<97x80xbf16>
    %c1_70 = arith.constant 1 : index
    %c0_71 = arith.constant 0 : index
    %c0_72 = arith.constant 0 : index
    %87 = vector.load %arg8[%c1_70, %c0_71, %c0_72] : memref<5x80x120xbf16, #tpu.memory_space<vmem>>, vector<1x80x120xbf16>
    %88 = vector.shape_cast %87 : vector<1x80x120xbf16> to vector<80x120xbf16>
    %cst_73 = arith.constant dense<0.000000e+00> : vector<97x120xf32>
    %89 = tpu.matmul %86, %88, %cst_73 {dimension_numbers = #tpu.dot_dimension_numbers<[1], [0], [0], [1], [0, 0, 1, 1], [], []>} : vector<97x80xbf16>, vector<80x120xbf16>, vector<97x120xf32> -> vector<97x120xf32>
    %90 = arith.addf %85, %89 : vector<97x120xf32>
    %91 = vector.extract_strided_slice %81 {offsets = [8, 0], sizes = [97, 80], strides = [1, 1]} : vector<113x80xbf16> to vector<97x80xbf16>
    %c2_74 = arith.constant 2 : index
    %c0_75 = arith.constant 0 : index
    %c0_76 = arith.constant 0 : index
    %92 = vector.load %arg8[%c2_74, %c0_75, %c0_76] : memref<5x80x120xbf16, #tpu.memory_space<vmem>>, vector<1x80x120xbf16>
    %93 = vector.shape_cast %92 : vector<1x80x120xbf16> to vector<80x120xbf16>
    %cst_77 = arith.constant dense<0.000000e+00> : vector<97x120xf32>
    %94 = tpu.matmul %91, %93, %cst_77 {dimension_numbers = #tpu.dot_dimension_numbers<[1], [0], [0], [1], [0, 0, 1, 1], [], []>} : vector<97x80xbf16>, vector<80x120xbf16>, vector<97x120xf32> -> vector<97x120xf32>
    %95 = arith.addf %90, %94 : vector<97x120xf32>
    %96 = vector.extract_strided_slice %81 {offsets = [12, 0], sizes = [97, 80], strides = [1, 1]} : vector<113x80xbf16> to vector<97x80xbf16>
    %c3_78 = arith.constant 3 : index
    %c0_79 = arith.constant 0 : index
    %c0_80 = arith.constant 0 : index
    %97 = vector.load %arg8[%c3_78, %c0_79, %c0_80] : memref<5x80x120xbf16, #tpu.memory_space<vmem>>, vector<1x80x120xbf16>
    %98 = vector.shape_cast %97 : vector<1x80x120xbf16> to vector<80x120xbf16>
    %cst_81 = arith.constant dense<0.000000e+00> : vector<97x120xf32>
    %99 = tpu.matmul %96, %98, %cst_81 {dimension_numbers = #tpu.dot_dimension_numbers<[1], [0], [0], [1], [0, 0, 1, 1], [], []>} : vector<97x80xbf16>, vector<80x120xbf16>, vector<97x120xf32> -> vector<97x120xf32>
    %100 = arith.addf %95, %99 : vector<97x120xf32>
    %101 = vector.extract_strided_slice %81 {offsets = [16, 0], sizes = [97, 80], strides = [1, 1]} : vector<113x80xbf16> to vector<97x80xbf16>
    %c4_82 = arith.constant 4 : index
    %c0_83 = arith.constant 0 : index
    %c0_84 = arith.constant 0 : index
    %102 = vector.load %arg8[%c4_82, %c0_83, %c0_84] : memref<5x80x120xbf16, #tpu.memory_space<vmem>>, vector<1x80x120xbf16>
    %103 = vector.shape_cast %102 : vector<1x80x120xbf16> to vector<80x120xbf16>
    %cst_85 = arith.constant dense<0.000000e+00> : vector<97x120xf32>
    %104 = tpu.matmul %101, %103, %cst_85 {dimension_numbers = #tpu.dot_dimension_numbers<[1], [0], [0], [1], [0, 0, 1, 1], [], []>} : vector<97x80xbf16>, vector<80x120xbf16>, vector<97x120xf32> -> vector<97x120xf32>
    %105 = arith.addf %100, %104 : vector<97x120xf32>
    %c0_86 = arith.constant 0 : index
    %c0_87 = arith.constant 0 : index
    %106 = vector.load %arg14[%c0_86, %c0_87] : memref<4x97xbf16, #tpu.memory_space<vmem>>, vector<4x97xbf16>
    %107 = arith.truncf %105 : vector<97x120xf32> to vector<97x120xbf16>
    %cst_88 = arith.constant dense<0.000000e+00> : vector<4x120xf32>
    %108 = tpu.matmul %106, %107, %cst_88 {dimension_numbers = #tpu.dot_dimension_numbers<[1], [0], [0], [1], [0, 0, 1, 1], [], []>} : vector<4x97xbf16>, vector<97x120xbf16>, vector<4x120xf32> -> vector<4x120xf32>
    %c0_89 = arith.constant 0 : index
    %c0_90 = arith.constant 0 : index
    %109 = vector.load %arg9[%c0_89, %c0_90] : memref<1x120xf32, #tpu.memory_space<vmem>>, vector<1x120xf32>
    %110 = vector.broadcast %109 : vector<1x120xf32> to vector<4x120xf32>
    %111 = arith.addf %108, %110 : vector<4x120xf32>
    %cst_91 = arith.constant 0.000000e+00 : f32
    %112 = vector.broadcast %cst_91 : f32 to vector<4x120xf32>
    %113 = arith.maximumf %111, %112 : vector<4x120xf32>
    %114 = arith.truncf %113 : vector<4x120xf32> to vector<4x120xbf16>
    %c0_92 = arith.constant 0 : index
    %c0_93 = arith.constant 0 : index
    %115 = vector.load %arg10[%c0_92, %c0_93] : memref<120x84xbf16, #tpu.memory_space<vmem>>, vector<120x84xbf16>
    %cst_94 = arith.constant dense<0.000000e+00> : vector<4x84xf32>
    %116 = tpu.matmul %114, %115, %cst_94 {dimension_numbers = #tpu.dot_dimension_numbers<[1], [0], [0], [1], [0, 0, 1, 1], [], []>} : vector<4x120xbf16>, vector<120x84xbf16>, vector<4x84xf32> -> vector<4x84xf32>
    %c0_95 = arith.constant 0 : index
    %c0_96 = arith.constant 0 : index
    %117 = vector.load %arg11[%c0_95, %c0_96] : memref<1x84xf32, #tpu.memory_space<vmem>>, vector<1x84xf32>
    %118 = vector.broadcast %117 : vector<1x84xf32> to vector<4x84xf32>
    %119 = arith.addf %116, %118 : vector<4x84xf32>
    %cst_97 = arith.constant 0.000000e+00 : f32
    %120 = vector.broadcast %cst_97 : f32 to vector<4x84xf32>
    %121 = arith.maximumf %119, %120 : vector<4x84xf32>
    %122 = arith.truncf %121 : vector<4x84xf32> to vector<4x84xbf16>
    %c0_98 = arith.constant 0 : index
    %c0_99 = arith.constant 0 : index
    %123 = vector.load %arg12[%c0_98, %c0_99] : memref<84x10xbf16, #tpu.memory_space<vmem>>, vector<84x10xbf16>
    %cst_100 = arith.constant dense<0.000000e+00> : vector<4x10xf32>
    %124 = tpu.matmul %122, %123, %cst_100 {dimension_numbers = #tpu.dot_dimension_numbers<[1], [0], [0], [1], [0, 0, 1, 1], [], []>} : vector<4x84xbf16>, vector<84x10xbf16>, vector<4x10xf32> -> vector<4x10xf32>
    %c0_101 = arith.constant 0 : index
    %c0_102 = arith.constant 0 : index
    %125 = vector.load %arg13[%c0_101, %c0_102] : memref<1x10xf32, #tpu.memory_space<vmem>>, vector<1x10xf32>
    %126 = vector.broadcast %125 : vector<1x10xf32> to vector<4x10xf32>
    %127 = arith.addf %124, %126 : vector<4x10xf32>
    %c0_103 = arith.constant 0 : index
    %c0_104 = arith.constant 0 : index
    %c0_105 = arith.constant 0 : index
    %128 = vector.load %arg15[%c0_103, %c0_104, %c0_105] : memref<1x4x10xf32, #tpu.memory_space<vmem>>, vector<1x4x10xf32>
    %129 = vector.shape_cast %128 : vector<1x4x10xf32> to vector<4x10xf32>
    %130 = vector.shape_cast %127 : vector<4x10xf32> to vector<1x4x10xf32>
    tpu.vector_store %arg15[%c0_103, %c0_104, %c0_105], %130 {strides = array<i32>} : memref<1x4x10xf32, #tpu.memory_space<vmem>>, vector<1x4x10xf32>,
    return
  }
  func.func @transform_0(%arg0: i32) -> (i32, i32) {
    %c0_i32 = arith.constant 0 : i32
    %c0_i32_0 = arith.constant 0 : i32
    return %arg0, %c0_i32 : i32, i32
  }
  func.func @transform_1(%arg0: i32) -> (i32, i32, i32) {
    %c0_i32 = arith.constant 0 : i32
    %c0_i32_0 = arith.constant 0 : i32
    %c0_i32_1 = arith.constant 0 : i32
    %c0_i32_2 = arith.constant 0 : i32
    return %c0_i32, %c0_i32_0, %c0_i32_1 : i32, i32, i32
  }
  func.func @transform_2(%arg0: i32) -> (i32, i32) {
    %c0_i32 = arith.constant 0 : i32
    %c0_i32_0 = arith.constant 0 : i32
    %c0_i32_1 = arith.constant 0 : i32
    return %c0_i32, %c0_i32_0 : i32, i32
  }
  func.func @transform_3(%arg0: i32) -> (i32, i32, i32) {
    %c0_i32 = arith.constant 0 : i32
    %c0_i32_0 = arith.constant 0 : i32
    %c0_i32_1 = arith.constant 0 : i32
    %c0_i32_2 = arith.constant 0 : i32
    return %c0_i32, %c0_i32_0, %c0_i32_1 : i32, i32, i32
  }
  func.func @transform_4(%arg0: i32) -> (i32, i32, i32) {
    %c0_i32 = arith.constant 0 : i32
    %c0_i32_0 = arith.constant 0 : i32
    %c0_i32_1 = arith.constant 0 : i32
    %c0_i32_2 = arith.constant 0 : i32
    return %c0_i32, %c0_i32_0, %c0_i32_1 : i32, i32, i32
  }
  func.func @transform_5(%arg0: i32) -> (i32, i32) {
    %c0_i32 = arith.constant 0 : i32
    %c0_i32_0 = arith.constant 0 : i32
    %c0_i32_1 = arith.constant 0 : i32
    return %c0_i32, %c0_i32_0 : i32, i32
  }
  func.func @transform_6(%arg0: i32) -> (i32, i32, i32) {
    %c0_i32 = arith.constant 0 : i32
    %c0_i32_0 = arith.constant 0 : i32
    %c0_i32_1 = arith.constant 0 : i32
    %c0_i32_2 = arith.constant 0 : i32
    return %c0_i32, %c0_i32_0, %c0_i32_1 : i32, i32, i32
  }
  func.func @transform_7(%arg0: i32) -> (i32, i32, i32) {
    %c0_i32 = arith.constant 0 : i32
    %c0_i32_0 = arith.constant 0 : i32
    %c0_i32_1 = arith.constant 0 : i32
    %c0_i32_2 = arith.constant 0 : i32
    return %c0_i32, %c0_i32_0, %c0_i32_1 : i32, i32, i32
  }
  func.func @transform_8(%arg0: i32) -> (i32, i32) {
    %c0_i32 = arith.constant 0 : i32
    %c0_i32_0 = arith.constant 0 : i32
    %c0_i32_1 = arith.constant 0 : i32
    return %c0_i32, %c0_i32_0 : i32, i32
  }
  func.func @transform_9(%arg0: i32) -> (i32, i32) {
    %c0_i32 = arith.constant 0 : i32
    %c0_i32_0 = arith.constant 0 : i32
    %c0_i32_1 = arith.constant 0 : i32
    return %c0_i32, %c0_i32_0 : i32, i32
  }
  func.func @transform_10(%arg0: i32) -> (i32, i32) {
    %c0_i32 = arith.constant 0 : i32
    %c0_i32_0 = arith.constant 0 : i32
    %c0_i32_1 = arith.constant 0 : i32
    return %c0_i32, %c0_i32_0 : i32, i32
  }
  func.func @transform_11(%arg0: i32) -> (i32, i32) {
    %c0_i32 = arith.constant 0 : i32
    %c0_i32_0 = arith.constant 0 : i32
    %c0_i32_1 = arith.constant 0 : i32
    return %c0_i32, %c0_i32_0 : i32, i32
  }
  func.func @transform_12(%arg0: i32) -> (i32, i32) {
    %c0_i32 = arith.constant 0 : i32
    %c0_i32_0 = arith.constant 0 : i32
    %c0_i32_1 = arith.constant 0 : i32
    return %c0_i32, %c0_i32_0 : i32, i32
  }
  func.func @transform_13(%arg0: i32) -> (i32, i32) {
    %c0_i32 = arith.constant 0 : i32
    %c0_i32_0 = arith.constant 0 : i32
    %c0_i32_1 = arith.constant 0 : i32
    return %c0_i32, %c0_i32_0 : i32, i32
  }
  func.func @transform_14(%arg0: i32) -> (i32, i32, i32) {
    %c0_i32 = arith.constant 0 : i32
    %c0_i32_0 = arith.constant 0 : i32
    %c0_i32_1 = arith.constant 0 : i32
    return %arg0, %c0_i32, %c0_i32_0 : i32, i32, i32
  }
}

</mosaic_0001>

<bundles_post_ra>
// kernel: lenet_forward.1
= control target key start
LH: loop header
LB: loop body
LE: loop exit
PB: predicated region body
PF: predicated region fallthrough
CT: control target
= control target key end

     0   :  { %s9113_s0 = inlined_call_operand.vmem [shape: bf16[256,96], index: 0, kind: input, shape index: {}]   ;;  %s9114_s1 = inlined_call_operand.vmem [shape: bf16[5,96,168], index: 1, kind: input, shape index: {}]   ;;  %s9115_s2 = inlined_call_operand.vmem [shape: f32[1,168], index: 2, kind: input, shape index: {}]   ;;  %s9116_s3 = inlined_call_operand.vmem [shape: bf16[2,168,84], index: 3, kind: input, shape index: {}]   ;;  %s9117_s4 = inlined_call_operand.vmem [shape: bf16[5,84,160], index: 4, kind: input, shape index: {}]   ;;  %s9118_s5 = inlined_call_operand.vmem [shape: f32[1,160], index: 5, kind: input, shape index: {}]   ;;  %s9119_s6 = inlined_call_operand.vmem [shape: bf16[2,160,80], index: 6, kind: input, shape index: {}]   ;;  %s9120_s7 = inlined_call_operand.vmem [shape: bf16[5,80,120], index: 7, kind: input, shape index: {}]   ;;  %s9121_s8 = inlined_call_operand.vmem [shape: f32[1,120], index: 8, kind: input, shape index: {}]   ;;  %s9122_s9 = inlined_call_operand.vmem [shape: bf16[120,84], index: 9, kind: input, shape index: {}]   ;;  %s9123_s10 = inlined_call_operand.vmem [shape: f32[1,84], index: 10, kind: input, shape index: {}]   ;;  %s9124_s11 = inlined_call_operand.vmem [shape: bf16[84,10], index: 11, kind: input, shape index: {}]   ;;  %s9125_s12 = inlined_call_operand.vmem [shape: f32[1,10], index: 12, kind: input, shape index: {}]   ;;  %s9126_s13 = inlined_call_operand.vmem [shape: bf16[4,97], index: 13, kind: input, shape index: {}]   ;;  %s9127_s14 = inlined_call_operand.hbm [shape: f32[2,4,10], index: 14, kind: output, shape index: {}]  }
   0x1   :  { %9129 = sst [smem:[#allocation7_spill]] %s9113_s0 }
   0x2   :  { %19 = vsyncpa [#allocation3], 0 }
   0x3   :  { %21 = vsyncpa [#allocation3 + $0x1], 0  ;;  %s7200_s29 = smov 0   ;;  %s7202_s30 = smov 0  }
   0x4   :  { %s7204_s15 = smov 0   ;;  %s7206_s16 = smov 0  }
   0x5 LB: > { %9130 = sst [smem:[#allocation5_spill]] %s7115_s15  ;;  %s7221_s17 = sadd.s32 4294967295, %s7119_s16   ;;  %s7119_s16 = sphi %s7206_s16, %s9140_s16   ;;  %s7115_s15 = sphi %s7204_s15, %s9139_s15   ;;  %s7111_s30 = sphi %s7202_s30, %s9138_s30   ;;  %s7107_s29 = sphi %s7200_s29, %s9137_s29  }
   0x6   : > { %s5500_s18 = sadd.s32 4294967294, %s7119_s16   ;;  %s7225_s19 = sadd.s32 1, %s7119_s16  }
   0x7   : > { %s333_s20 = sadd.s32 1, %s7115_s15  ;;  %s330_s21 = ssub.s32 %s7119_s16, %s7225_s19 }
   0x8   : > { %p343_p0 = scmp.ne.s32.totalorder %s7115_s15, %s7111_s30  ;;  %p331_p1 = scmp.eq.s32.totalorder %s330_s21, 0 }
   0x9   : > { %p344_p2 = scmp.eq.s32.totalorder %s7221_s17, 1  ;;  %p349_p3 = scmp.ne.s32.totalorder %s7111_s30, %s7107_s29 }
   0xa   : > { %p350_p4 = scmp.eq.s32.totalorder %s5500_s18, 1  ;;  %p5503_p7 = scmp.ge.s32.totalorder %s7119_s16, 1 }
   0xb   : > { %s7236_s22 = scalar_select %p331_p1, %s7115_s15, %s333_s20  }
   0xc   : > { %p7238_p5 = por %p344_p2, %p343_p0  ;;  %p7242_p6 = por %p350_p4, %p349_p3 }
   0xd   : > { %9131 = sst [smem:[#allocation6_spill]] %s7236_s22  ;;  %p416_p8 = scmp.lt.s32.totalorder %s7119_s16, 3 }
   0xf   : > { %p417_p9 = pnand %p5503_p7, %p416_p8 }
  0x10   : > { %v7251_v0 = vld [vmem:[%s9114_s1 + $0x4] ss:$8 sps:$4 sm:$0xff] (!%p417_p9)   ;;  %s5505_s27 = sshll.u32 (!%p417_p9), %s7221_s17, 4  ;;  %v7257_v1 = vld [vmem:[%s9114_s1] ss:$8 sps:$4 sm:$0xff] (!%p417_p9)   ;;  %v7121_v2 = vmov (!%p417_p9), 0  }
  0x11   : > { %420 = sbr.rel (%p417_p9) target bundleno = 2661 (0xa65), region = 76  ;;  %925 = vmatprep.mubr.bf16.mxu0 (!%p417_p9), %v7121_v2  ;;  %p463_p10 = scmp.lt.s32.totalorder (!%p417_p9), %s5505_s27, 31  ;;  %732 = vmatprep.mubr.bf16.mxu1 (!%p417_p9), %v7121_v2  ;;  %v7265_v3 = vld [vmem:[%s9114_s1 + $0x14] ss:$8 sps:$4 sm:$0xff] (!%p417_p9)   ;;  %v7271_v4 = vld [vmem:[%s9114_s1 + $0x10] ss:$8 sps:$4 sm:$0xff] (!%p417_p9)  }
  0x12   : > { %893 = vmatprep.subr.bf16.mxu0 (!%p417_p9), %v7251_v0  ;;  %v7277_v5 = vld [vmem:[%s9114_s1 + $0x24] ss:$8 sps:$4 sm:$0xff] (!%p417_p9)   ;;  %s9134_s0 = sld [smem:[#allocation7_spill]] (!%p417_p9)  ;;  %v7288_v6 = vld [vmem:[%s9114_s1 + $0x20] ss:$8 sps:$4 sm:$0xff] (!%p417_p9)   ;;  %vm675_vm0 = vcmask (!%p417_p9), 785408  }
  0x13   : > { %894 = vmatpush1.bf16.msra.mxu0 (!%p417_p9), %v7257_v1  ;;  %v7294_v7 = vld [vmem:[%s9114_s1 + $0x34] ss:$8 sps:$4 sm:$0xff] (!%p417_p9)   ;;  %v7308_v11 = vld [vmem:[%s9114_s1 + $0x30] ss:$8 sps:$4 sm:$0xff] (!%p417_p9)   ;;  %v7314_v12 = vld [vmem:[%s9114_s1 + $0x44] ss:$8 sps:$4 sm:$0xff] (!%p417_p9)  }
  0x14   : > { %895 = vmatprep.subr.bf16.mxu0 (!%p417_p9), %v7265_v3  ;;  %v7320_v13 = vld [vmem:[%s9114_s1 + $0x40] ss:$8 sps:$4 sm:$0xff] (!%p417_p9)   ;;  %v7326_v14 = vld [vmem:[%s9114_s1 + $0x54] ss:$8 sps:$4 sm:$0xff] (!%p417_p9)   ;;  %v7331_v15 = vld [vmem:[%s9114_s1 + $0x50] ss:$8 sps:$4 sm:$0xff] (!%p417_p9)  }
  0x15   : > { %v6812_v17 = vld [vmem:[%s9114_s1 + $0xc4] ss:$8 sps:$4 sm:$0xff] (!%p417_p9)   ;;  %v6810_v18 = vld [vmem:[%s9114_s1 + $0xc0] ss:$8 sps:$4 sm:$0xff] (!%p417_p9)   ;;  %v6815_v23 = vld [vmem:[%s9114_s1 + $0xd4] ss:$8 sps:$4 sm:$0xff] (!%p417_p9)  }
  0x16   : > { %v6834_v20 = vld [vmem:[%s9114_s1 + $0x64] ss:$8 sps:$4 sm:$0xff] (!%p417_p9)   ;;  %v6836_v21 = vld [vmem:[%s9114_s1 + $0x60] ss:$8 sps:$4 sm:$0xff] (!%p417_p9)   ;;  %v6813_v24 = vld [vmem:[%s9114_s1 + $0xd0] ss:$8 sps:$4 sm:$0xff] (!%p417_p9)  }
  0x17   : > { %896 = vmatpush1.bf16.msra.mxu0 (!%p417_p9), %v7271_v4  ;;  %700 = vmatprep.subr.bf16.mxu1 (!%p417_p9), %v6834_v20  ;;  %v6819_v27 = vld [vmem:[%s9114_s1 + $0xe4] ss:$8 sps:$4 sm:$0xff] (!%p417_p9)   ;;  %v6841_v28 = vld [vmem:[%s9114_s1 + $0x74] ss:$8 sps:$4 sm:$0xff] (!%p417_p9)   ;;  %v6843_v29 = vld [vmem:[%s9114_s1 + $0x70] ss:$8 sps:$4 sm:$0xff] (!%p417_p9)  }
  0x18   : > { %s9142_s27 = smov (!%p463_p10, %s5505_s27), 31  ;;  %897 = vmatprep.subr.bf16.mxu0 %v7277_v5  ;;  %701 = vmatpush1.bf16.msra.mxu1 %v6836_v21  ;;  %v6844_v31 = vld [vmem:[%s9114_s1 + $0x84] ss:$8 sps:$4 sm:$0xff]   ;;  %v6846_v37 = vld [vmem:[%s9114_s1 + $0x80] ss:$8 sps:$4 sm:$0xff]   ;;  %vm1023_vm3 = vcmask 1046528  }
  0x19   : > { %s5506_s22 = sshll.u32 %s9142_s27, 2  ;;  %702 = vmatprep.subr.bf16.mxu1 %v6841_v28  ;;  %v6848_v39 = vld [vmem:[%s9114_s1 + $0x94] ss:$8 sps:$4 sm:$0xff]   ;;  %v6817_v41 = vld [vmem:[%s9114_s1 + $0xe0] ss:$8 sps:$4 sm:$0xff]   ;;  %vm1573_vm4 = vcmask 1045504  }
  0x1a   : > { %s7282_s21 = scalar_lea.vmem %s9134_s0, %s5506_s22  ;;  %vm1285_vm1 = vsmask.f32 6400  ;;  %v6822_v43 = vld [vmem:[%s9114_s1 + $0xf4] ss:$8 sps:$4 sm:$0xff]   ;;  %v6850_v49 = vld [vmem:[%s9114_s1 + $0x90] ss:$8 sps:$4 sm:$0xff]  }
  0x1b   : > { %v7297_v8 = vld [vmem:[%s7282_s21 + $0x4] sm:$0xf]  ;;  %v7300_v9 = vld [vmem:[%s7282_s21] sm:$0xc]  ;;  %898 = vmatpush1.bf16.msra.mxu0 %v7288_v6  ;;  %v7353_v22 = vld [vmem:[%s7282_s21 + $0x8] sm:$0xff]   ;;  %vm2178_vm5 = vcmask 1043456  }
  0x1c   : > { %v5646_v10 = vcombine.low %v7300_v9, %v7297_v8  ;;  %899 = vmatprep.subr.bf16.mxu0 %v7294_v7  ;;  %v469_v16 = vld [vmem:[%s7282_s21] sm:$0xf]  ;;  %v7362_v25 = vld [vmem:[%s7282_s21 + $0x10] sm:$0xff]   ;;  %v560_v26 = vshll.u32 %v7353_v22, 16  ;;  %v564_v30 = vshrl.u32 %v7353_v22, 16  ;;  %v7386_v35 = vld [vmem:[%s7282_s21 + $0x18] sm:$0xff]   ;;  %703 = vmatpush1.bf16.msra.mxu1 %v6843_v29 }
  0x1d   : > { %v7343_v19 = vcombine.low %v469_v16, %v7297_v8  ;;  %v568_v33 = vshll.u32 %v7362_v25, 16  ;;  %v572_v34 = vshrl.u32 %v7362_v25, 16  ;;  %704 = vmatprep.subr.bf16.mxu1 %v6844_v31  ;;  %v7408_v44 = vld [vmem:[%s7282_s21 + $0x20] sm:$0xff]   ;;  %v576_v45 = vshll.u32 %v7386_v35, 16  ;;  %v6820_v54 = vld [vmem:[%s9114_s1 + $0xf0] ss:$8 sps:$4 sm:$0xff]  }
  0x1e   : > { %v1295_v32 = vrot.slane %v560_v26, 2  ;;  %v1294_v36 = vrot.slane %v564_v30, 1  ;;  %v580_v47 = vshrl.u32 %v7386_v35, 16  ;;  %v6854_v50 = vld [vmem:[%s9114_s1 + $0xa4] ss:$8 sps:$4 sm:$0xff]   ;;  %v588_v57 = vshrl.u32 %v7408_v44, 16 }
  0x1f   : > { %900 = vmatpush1.bf16.msra.mxu0 %v7308_v11  ;;  %v1298_v38 = vrot.slane %v572_v34, 1  ;;  %v1299_v40 = vrot.slane %v568_v33, 2  ;;  %v555_v42 = vshll.u32 %v7343_v19, 16  ;;  %v1303_v53 = vrot.slane %v576_v45, 2  ;;  %v1006_v55 = vld [vmem:[%s7282_s21] sm:$0xe] }
  0x20   : > { %901 = vmatprep.subr.bf16.mxu0 %v7314_v12  ;;  %v7411_v46 = vor.u32 %v1295_v32, %v1294_v36  ;;  %705 = vmatpush1.bf16.msra.mxu1 %v6846_v37  ;;  %v1302_v52 = vrot.slane %v580_v47, 1  ;;  %v6826_v56 = vld [vmem:[%s9114_s1 + $0x104] ss:$8 sps:$4 sm:$0xff]   ;;  %v6824_v59 = vld [vmem:[%s9114_s1 + $0x100] ss:$8 sps:$4 sm:$0xff]   ;;  %v553_v61 = vshrl.u32 %v7343_v19, 16  ;;  %v7459_v21 = vcombine.low %v1006_v55, %v7297_v8 }
  0x21   : > { %v1300_v48 = vor.u32 %v1299_v40, %v1298_v38  ;;  %706 = vmatprep.subr.bf16.mxu1 %v6848_v39  ;;  %v6856_v60 = vld [vmem:[%s9114_s1 + $0xa0] ss:$8 sps:$4 sm:$0xff]   ;;  %v557_v62 = vrot.slane %v555_v42, 1  ;;  %v6858_v16 = vld [vmem:[%s9114_s1 + $0xb4] ss:$8 sps:$4 sm:$0xff]   ;;  %v1306_v20 = vrot.slane %v588_v57, 1 }
  0x22   : > { %v1304_v58 = vor.u32 %v1303_v53, %v1302_v52  ;;  %v7447_v63 = vld [vmem:[%s7282_s21 + $0x28] sm:$0xff]   ;;  %vm551_vm2 = vsmask.f32 7424  ;;  %v6860_v29 = vld [vmem:[%s9114_s1 + $0xb0] ss:$8 sps:$4 sm:$0xff]   ;;  %v562_v32 = vrot.slane %v560_v26, 1 }
  0x23   : > { %902 = vmatpush1.bf16.msra.mxu0 %v7320_v13  ;;  %v7424_v51 = vsel %vm1285_vm1, %v7411_v46, %v1300_v48  ;;  %v558_v31 = vor.u32 %v557_v62, %v553_v61  ;;  %v6827_v26 = vld [vmem:[%s9114_s1 + $0x110] ss:$8 sps:$4 sm:$0xff]   ;;  %v1025_v42 = vrot.slane %v7353_v22, 1  ;;  %v1574_v53 = vrot.slane %v5646_v10, 2  ;;  %v6830_v9 = vld [vmem:[%s9114_s1 + $0x120] ss:$8 sps:$4 sm:$0xff]  }
  0x24   : > { %903 = vmatprep.subr.bf16.mxu0 %v7326_v14  ;;  %707 = vmatpush1.bf16.msra.mxu1 %v6850_v49  ;;  %v570_v10 = vrot.slane %v568_v33, 1  ;;  %v6839_v62 = vld [vmem:[%s9114_s1 + $0x134] ss:$8 sps:$4 sm:$0xff]   ;;  %v6837_v33 = vld [vmem:[%s9114_s1 + $0x130] ss:$8 sps:$4 sm:$0xff]   ;;  %vm2153_vm6 = vcmask 326656  }
  0x25   : > { %708 = vmatprep.subr.bf16.mxu1 %v6854_v50  ;;  %v563_v55 = vsel %vm551_vm2, %v558_v31, %v562_v32  ;;  %v6853_v31 = vld [vmem:[%s9114_s1 + $0x144] ss:$8 sps:$4 sm:$0xff]   ;;  %vm2614_vm7 = vcmask 1041408   ;;  %vm2589_vm8 = vcmask 687104   ;;  %vm3193_vm9 = vcmask 1044480   ;;  %s459_s15 = sand.u32 1, %s7111_s30  }
  0x26   : > { %vm4006_vm10 = vcmask 261120   ;;  %vm7123_vm11 = vmmov 0   ;;  %vm4398_vm12 = vcmask 654336   ;;  %vm5164_vm13 = vcmask 1040384   ;;  %s5504_s22 = sshll.u32 %s459_s15, 2  ;;  %s6052_s20 = sshll.u32 %s7221_s17, 6 }
  0x27   : > { %904 = vmatpush1.bf16.msra.mxu0 %v7331_v15  ;;  %vm5160_vm14 = vcmask 793600   ;;  %vm5279_vm15 = vcmask 982016   ;;  %s461_s25 = scalar_lea.vmem [#allocation2], %s5504_s22  ;;  %s9071_s18 = scalar_lea.hbm %s9127_s14, %s6052_s20 }
  0x28   : > { %1123 = vmatprep.subr.bf16.mxu0 %v6812_v17  ;;  %v584_v17 = vshll.u32 %v7408_v44, 16  ;;  %709 = vmatpush1.bf16.msra.mxu1 %v6856_v60  ;;  %s5441_s0 = sshll.u32 %s461_s25, 4  ;;  %s5428_s17 = scalar_lea.sflag [#allocation3], %s459_s15  ;;  %s9073_s0 = int_to_ptr.vmem [resolvable:$true] %s5441_s0 }
  0x29   : > { %710 = vmatprep.subr.bf16.mxu1 %v6858_v16  ;;  %v578_v16 = vrot.slane %v576_v45, 1  ;;  %s7057_s22 = scalar_lea.vmem %s9073_s0, 64 }
  0x2a   : > { %5560 = vmatmul.mubr.msk.bf16.vlgmr.msra.gmra.mrb[0].mxu0 %vm675_vm0, %v7343_v19  ;;  %v6829_v19 = vld [vmem:[%s9114_s1 + $0x114] ss:$8 sps:$4 sm:$0xff]   ;;  %v1307_v28 = vrot.slane %v584_v17, 2  ;;  %p7058_p11 = scmp.ne.s32.totalorder %s9073_s0, %s7057_s22 }
  0x2b   : > { %1124 = vmatpush1.bf16.msra.mxu0 %v6810_v18  ;;  %935 = vmatprep.mubr.bf16.mxu0 %v7121_v2  ;;  %v7454_v18 = vsel %vm1285_vm1, %v1300_v48, %v1304_v58 }
  0x2c   : > { %1125 = vmatprep.subr.bf16.mxu0 %v6815_v23  ;;  %v7465_v23 = vld [vmem:[%s7282_s21 + $0x30] sm:$0xff]   ;;  %v1308_v37 = vor.u32 %v1307_v28, %v1306_v20  ;;  %711 = vmatpush1.bf16.msra.mxu1 %v6860_v29  ;;  %v566_v29 = vor.u32 %v564_v30, %v562_v32  ;;  %v6851_v30 = vld [vmem:[%s9114_s1 + $0x140] ss:$8 sps:$4 sm:$0xff]   ;;  %p7059_p12 = pnand %p7058_p11, %p7238_p5 }
  0x2d   : > { %v600_v36 = vshll.u32 %v7465_v23, 16  ;;  %v604_v38 = vshrl.u32 %v7465_v23, 16  ;;  %6383 = vmatprep.subr.bf16.mxu1 %v7251_v0  ;;  %v1575_v0 = vrot.slane %v7353_v22, 2 }
  0x2e   : > { %v7494_v48 = vsel %vm1285_vm1, %v1304_v58, %v1308_v37  ;;  %v1268_v58 = vld [vmem:[%s7282_s21 + $0x3c] sm:$0xf]  ;;  %v571_v32 = vsel %vm551_vm2, %v566_v29, %v570_v10  ;;  %p7060_p13 = pneg %p7059_p12 }
  0x2f   : > { %1126 = vmatpush1.bf16.msra.mxu0 %v6813_v24  ;;  %v592_v24 = vshll.u32 %v7447_v63, 16  ;;  %v1314_v50 = vrot.slane %v604_v38, 1  ;;  %v1315_v52 = vrot.slane %v600_v36, 2  ;;  %5539 = vmatmul.mubr.msk.bf16.vlgmr.msra.gmra.mrb[0].mxu1 %vm675_vm0, %v563_v55  ;;  %v7542_v45 = vsel %vm1573_vm4, %v1574_v53, %v1575_v0 }
  0x30   : > { %1127 = vmatprep.subr.bf16.mxu0 %v6819_v27  ;;  %v596_v27 = vshrl.u32 %v7447_v63, 16  ;;  %742 = vmatprep.mubr.bf16.mxu1 %v7121_v2  ;;  %v1031_v53 = vrot.slane %v7408_v44, 1  ;;  %v1287_v55 = vshrl.u32 %v7459_v21, 16 }
  0x31   : > { %v1311_v40 = vrot.slane %v592_v24, 2  ;;  %v1316_v60 = vor.u32 %v1315_v52, %v1314_v50  ;;  %6389 = vmatpush1.bf16.msra.mxu1 %v7257_v1  ;;  %v6868_v50 = vld [vmem:[%s9114_s1 + $0x170] ss:$8 sps:$4 sm:$0xff]   ;;  %v6873_v52 = vld [vmem:[%s9114_s1 + $0x184] ss:$8 sps:$4 sm:$0xff]  }
  0x32   : > { %5561 = vmatmul.mubr.msk.bf16.gmra.mrb[4].mxu0 %vm675_vm0, %v7353_v22  ;;  %v1310_v39 = vrot.slane %v596_v27, 1  ;;  %6384 = vmatprep.subr.bf16.mxu1 %v7265_v3  ;;  %v1577_v22 = vrot.slane %v7362_v25, 2 }
  0x33   : > { %1128 = vmatpush1.bf16.msra.mxu0 %v6817_v41  ;;  %945 = vmatprep.mubr.bf16.mxu0 %v7121_v2  ;;  %v1024_v41 = vrot.slane %v7459_v21, 1 }
  0x34   : > { %1129 = vmatprep.subr.bf16.mxu0 %v6822_v43  ;;  %v6832_v43 = vld [vmem:[%s9114_s1 + $0x124] ss:$8 sps:$4 sm:$0xff]   ;;  %v1312_v49 = vor.u32 %v1311_v40, %v1310_v39  ;;  %v7561_v3 = vsel %vm1573_vm4, %v1575_v0, %v1577_v22  ;;  %v6863_v40 = vld [vmem:[%s9114_s1 + $0x154] ss:$8 sps:$4 sm:$0xff]  }
  0x35   : > { %v1026_v8 = vsel %vm1023_vm3, %v1024_v41, %v1025_v42  ;;  %6390 = vmatpush1.bf16.msra.mxu1 %v7271_v4  ;;  %v6861_v4 = vld [vmem:[%s9114_s1 + $0x150] ss:$8 sps:$4 sm:$0xff]  }
  0x36   : > { %v7530_v20 = vsel %vm1285_vm1, %v1312_v49, %v1316_v60  ;;  %6385 = vmatprep.subr.bf16.mxu1 %v7277_v5  ;;  %v574_v5 = vor.u32 %v572_v34, %v570_v10  ;;  %v6865_v34 = vld [vmem:[%s9114_s1 + $0x160] ss:$8 sps:$4 sm:$0xff]  }
  0x37   : > { %1130 = vmatpush1.bf16.msra.mxu0 %v6820_v54  ;;  %v1027_v54 = vrot.slane %v7362_v25, 1  ;;  %5540 = vmatmul.mubr.msk.bf16.gmra.mrb[4].mxu1 %vm675_vm0, %v571_v32 }
  0x38   : > { %1131 = vmatprep.subr.bf16.mxu0 %v6826_v56  ;;  %v7506_v56 = vld [vmem:[%s7282_s21 + $0x38] sm:$0xf]  ;;  %752 = vmatprep.mubr.bf16.mxu1 %v7121_v2 }
  0x39   : > { %v7514_v61 = vcombine.low %v7506_v56, %v1268_v58  ;;  %v1028_v41 = vsel %vm1023_vm3, %v1025_v42, %v1027_v54  ;;  %6391 = vmatpush1.bf16.msra.mxu1 %v7288_v6  ;;  %v6867_v42 = vld [vmem:[%s9114_s1 + $0x164] ss:$8 sps:$4 sm:$0xff]   ;;  %v579_v6 = vsel %vm551_vm2, %v574_v5, %v578_v16  ;;  %v1290_v58 = vshll.u32 %v7459_v21, 16  ;;  %v6880_v5 = vld [vmem:[%s9114_s1 + $0x1b0] ss:$8 sps:$4 sm:$0xff]  }
  0x3a   : > { %5562 = vmatmul.mubr.msk.bf16.gmra.mrb[8].mxu0 %vm675_vm0, %v7362_v25  ;;  %6386 = vmatprep.subr.bf16.mxu1 %v7294_v7  ;;  %v1035_v21 = vrot.slane %v7465_v23, 1 }
  0x3b   : > { %1132 = vmatpush1.bf16.msra.mxu0 %v6824_v59  ;;  %1155 = vmatprep.mubr.bf16.mxu0 %v7121_v2  ;;  %v7511_v59 = vsel %vm1285_vm1, %v1308_v37, %v1312_v49  ;;  %v1322_v28 = vshll.u32 %v7514_v61, 16  ;;  %v6870_v49 = vld [vmem:[%s9114_s1 + $0x174] ss:$8 sps:$4 sm:$0xff]   ;;  %v1292_v10 = vrot.slane %v1290_v58, 2  ;;  %v6900_v58 = vld [vmem:[%s9116_s3 + $0x48] sm:$0xff]  }
  0x3c   : > { %1133 = vmatprep.subr.bf16.mxu0 %v6829_v19  ;;  %v1319_v19 = vshrl.u32 %v7514_v61, 16 }
  0x3d   : > { %v1324_v39 = vrot.slane %v1322_v28, 2  ;;  %6392 = vmatpush1.bf16.msra.mxu1 %v7308_v11  ;;  %v582_v11 = vor.u32 %v580_v47, %v578_v16 }
  0x3e   : > { %v1321_v37 = vrot.slane %v1319_v19, 1  ;;  %6387 = vmatprep.subr.bf16.mxu1 %v7314_v12  ;;  %v586_v12 = vrot.slane %v584_v17, 1  ;;  %v497_v17 = vld [vmem:[%s7282_s21 + $0x3c] sm:$0x7] }
  0x3f   : > { %1134 = vmatpush1.bf16.msra.mxu0 %v6827_v26  ;;  %5541 = vmatmul.mubr.msk.bf16.gmra.mrb[8].mxu1 %vm675_vm0, %v579_v6  ;;  %v484_v6 = vld [vmem:[%s7282_s21 + $0x3c] sm:$0x3]  ;;  %s7124_s21 = smov [#allocation2]  }
  0x40   : > { %1411 = vmatprep.subr.bf16.mxu0 %v6832_v43  ;;  %v7551_v1 = vor.u32 %v1324_v39, %v1321_v37  ;;  %v1029_v43 = vrot.slane %v7386_v35, 1  ;;  %762 = vmatprep.mubr.bf16.mxu1 %v7121_v2  ;;  %v587_v47 = vsel %vm551_vm2, %v582_v11, %v586_v12  ;;  %v6871_v39 = vld [vmem:[%s9114_s1 + $0x180] ss:$8 sps:$4 sm:$0xff]   ;;  %s7061_s27 = sshll.u32 %s7124_s21, 4  ;;  %s7062_s27 = int_to_ptr.vmem [resolvable:$false] %s7061_s27 }
  0x41   : > { %6393 = vmatpush1.bf16.msra.mxu1 %v7320_v13  ;;  %v6896_v11 = vld [vmem:[%s9116_s3 + $0x28] sm:$0xff]   ;;  %s7063_s26 = scalar_lea.vmem %s7062_s27, 128  ;;  %p7064_p0 = scmp.lt.s32.totalorder %s9073_s0, %s7062_s27 }
  0x42   : > { %5593 = vmatmul.mubr.msk.bf16.vlgmr.msra.gmra.mrb[0].mxu0 %vm675_vm0, %v1026_v8  ;;  %v7569_v26 = vsel %vm1285_vm1, %v1316_v60, %v7551_v1  ;;  %v1030_v7 = vsel %vm1023_vm3, %v1027_v54, %v1029_v43  ;;  %6388 = vmatprep.subr.bf16.mxu1 %v7326_v14  ;;  %v1032_v13 = vsel %vm1023_vm3, %v1029_v43, %v1031_v53  ;;  %v594_v54 = vrot.slane %v592_v24, 1  ;;  %v6884_v43 = vld [vmem:[%s9114_s1 + $0x1c0] ss:$8 sps:$4 sm:$0xff]   ;;  %p7065_p1 = scmp.lt.s32.totalorder %s7063_s26, %s7057_s22 }
  0x43   : > { %1165 = vmatprep.mubr.bf16.mxu0 %v7121_v2  ;;  %1412 = vmatpush1.bf16.msra.mxu0 %v6830_v9  ;;  %v590_v14 = vor.u32 %v588_v57, %v586_v12  ;;  %v5526_v60 = vcombine.low %v7506_v56, %v497_v17  ;;  %v1289_v57 = vrot.slane %v1287_v55, 1  ;;  %v602_v24 = vrot.slane %v600_v36, 1 }
  0x44   : > { %1413 = vmatprep.subr.bf16.mxu0 %v6839_v62  ;;  %v598_v62 = vor.u32 %v596_v27, %v594_v54  ;;  %p7066_p2 = por %p7065_p1, %p7064_p0 }
  0x45   : > { %6394 = vmatpush1.bf16.msra.mxu1 %v7331_v15  ;;  %v1033_v15 = vrot.slane %v7447_v63, 1  ;;  %v595_v8 = vsel %vm551_vm2, %v590_v14, %v594_v54  ;;  %v608_v0 = vshll.u32 %v5526_v60, 16  ;;  %v606_v36 = vor.u32 %v604_v38, %v602_v24  ;;  %v6899_v54 = vld [vmem:[%s9116_s3 + $0x40] sm:$0xff]  }
  0x46   : > { %2182 = vmatprep.subr.bf16.mxu1 %v7121_v2  ;;  %v603_v19 = vsel %vm551_vm2, %v598_v62, %v602_v24  ;;  %v1037_v27 = vrot.slane %v5526_v60, 1  ;;  %v1293_v38 = vor.u32 %v1292_v10, %v1289_v57  ;;  %p7067_p3 = pnand %p7066_p2, %p7060_p13 }
  0x47   : > { %1414 = vmatpush1.bf16.msra.mxu0 %v6837_v33  ;;  %5542 = vmatmul.mubr.msk.bf16.gmra.mrb[12].mxu1 %vm675_vm0, %v587_v47  ;;  %v1034_v9 = vsel %vm1023_vm3, %v1031_v53, %v1033_v15  ;;  %v610_v16 = vrot.slane %v608_v0, 1  ;;  %v1036_v28 = vsel %vm1023_vm3, %v1033_v15, %v1035_v21  ;;  %v612_v33 = vshrl.u32 %v5526_v60, 16 }
  0x48   : > { %1415 = vmatprep.subr.bf16.mxu0 %v6853_v31  ;;  %772 = vmatprep.mubr.bf16.mxu1 %v7121_v2  ;;  %v1038_v31 = vsel %vm1023_vm3, %v1035_v21, %v1037_v27  ;;  %v1297_v32 = vsel %vm1285_vm1, %v1293_v38, %v7411_v46  ;;  %v6877_v46 = vld [vmem:[%s9114_s1 + $0x1a0] ss:$8 sps:$4 sm:$0xff]  }
  0x49   : > { %v611_v29 = vsel %vm551_vm2, %v606_v36, %v610_v16  ;;  %v614_v37 = vor.u32 %v612_v33, %v610_v16 }
  0x4a   : > { %5594 = vmatmul.mubr.msk.bf16.gmra.mrb[4].mxu0 %vm675_vm0, %v1028_v41  ;;  %v6879_v41 = vld [vmem:[%s9114_s1 + $0x1a4] ss:$8 sps:$4 sm:$0xff]  }
  0x4b   : > { %1175 = vmatprep.mubr.bf16.mxu0 %v7121_v2  ;;  %1416 = vmatpush1.bf16.msra.mxu0 %v6851_v30  ;;  %v6876_v30 = vld [vmem:[%s9114_s1 + $0x194] ss:$8 sps:$4 sm:$0xff]  }
  0x4c   : > { %1417 = vmatprep.subr.bf16.mxu0 %v6863_v40  ;;  %v6874_v40 = vld [vmem:[%s9114_s1 + $0x190] ss:$8 sps:$4 sm:$0xff]  }
  0x4f   : > { %1418 = vmatpush1.bf16.msra.mxu0 %v6861_v4  ;;  %5543 = vmatmul.mubr.msk.bf16.gmra.mrb[16].mxu1 %vm675_vm0, %v595_v8  ;;  %v6882_v4 = vld [vmem:[%s9114_s1 + $0x1b4] ss:$8 sps:$4 sm:$0xff]  }
  0x50   : > { %1419 = vmatprep.subr.bf16.mxu0 %v6867_v42  ;;  %782 = vmatprep.mubr.bf16.mxu1 %v7121_v2  ;;  %v6886_v42 = vld [vmem:[%s9114_s1 + $0x1c4] ss:$8 sps:$4 sm:$0xff]  }
  0x52   : > { %5595 = vmatmul.mubr.msk.bf16.gmra.mrb[8].mxu0 %vm675_vm0, %v1030_v7 }
  0x53   : > { %1185 = vmatprep.mubr.bf16.mxu0 %v7121_v2  ;;  %1420 = vmatpush1.bf16.msra.mxu0 %v6865_v34  ;;  %v6887_v34 = vld [vmem:[%s9114_s1 + $0x1d0] ss:$8 sps:$4 sm:$0xff]  }
  0x54   : > { %1421 = vmatprep.subr.bf16.mxu0 %v6870_v49  ;;  %v1587_v49 = vrot.slane %v7514_v61, 2  ;;  %v6897_v61 = vld [vmem:[%s9116_s3 + $0x30] sm:$0xff]  }
  0x57   : > { %1422 = vmatpush1.bf16.msra.mxu0 %v6868_v50  ;;  %5544 = vmatmul.mubr.msk.bf16.gmra.mrb[20].mxu1 %vm675_vm0, %v603_v19 }
  0x58   : > { %1673 = vmatprep.subr.bf16.mxu0 %v6873_v52  ;;  %792 = vmatprep.mubr.bf16.mxu1 %v7121_v2 }
  0x5a   : > { %5596 = vmatmul.mubr.msk.bf16.gmra.mrb[12].mxu0 %vm675_vm0, %v1032_v13  ;;  %v6898_v13 = vld [vmem:[%s9116_s3 + $0x38] sm:$0xff]  }
  0x5b   : > { %1195 = vmatprep.mubr.bf16.mxu0 %v7121_v2 }
  0x5f   : > { %5545 = vmatmul.mubr.msk.bf16.gmra.mrb[24].mxu1 %vm675_vm0, %v611_v29 }
  0x60   : > { %802 = vmatprep.mubr.bf16.mxu1 %v7121_v2 }
  0x62   : > { %5597 = vmatmul.mubr.msk.bf16.gmra.mrb[16].mxu0 %vm675_vm0, %v1034_v9  ;;  %v6901_v9 = vld [vmem:[%s9116_s3 + $0x50] ss:$0 sps:$4 sm:$0xff]  }
  0x63   : > { %1205 = vmatprep.mubr.bf16.mxu0 %v7121_v2  ;;  %v2180_v57 = vsel %vm2178_vm5, %v6901_v9, 0 }
  0x67   : > { %5546 = vmatmul.mubr.msk.bf16.gmra.mrb[28].mxu1 %vm675_vm0, %v614_v37 }
  0x68   : > { %955 = vmatprep.mubr.bf16.mxu1 %v7121_v2 }
  0x6a   : > { %5598 = vmatmul.mubr.msk.bf16.gmra.mrb[20].mxu0 %vm675_vm0, %v1036_v28 }
  0x6b   : > { %1215 = vmatprep.mubr.bf16.mxu0 %v7121_v2 }
  0x6f   : > { %5563 = vmatmul.mubr.msk.bf16.vlgmr.msra.gmra.mrb[12].mxu1 %vm675_vm0, %v7386_v35 }
  0x70   : > { %965 = vmatprep.mubr.bf16.mxu1 %v7121_v2 }
  0x72   : > { %5599 = vmatmul.mubr.msk.bf16.gmra.mrb[24].mxu0 %vm675_vm0, %v1038_v31 }
  0x73   : > { %1225 = vmatprep.mubr.bf16.mxu0 %v7121_v2 }
  0x77   : > { %5564 = vmatmul.mubr.msk.bf16.gmra.mrb[16].mxu1 %vm675_vm0, %v7408_v44 }
  0x78   : > { %975 = vmatprep.mubr.bf16.mxu1 %v7121_v2 }
  0x7a   : > { %5600 = vmatmul.mubr.msk.bf16.gmra.mrb[28].mxu0 %vm675_vm0, %v1037_v27 }
  0x7b   : > { %1443 = vmatprep.mubr.bf16.mxu0 %v7121_v2 }
  0x7f   : > { %5565 = vmatmul.mubr.msk.bf16.gmra.mrb[20].mxu1 %vm675_vm0, %v7447_v63 }
  0x80   : > { %985 = vmatprep.mubr.bf16.mxu1 %v7121_v2 }
  0x82   : > { %5626 = vmatmul.mubr.msk.bf16.vlgmr.msra.gmra.mrb[0].mxu0 %vm675_vm0, %v1297_v32 }
  0x83   : > { %1453 = vmatprep.mubr.bf16.mxu0 %v7121_v2  ;;  %1674 = vmatpush1.bf16.msra.mxu0 %v6871_v39 }
  0x84   : > { %1675 = vmatprep.subr.bf16.mxu0 %v6876_v30 }
  0x87   : > { %1676 = vmatpush1.bf16.msra.mxu0 %v6874_v40  ;;  %5566 = vmatmul.mubr.msk.bf16.gmra.mrb[24].mxu1 %vm675_vm0, %v7465_v23 }
  0x88   : > { %1677 = vmatprep.subr.bf16.mxu0 %v6879_v41  ;;  %995 = vmatprep.mubr.bf16.mxu1 %v7121_v2 }
  0x8a   : > { %5627 = vmatmul.mubr.msk.bf16.gmra.mrb[4].mxu0 %vm675_vm0, %v7424_v51  ;;  %v6889_v51 = vld [vmem:[%s9114_s1 + $0x1d4] ss:$8 sps:$4 sm:$0xff]  }
  0x8b   : > { %1463 = vmatprep.mubr.bf16.mxu0 %v7121_v2  ;;  %1678 = vmatpush1.bf16.msra.mxu0 %v6877_v46  ;;  %v1820_v46 = vlaneseq }
  0x8c   : > { %1679 = vmatprep.subr.bf16.mxu0 %v6882_v4 }
  0x8d   : > { %v7870_v4 = vshrl.u32 %v1820_v46, 7 }
  0x8f   : > { %1680 = vmatpush1.bf16.msra.mxu0 %v6880_v5  ;;  %v1822_v5 = vsub.s32 0, %v7870_v4 }
  0x90   : > { %1681 = vmatprep.subr.bf16.mxu0 %v6886_v42  ;;  %v1818_v42 = vld [vmem:[%s9115_s2] sm:$0x3] }
  0x92   : > { %5628 = vmatmul.mubr.msk.bf16.gmra.mrb[8].mxu0 %vm675_vm0, %v7454_v18  ;;  %v5547_v18 = vcombine.low %v7506_v56, %v484_v6 }
  0x93   : > { %1473 = vmatprep.mubr.bf16.mxu0 %v7121_v2  ;;  %1682 = vmatpush1.bf16.msra.mxu0 %v6884_v43  ;;  %v1826_v43 = vsub.s32 1, %v7870_v4 }
  0x94   : > { %1683 = vmatprep.subr.bf16.mxu0 %v6889_v51  ;;  %5567 = vmatmul.mubr.msk.bf16.gmra.mrb[28].mxu1 %vm675_vm0, %v5547_v18  ;;  %v7879_v51 = vrot.slane %v1818_v42, %v1822_v5 }
  0x95   : > { %v7883_v6 = vrot.slane %v1818_v42, %v1826_v43 }
  0x97   : > { %1684 = vmatpush1.bf16.msra.mxu0 %v6887_v34 }
  0x98   : > { %4031 = vmatprep.subr.bf16.mxu0 %v7121_v2 }
  0x9a   : > { %5629 = vmatmul.mubr.msk.bf16.gmra.mrb[12].mxu0 %vm675_vm0, %v7494_v48  ;;  %v1579_v48 = vrot.slane %v7386_v35, 2  ;;  %v6892_v35 = vld [vmem:[%s9116_s3 + $0x8] sm:$0xff]  }
  0x9b   : > { %1483 = vmatprep.mubr.bf16.mxu0 %v7121_v2 }
  0x9c   : > { %v1580_v56 = vsel %vm1573_vm4, %v1577_v22, %v1579_v48  ;;  %v6894_v22 = vld [vmem:[%s9116_s3 + $0x18] sm:$0xff]  }
  0xa2   : > { %5630 = vmatmul.mubr.msk.bf16.gmra.mrb[16].mxu0 %vm675_vm0, %v7511_v59  ;;  %v1581_v59 = vrot.slane %v7408_v44, 2  ;;  %v1583_v44 = vrot.slane %v7447_v63, 2  ;;  %v1585_v63 = vrot.slane %v7465_v23, 2 }
  0xa3   : > { %1493 = vmatprep.mubr.bf16.mxu0 %v7121_v2 }
  0xa4   : > { %v1582_v25 = vsel %vm1573_vm4, %v1579_v48, %v1581_v59  ;;  %v1588_v7 = vsel %vm1573_vm4, %v1585_v63, %v1587_v49 }
  0xaa   : > { %5631 = vmatmul.mubr.msk.bf16.gmra.mrb[20].mxu0 %vm675_vm0, %v7530_v20  ;;  %v6891_v20 = vld [vmem:[%s9116_s3] sm:$0xff]  }
  0xab   : > { %1503 = vmatprep.mubr.bf16.mxu0 %v7121_v2  ;;  %2183 = vmatpush1.bf16.msra.mxu1 %v6891_v20 }
  0xac   : > { %2184 = vmatprep.subr.bf16.mxu1 %v7121_v2 }
  0xaf   : > { %2185 = vmatpush1.bf16.msra.mxu1 %v6892_v35 }
  0xb0   : > { %2186 = vmatprep.subr.bf16.mxu1 %v7121_v2 }
  0xb2   : > { %5632 = vmatmul.mubr.msk.bf16.gmra.mrb[24].mxu0 %vm675_vm0, %v7569_v26  ;;  %v1586_v26 = vsel %vm1573_vm4, %v1583_v44, %v1585_v63 }
  0xb3   : > { %1513 = vmatprep.mubr.bf16.mxu0 %v7121_v2 }
  0xba   : > { %5633 = vmatmul.mubr.msk.bf16.gmra.mrb[28].mxu0 %vm675_vm0, %v7551_v1  ;;  %v1584_v1 = vsel %vm1573_vm4, %v1581_v59, %v1583_v44 }
  0xbb   : > { %1705 = vmatprep.mubr.bf16.mxu0 %v7121_v2 }
  0xc2   : > { %5659 = vmatmul.mubr.msk.bf16.vlgmr.msra.gmra.mrb[0].mxu0 %vm675_vm0, %v7542_v45  ;;  %v6893_v45 = vld [vmem:[%s9116_s3 + $0x10] sm:$0xff]  }
  0xc3   : > { %1715 = vmatprep.mubr.bf16.mxu0 %v7121_v2  ;;  %2187 = vmatpush1.bf16.msra.mxu1 %v6893_v45 }
  0xc4   : > { %2188 = vmatprep.subr.bf16.mxu1 %v7121_v2 }
  0xc7   : > { %2189 = vmatpush1.bf16.msra.mxu1 %v6894_v22 }
  0xc8   : > { %2190 = vmatprep.subr.bf16.mxu1 %v7121_v2 }
  0xca   : > { %5660 = vmatmul.mubr.msk.bf16.gmra.mrb[4].mxu0 %vm675_vm0, %v7561_v3  ;;  %v6895_v3 = vld [vmem:[%s9116_s3 + $0x20] sm:$0xff]  }
  0xcb   : > { %1725 = vmatprep.mubr.bf16.mxu0 %v7121_v2  ;;  %2191 = vmatpush1.bf16.msra.mxu1 %v6895_v3 }
  0xcc   : > { %2192 = vmatprep.subr.bf16.mxu1 %v7121_v2 }
  0xcf   : > { %2193 = vmatpush1.bf16.msra.mxu1 %v6896_v11 }
  0xd0   : > { %2194 = vmatprep.subr.bf16.mxu1 %v7121_v2 }
  0xd2   : > { %5661 = vmatmul.mubr.msk.bf16.gmra.mrb[8].mxu0 %vm675_vm0, %v1580_v56 }
  0xd3   : > { %1735 = vmatprep.mubr.bf16.mxu0 %v7121_v2  ;;  %2195 = vmatpush1.bf16.msra.mxu1 %v6897_v61 }
  0xd4   : > { %2196 = vmatprep.subr.bf16.mxu1 %v7121_v2 }
  0xd7   : > { %2197 = vmatpush1.bf16.msra.mxu1 %v6898_v13 }
  0xd8   : > { %2198 = vmatprep.subr.bf16.mxu1 %v7121_v2 }
  0xda   : > { %5662 = vmatmul.mubr.msk.bf16.gmra.mrb[12].mxu0 %vm675_vm0, %v1582_v25 }
  0xdb   : > { %1745 = vmatprep.mubr.bf16.mxu0 %v7121_v2  ;;  %2199 = vmatpush1.bf16.msra.mxu1 %v6899_v54 }
  0xdc   : > { %2200 = vmatprep.subr.bf16.mxu1 %v7121_v2 }
  0xdf   : > { %2201 = vmatpush1.bf16.msra.mxu1 %v6900_v58 }
  0xe0   : > { %2202 = vmatprep.subr.bf16.mxu1 %v7121_v2 }
  0xe2   : > { %5663 = vmatmul.mubr.msk.bf16.gmra.mrb[16].mxu0 %vm675_vm0, %v1584_v1 }
  0xe3   : > { %1755 = vmatprep.mubr.bf16.mxu0 %v7121_v2  ;;  %2203 = vmatpush1.bf16.msra.mxu1 %v2180_v57 }
  0xe4   : > { %2367 = vmatprep.subr.bf16.mxu1 %v7121_v2 }
  0xea   : > { %5664 = vmatmul.mubr.msk.bf16.gmra.mrb[20].mxu0 %vm675_vm0, %v1586_v26 }
  0xeb   : > { %1765 = vmatprep.mubr.bf16.mxu0 %v7121_v2 }
  0xf2   : > { %5665 = vmatmul.mubr.msk.bf16.gmra.mrb[24].mxu0 %vm675_vm0, %v1588_v7 }
  0xf3   : > { %1775 = vmatprep.mubr.bf16.mxu0 %v7121_v2 }
  0xfa   : > { %5666 = vmatmul.mubr.msk.bf16.gmra.mrb[28].mxu0 %vm675_vm0, %v1587_v49  ;;  %vm5425_vm0 = vcmask 76800  }
 0x102   : > { %v734_v23 = vpop.f32.mrb[0].mxu1 }
 0x103   : > { %v736_v50 = vpop.f32.mrb[1].mxu1 }
 0x104   : > { %v738_v12 = vpop.f32.mrb[2].mxu1 }
 0x105   : > { %v7790_v52 = vpop.f32.mrb[3].mxu1 }
 0x10a   : > { %v7796_v53 = vpop.f32.mrb[4].mxu1 }
 0x10b   : > { %v7799_v47 = vpop.f32.mrb[5].mxu1 }
 0x10c   : > { %v7804_v17 = vpop.f32.mrb[6].mxu1 }
 0x10d   : > { %v7806_v14 = vpop.f32.mrb[7].mxu1 }
 0x112   : > { %v7812_v15 = vpop.f32.mrb[8].mxu1 }
 0x113   : > { %v7815_v55 = vpop.f32.mrb[9].mxu1 }
 0x114   : > { %v7820_v60 = vpop.f32.mrb[10].mxu1 }
 0x115   : > { %v7822_v8 = vpop.f32.mrb[11].mxu1 }
 0x142   : > { %v7830_v10 = vpop.f32.mrb[12].mxu1 }
 0x143   : > { %v7832_v0 = vpop.f32.mrb[13].mxu1 }
 0x144   : > { %v7834_v24 = vpop.f32.mrb[14].mxu1 }
 0x145   : > { %v7836_v62 = vpop.f32.mrb[15].mxu1 }
 0x14a   : > { %v7838_v21 = vpop.f32.mrb[16].mxu1 }
 0x14b   : > { %v7840_v16 = vpop.f32.mrb[17].mxu1 }
 0x14c   : > { %v7842_v19 = vpop.f32.mrb[18].mxu1 }
 0x14d   : > { %v7844_v28 = vpop.f32.mrb[19].mxu1 }
 0x152   : > { %v7846_v36 = vpop.f32.mrb[20].mxu1 }
 0x153   : > { %v7848_v27 = vpop.f32.mrb[21].mxu1 }
 0x154   : > { %v7850_v33 = vpop.f32.mrb[22].mxu1 }
 0x155   : > { %v7852_v29 = vpop.f32.mrb[23].mxu1 }
 0x15a   : > { %v7854_v31 = vpop.f32.mrb[24].mxu1 }
 0x15b   : > { %v7856_v37 = vpop.f32.mrb[25].mxu1 }
 0x15c   : > { %v7858_v38 = vpop.f32.mrb[26].mxu1 }
 0x15d   : > { %v7860_v39 = vpop.f32.mrb[27].mxu1 }
 0x167   : > { %v7862_v30 = vpop.f32.mrb[28].mxu1 }
 0x168   : > { %v7864_v32 = vpop.f32.mrb[29].mxu1 }
 0x169   : > { %v7866_v40 = vpop.f32.mrb[30].mxu1 }
 0x16a   : > { %v7868_v41 = vpop.f32.mrb[31].mxu1 }
 0x195   : > { %v1707_v34 = vpop.f32.mrb[0].mxu0 }
 0x196   : > { %v6395_v18 = vadd.f32 %v1707_v34, %v734_v23  ;;  %v1709_v48 = vpop.f32.mrb[1].mxu0 }
 0x197   : > { %v6396_v56 = vadd.f32 %v1709_v48, %v736_v50  ;;  %v1711_v59 = vpop.f32.mrb[2].mxu0 }
 0x198   : > { %v1830_v20 = vadd.f32 %v6395_v18, %v7879_v51  ;;  %v6397_v35 = vadd.f32 %v1711_v59, %v738_v12  ;;  %v1713_v25 = vpop.f32.mrb[3].mxu0 }
 0x199   : > { %v1831_v44 = vadd.f32 %v6396_v56, %v7883_v6  ;;  %v6398_v45 = vadd.f32 %v1713_v25, %v7790_v52 }
 0x19a   : > { %v1862_v22 = vmax.f32 %v1830_v20, 0.0  ;;  %v1832_v1 = vadd.f32 %v6397_v35, %v7879_v51 }
 0x19b   : > { %v1863_v63 = vmax.f32 %v1831_v44, 0.0  ;;  %v1833_v3 = vadd.f32 %v6398_v45, %v7883_v6 }
 0x19c   : > { %v1864_v26 = vmax.f32 %v1832_v1, 0.0  ;;  %v1927_v23 = vrot.slane %v1862_v22, 1 }
 0x19d   : > { %v1865_v49 = vmax.f32 %v1833_v3, 0.0  ;;  %v1717_v7 = vpop.f32.mrb[4].mxu0  ;;  %v1930_v12 = vrot.slane %v1863_v63, 1 }
 0x19e   : > { %v1928_v50 = vrot.slane %v1864_v26, 1  ;;  %v6399_v11 = vadd.f32 %v1717_v7, %v7796_v53  ;;  %v1719_v61 = vpop.f32.mrb[5].mxu0 }
 0x19f   : > { %v1931_v13 = vrot.slane %v1865_v49, 1  ;;  %v6400_v54 = vadd.f32 %v1719_v61, %v7799_v47  ;;  %v1721_v58 = vpop.f32.mrb[6].mxu0 }
 0x1a0   : > { %v1929_v52 = vsel %vm1023_vm3, %v1927_v23, %v1928_v50  ;;  %v1834_v9 = vadd.f32 %v6399_v11, %v7879_v51  ;;  %v6401_v57 = vadd.f32 %v1721_v58, %v7804_v17  ;;  %v1723_v46 = vpop.f32.mrb[7].mxu0 }
 0x1a1   : > { %v2021_v42 = vmax.f32 %v1862_v22, %v1929_v52  ;;  %v1932_v34 = vsel %vm1023_vm3, %v1930_v12, %v1931_v13  ;;  %v1835_v18 = vadd.f32 %v6400_v54, %v7883_v6  ;;  %v6402_v53 = vadd.f32 %v1723_v46, %v7806_v14 }
 0x1a2   : > { %v1866_v48 = vmax.f32 %v1834_v9, 0.0  ;;  %v1836_v56 = vadd.f32 %v6401_v57, %v7879_v51  ;;  %v2022_v59 = vmax.f32 %v1863_v63, %v1932_v34 }
 0x1a3   : > { %v1867_v47 = vmax.f32 %v1835_v18, 0.0  ;;  %v1837_v20 = vadd.f32 %v6402_v53, %v7883_v6 }
 0x1a4   : > { %v1933_v35 = vrot.slane %v1866_v48, 1  ;;  %v1868_v25 = vmax.f32 %v1836_v56, 0.0 }
 0x1a5   : > { %v1935_v44 = vrot.slane %v1867_v47, 1  ;;  %v1869_v45 = vmax.f32 %v1837_v20, 0.0  ;;  %v1727_v17 = vpop.f32.mrb[8].mxu0 }
 0x1a6   : > { %v1934_v22 = vsel %vm1023_vm3, %v1928_v50, %v1933_v35  ;;  %v1937_v1 = vrot.slane %v1868_v25, 1  ;;  %v6403_v3 = vadd.f32 %v1727_v17, %v7812_v15  ;;  %v1729_v7 = vpop.f32.mrb[9].mxu0 }
 0x1a7   : > { %v2023_v14 = vmax.f32 %v1864_v26, %v1934_v22  ;;  %v1936_v23 = vsel %vm1023_vm3, %v1931_v13, %v1935_v44  ;;  %v1939_v11 = vrot.slane %v1869_v45, 1  ;;  %v6404_v63 = vadd.f32 %v1729_v7, %v7815_v55  ;;  %v1731_v61 = vpop.f32.mrb[10].mxu0 }
 0x1a8   : > { %v1838_v12 = vadd.f32 %v6403_v3, %v7879_v51  ;;  %v6405_v54 = vadd.f32 %v1731_v61, %v7820_v60  ;;  %v1733_v58 = vpop.f32.mrb[11].mxu0  ;;  %v2024_v52 = vmax.f32 %v1865_v49, %v1936_v23  ;;  %v1938_v50 = vsel %vm1023_vm3, %v1933_v35, %v1937_v1  ;;  %v6902_v60 = vld [vmem:[%s9116_s3 + $0x54] sm:$0xff]  }
 0x1a9   : > { %v1940_v9 = vsel %vm1023_vm3, %v1935_v44, %v1939_v11  ;;  %v1839_v15 = vadd.f32 %v6404_v63, %v7883_v6  ;;  %v6406_v26 = vadd.f32 %v1733_v58, %v7822_v8  ;;  %v7910_v57 = vpack.c.bf16 %v2023_v14, %v2021_v42 }
 0x1aa   : > { %v1870_v13 = vmax.f32 %v1838_v12, 0.0  ;;  %v7913_v55 = vadd.f32 %v6405_v54, %v7879_v51  ;;  %v7915_v46 = vpack.c.bf16 %v2024_v52, %v2022_v59  ;;  %v2026_v34 = vmax.f32 %v1867_v47, %v1940_v9 }
 0x1ab   : > { %v1871_v49 = vmax.f32 %v1839_v15, 0.0  ;;  %v7921_v18 = vadd.f32 %v6406_v26, %v7883_v6  ;;  %v2025_v53 = vmax.f32 %v1866_v48, %v1938_v50  ;;  %v6903_v48 = vld [vmem:[%s9116_s3 + $0x5c] sm:$0xff]  }
 0x1ac   : > { %v1941_v56 = vrot.slane %v1870_v13, 1  ;;  %v1872_v8 = vmax.f32 %v7913_v55, 0.0  ;;  %5678 = vmatprep.mubr.msk.bf16.mxu1 %vm2153_vm6, %v7915_v46 }
 0x1ad   : > { %v1943_v42 = vrot.slane %v1871_v49, 1  ;;  %v1873_v59 = vmax.f32 %v7921_v18, 0.0  ;;  %v1737_v20 = vpop.f32.mrb[12].mxu0  ;;  %2215 = vmatmul.mubr.bf16.vlgmr.msra.gmra.mrb[32].mxu1 %v7910_v57 }
 0x1ae   : > { %v1945_v47 = vrot.slane %v1872_v8, 1  ;;  %v6407_v35 = vadd.f32 %v1737_v20, %v7830_v10  ;;  %v1739_v44 = vpop.f32.mrb[13].mxu0  ;;  %v1942_v17 = vsel %vm1023_vm3, %v1937_v1, %v1941_v56  ;;  %2368 = vmatpush1.bf16.msra.mxu1 %v6902_v60 }
 0x1af   : > { %v1944_v22 = vsel %vm1023_vm3, %v1939_v11, %v1943_v42  ;;  %v1947_v3 = vrot.slane %v1873_v59, 1  ;;  %v6408_v7 = vadd.f32 %v1739_v44, %v7832_v0  ;;  %v1741_v14 = vpop.f32.mrb[14].mxu0  ;;  %v2027_v23 = vmax.f32 %v1868_v25, %v1942_v17  ;;  %2369 = vmatprep.subr.bf16.mxu1 %v7121_v2 }
 0x1b0   : > { %v1842_v63 = vadd.f32 %v6407_v35, %v7879_v51  ;;  %v6409_v10 = vadd.f32 %v1741_v14, %v7834_v24  ;;  %v1743_v61 = vpop.f32.mrb[15].mxu0  ;;  %v2028_v1 = vmax.f32 %v1869_v45, %v1944_v22  ;;  %v1946_v12 = vsel %vm1023_vm3, %v1941_v56, %v1945_v47  ;;  %v6904_v24 = vld [vmem:[%s9116_s3 + $0x64] sm:$0xff]  }
 0x1b1   : > { %v1948_v54 = vsel %vm1023_vm3, %v1943_v42, %v1947_v3  ;;  %v1843_v58 = vadd.f32 %v6408_v7, %v7883_v6  ;;  %v6410_v11 = vadd.f32 %v1743_v61, %v7836_v62  ;;  %v7942_v52 = vpack.c.bf16 %v2027_v23, %v2025_v53  ;;  %v6905_v42 = vld [vmem:[%s9116_s3 + $0x6c] sm:$0xff]  }
 0x1b2   : > { %v1874_v0 = vmax.f32 %v1842_v63, 0.0  ;;  %v7945_v25 = vadd.f32 %v6409_v10, %v7879_v51  ;;  %v7947_v50 = vpack.c.bf16 %v2028_v1, %v2026_v34  ;;  %v2030_v9 = vmax.f32 %v1871_v49, %v1948_v54  ;;  %2370 = vmatpush1.bf16.msra.mxu1 %v6903_v48 }
 0x1b3   : > { %v1875_v45 = vmax.f32 %v1843_v58, 0.0  ;;  %v7953_v15 = vadd.f32 %v6410_v11, %v7883_v6  ;;  %v2029_v26 = vmax.f32 %v1870_v13, %v1946_v12  ;;  %2371 = vmatprep.subr.bf16.mxu1 %v7121_v2 }
 0x1b4   : > { %v1949_v62 = vrot.slane %v1874_v0, 1  ;;  %v1876_v55 = vmax.f32 %v7945_v25, 0.0  ;;  %5679 = vmatprep.mubr.msk.bf16.mxu1 %vm2153_vm6, %v7947_v50 }
 0x1b5   : > { %v1951_v34 = vrot.slane %v1875_v45, 1  ;;  %v1877_v60 = vmax.f32 %v7953_v15, 0.0  ;;  %v1747_v49 = vpop.f32.mrb[16].mxu0  ;;  %2223 = vmatmul.mubr.bf16.gmra.mrb[36].mxu1 %v7942_v52 }
 0x1b6   : > { %v1953_v18 = vrot.slane %v1876_v55, 1  ;;  %v6411_v53 = vadd.f32 %v1747_v49, %v7838_v21  ;;  %v1749_v56 = vpop.f32.mrb[17].mxu0  ;;  %v1950_v13 = vsel %vm1023_vm3, %v1945_v47, %v1949_v62  ;;  %2372 = vmatpush1.bf16.msra.mxu1 %v6904_v24 }
 0x1b7   : > { %v1952_v20 = vsel %vm1023_vm3, %v1947_v3, %v1951_v34  ;;  %v1955_v35 = vrot.slane %v1877_v60, 1  ;;  %v6412_v44 = vadd.f32 %v1749_v56, %v7840_v16  ;;  %v1751_v17 = vpop.f32.mrb[18].mxu0  ;;  %v2031_v48 = vmax.f32 %v1872_v8, %v1950_v13  ;;  %2373 = vmatprep.subr.bf16.mxu1 %v7121_v2 }
 0x1b8   : > { %v1846_v22 = vadd.f32 %v6411_v53, %v7879_v51  ;;  %v6413_v21 = vadd.f32 %v1751_v17, %v7842_v19  ;;  %v1753_v7 = vpop.f32.mrb[19].mxu0  ;;  %v2032_v47 = vmax.f32 %v1873_v59, %v1952_v20  ;;  %v1954_v14 = vsel %vm1023_vm3, %v1949_v62, %v1953_v18  ;;  %v6906_v19 = vld [vmem:[%s9116_s3 + $0x74] sm:$0xff]  }
 0x1b9   : > { %v1956_v23 = vsel %vm1023_vm3, %v1951_v34, %v1955_v35  ;;  %v1847_v63 = vadd.f32 %v6412_v44, %v7883_v6  ;;  %v6414_v3 = vadd.f32 %v1753_v7, %v7844_v28  ;;  %v7975_v10 = vpack.c.bf16 %v2031_v48, %v2029_v26  ;;  %v6907_v26 = vld [vmem:[%s9116_s3 + $0x7c] sm:$0xff]  }
 0x1ba   : > { %v1878_v16 = vmax.f32 %v1846_v22, 0.0  ;;  %v7978_v8 = vadd.f32 %v6413_v21, %v7879_v51  ;;  %v7980_v61 = vpack.c.bf16 %v2032_v47, %v2030_v9  ;;  %v2034_v1 = vmax.f32 %v1875_v45, %v1956_v23  ;;  %2374 = vmatpush1.bf16.msra.mxu1 %v6905_v42 }
 0x1bb   : > { %v1879_v59 = vmax.f32 %v1847_v63, 0.0  ;;  %v7986_v12 = vadd.f32 %v6414_v3, %v7883_v6  ;;  %v2033_v54 = vmax.f32 %v1874_v0, %v1954_v14  ;;  %2375 = vmatprep.subr.bf16.mxu1 %v7121_v2 }
 0x1bc   : > { %v1957_v28 = vrot.slane %v1878_v16, 1  ;;  %v1880_v58 = vmax.f32 %v7978_v8, 0.0  ;;  %5680 = vmatprep.mubr.msk.bf16.mxu1 %vm2153_vm6, %v7980_v61 }
 0x1bd   : > { %v1959_v11 = vrot.slane %v1879_v59, 1  ;;  %v1881_v25 = vmax.f32 %v7986_v12, 0.0  ;;  %v1757_v9 = vpop.f32.mrb[20].mxu0  ;;  %2231 = vmatmul.mubr.bf16.gmra.mrb[40].mxu1 %v7975_v10 }
 0x1be   : > { %v1961_v24 = vrot.slane %v1880_v58, 1  ;;  %v6415_v45 = vadd.f32 %v1757_v9, %v7846_v36  ;;  %v1759_v15 = vpop.f32.mrb[21].mxu0  ;;  %v1958_v0 = vsel %vm1023_vm3, %v1953_v18, %v1957_v28  ;;  %2376 = vmatpush1.bf16.msra.mxu1 %v6906_v19 }
 0x1bf   : > { %v1960_v62 = vsel %vm1023_vm3, %v1955_v35, %v1959_v11  ;;  %v1963_v34 = vrot.slane %v1881_v25, 1  ;;  %v6416_v49 = vadd.f32 %v1759_v15, %v7848_v27  ;;  %v1761_v53 = vpop.f32.mrb[22].mxu0  ;;  %v2035_v56 = vmax.f32 %v1876_v55, %v1958_v0  ;;  %2377 = vmatprep.subr.bf16.mxu1 %v7121_v2 }
 0x1c0   : > { %v1850_v13 = vadd.f32 %v6415_v45, %v7879_v51  ;;  %v6417_v36 = vadd.f32 %v1761_v53, %v7850_v33  ;;  %v1763_v42 = vpop.f32.mrb[23].mxu0  ;;  %v2036_v18 = vmax.f32 %v1877_v60, %v1960_v62  ;;  %v1962_v20 = vsel %vm1023_vm3, %v1957_v28, %v1961_v24  ;;  %v6908_v33 = vld [vmem:[%s9116_s3 + $0x84] sm:$0xff]  }
 0x1c1   : > { %v1964_v44 = vsel %vm1023_vm3, %v1959_v11, %v1963_v34  ;;  %v1851_v17 = vadd.f32 %v6416_v49, %v7883_v6  ;;  %v6418_v35 = vadd.f32 %v1763_v42, %v7852_v29  ;;  %v8008_v48 = vpack.c.bf16 %v2035_v56, %v2033_v54 }
 0x1c2   : > { %v1882_v27 = vmax.f32 %v1850_v13, 0.0  ;;  %v8011_v55 = vadd.f32 %v6417_v36, %v7879_v51  ;;  %v8013_v22 = vpack.c.bf16 %v2036_v18, %v2034_v1  ;;  %v2038_v21 = vmax.f32 %v1879_v59, %v1964_v44  ;;  %2378 = vmatpush1.bf16.msra.mxu1 %v6907_v26  ;;  %v6909_v59 = vld [vmem:[%s9116_s3 + $0x8c] sm:$0xff]  }
 0x1c3   : > { %v1883_v60 = vmax.f32 %v1851_v17, 0.0  ;;  %v8019_v7 = vadd.f32 %v6418_v35, %v7883_v6  ;;  %v2037_v47 = vmax.f32 %v1878_v16, %v1962_v20  ;;  %2379 = vmatprep.subr.bf16.mxu1 %v7121_v2 }
 0x1c4   : > { %v1965_v29 = vrot.slane %v1882_v27, 1  ;;  %v1884_v14 = vmax.f32 %v8011_v55, 0.0  ;;  %5681 = vmatprep.mubr.msk.bf16.mxu1 %vm2153_vm6, %v8013_v22 }
 0x1c5   : > { %v1967_v23 = vrot.slane %v1883_v60, 1  ;;  %v1885_v63 = vmax.f32 %v8019_v7, 0.0  ;;  %v1767_v3 = vpop.f32.mrb[24].mxu0  ;;  %2239 = vmatmul.mubr.bf16.gmra.mrb[44].mxu1 %v8008_v48 }
 0x1c6   : > { %v1969_v8 = vrot.slane %v1884_v14, 1  ;;  %v6419_v1 = vadd.f32 %v1767_v3, %v7854_v31  ;;  %v1769_v19 = vpop.f32.mrb[25].mxu0  ;;  %v1966_v16 = vsel %vm1023_vm3, %v1961_v24, %v1965_v29  ;;  %2380 = vmatpush1.bf16.msra.mxu1 %v6908_v33 }
 0x1c7   : > { %v1968_v12 = vsel %vm1023_vm3, %v1963_v34, %v1967_v23  ;;  %v1971_v54 = vrot.slane %v1885_v63, 1  ;;  %v6420_v28 = vadd.f32 %v1769_v19, %v7856_v37  ;;  %v1771_v11 = vpop.f32.mrb[26].mxu0  ;;  %v2039_v9 = vmax.f32 %v1880_v58, %v1966_v16  ;;  %2381 = vmatprep.subr.bf16.mxu1 %v7121_v2 }
 0x1c8   : > { %v1854_v45 = vadd.f32 %v6419_v1, %v7879_v51  ;;  %v6421_v31 = vadd.f32 %v1771_v11, %v7858_v38  ;;  %v1773_v15 = vpop.f32.mrb[27].mxu0  ;;  %v2040_v24 = vmax.f32 %v1881_v25, %v1968_v12  ;;  %v1970_v0 = vsel %vm1023_vm3, %v1965_v29, %v1969_v8  ;;  %v6910_v38 = vld [vmem:[%s9116_s3 + $0x94] sm:$0xff]  }
 0x1c9   : > { %v1972_v26 = vsel %vm1023_vm3, %v1967_v23, %v1971_v54  ;;  %v1855_v62 = vadd.f32 %v6420_v28, %v7883_v6  ;;  %v6422_v34 = vadd.f32 %v1773_v15, %v7860_v39  ;;  %v8041_v49 = vpack.c.bf16 %v2039_v9, %v2037_v47 }
 0x1ca   : > { %v1886_v37 = vmax.f32 %v1854_v45, 0.0  ;;  %v1856_v58 = vadd.f32 %v6421_v31, %v7879_v51  ;;  %v8044_v53 = vpack.c.bf16 %v2040_v24, %v2038_v21  ;;  %v2042_v56 = vmax.f32 %v1883_v60, %v1972_v26  ;;  %2382 = vmatpush1.bf16.msra.mxu1 %v6909_v59 }
 0x1cb   : > { %v1887_v25 = vmax.f32 %v1855_v62, 0.0  ;;  %v1857_v13 = vadd.f32 %v6422_v34, %v7883_v6  ;;  %v2041_v36 = vmax.f32 %v1882_v27, %v1970_v0  ;;  %2383 = vmatprep.subr.bf16.mxu1 %v7121_v2  ;;  %v6911_v27 = vld [vmem:[%s9116_s3 + $0x9c] sm:$0xff]  }
 0x1cc   : > { %v1973_v39 = vrot.slane %v1886_v37, 1  ;;  %v1888_v42 = vmax.f32 %v1856_v58, 0.0  ;;  %5682 = vmatprep.mubr.msk.bf16.mxu1 %vm2153_vm6, %v8044_v53 }
 0x1cd   : > { %v1975_v18 = vrot.slane %v1887_v25, 1  ;;  %v1889_v20 = vmax.f32 %v1857_v13, 0.0  ;;  %v1777_v44 = vpop.f32.mrb[28].mxu0  ;;  %2247 = vmatmul.mubr.bf16.gmra.mrb[48].mxu1 %v8041_v49 }
 0x1ce   : > { %v1977_v17 = vrot.slane %v1888_v42, 1  ;;  %v6423_v35 = vadd.f32 %v1777_v44, %v7862_v30  ;;  %v1779_v55 = vpop.f32.mrb[29].mxu0  ;;  %v1974_v21 = vsel %vm1023_vm3, %v1969_v8, %v1973_v39  ;;  %2384 = vmatpush1.bf16.msra.mxu1 %v6910_v38  ;;  %v6912_v30 = vld [vmem:[%s9116_s3 + $0xa4] ss:$0 sps:$4 sm:$0xff]  }
 0x1cf   : > { %v1976_v33 = vsel %vm1023_vm3, %v1971_v54, %v1975_v18  ;;  %v1979_v60 = vrot.slane %v1889_v20, 1  ;;  %v6424_v7 = vadd.f32 %v1779_v55, %v7864_v32  ;;  %v1781_v47 = vpop.f32.mrb[30].mxu0  ;;  %v2043_v29 = vmax.f32 %v1884_v14, %v1974_v21  ;;  %2385 = vmatprep.subr.bf16.mxu1 %v7121_v2  ;;  %v6932_v55 = vld [vmem:[%s9117_s4 + $0x4] ss:$8 sps:$4 sm:$0xff]  }
 0x1d0   : > { %v1858_v23 = vadd.f32 %v6423_v35, %v7879_v51  ;;  %v6425_v3 = vadd.f32 %v1781_v47, %v7866_v40  ;;  %v1783_v8 = vpop.f32.mrb[31].mxu0  ;;  %v2044_v1 = vmax.f32 %v1885_v63, %v1976_v33  ;;  %v1978_v19 = vsel %vm1023_vm3, %v1973_v39, %v1977_v17 }
 0x1d1   : > { %v1980_v16 = vsel %vm1023_vm3, %v1975_v18, %v1979_v60  ;;  %v1859_v32 = vadd.f32 %v6424_v7, %v7883_v6  ;;  %v6426_v14 = vadd.f32 %v1783_v8, %v7868_v41  ;;  %v2063_v59 = vpack.c.bf16 %v2043_v29, %v2041_v36 }
 0x1d2   : > { %v1890_v12 = vmax.f32 %v1858_v23, 0.0  ;;  %v1860_v54 = vadd.f32 %v6425_v3, %v7879_v51  ;;  %v2064_v28 = vpack.c.bf16 %v2044_v1, %v2042_v56  ;;  %v2046_v11 = vmax.f32 %v1887_v25, %v1980_v16  ;;  %2386 = vmatpush1.bf16.msra.mxu1 %v6911_v27 }
 0x1d3   : > { %v1891_v9 = vmax.f32 %v1859_v32, 0.0  ;;  %v1861_v40 = vadd.f32 %v6426_v14, %v7883_v6  ;;  %v2045_v45 = vmax.f32 %v1886_v37, %v1978_v19  ;;  %2387 = vmatprep.subr.bf16.mxu1 %v7121_v2  ;;  %v2365_v63 = vsel %vm2178_vm5, %v6912_v30, 0 }
 0x1d4   : > { %v1981_v31 = vrot.slane %v1890_v12, 1  ;;  %v1892_v15 = vmax.f32 %v1860_v54, 0.0  ;;  %5683 = vmatprep.mubr.msk.bf16.mxu1 %vm2153_vm6, %v2064_v28 }
 0x1d5   : > { %v1983_v41 = vrot.slane %v1891_v9, 1  ;;  %v1893_v24 = vmax.f32 %v1861_v40, 0.0  ;;  %2255 = vmatmul.mubr.bf16.gmra.mrb[52].mxu1 %v2063_v59 }
 0x1d6   : > { %v1985_v0 = vrot.slane %v1892_v15, 1  ;;  %v1982_v51 = vsel %vm1023_vm3, %v1977_v17, %v1981_v31  ;;  %2388 = vmatpush1.bf16.msra.mxu1 %v2365_v63 }
 0x1d7   : > { %v1984_v26 = vsel %vm1023_vm3, %v1979_v60, %v1983_v41  ;;  %v1987_v62 = vrot.slane %v1893_v24, 1  ;;  %v2047_v6 = vmax.f32 %v1888_v42, %v1982_v51  ;;  %v5736_v42 = vld [vmem:[%s9117_s4 + $0xa8] sm:$0x33] }
 0x1d8   : > { %v2051_v34 = vmax.f32 %v1892_v15, %v1985_v0  ;;  %v2048_v37 = vmax.f32 %v1889_v20, %v1984_v26  ;;  %v1986_v58 = vsel %vm1023_vm3, %v1981_v31, %v1985_v0  ;;  %v5748_v20 = vcombine.high %v5736_v42, %v5736_v42 }
 0x1d9   : > { %v1988_v56 = vsel %vm1023_vm3, %v1983_v41, %v1987_v62  ;;  %v2052_v38 = vmax.f32 %v1893_v24, %v1987_v62  ;;  %v2065_v25 = vpack.c.bf16 %v2047_v6, %v2045_v45  ;;  %v2049_v13 = vmax.f32 %v1890_v12, %v1986_v58 }
 0x1da   : > { %v2050_v36 = vmax.f32 %v1891_v9, %v1988_v56  ;;  %v2066_v39 = vpack.c.bf16 %v2048_v37, %v2046_v11  ;;  %v5747_v17 = vcombine.low %v5736_v42, %v5736_v42 }
 0x1db   : > { %v2067_v18 = vpack.c.bf16 %v2051_v34, %v2049_v13 }
 0x1dc   : > { %v2068_v44 = vpack.c.bf16 %v2052_v38, %v2050_v36  ;;  %5684 = vmatprep.mubr.msk.bf16.mxu1 %vm2153_vm6, %v2066_v39  ;;  %v2616_v35 = vsel %vm2614_vm7, %v5747_v17, 0  ;;  %v6933_v17 = vld [vmem:[%s9117_s4 + $0x10] ss:$8 sps:$4 sm:$0xff]  }
 0x1dd   : > { %2263 = vmatmul.mubr.bf16.gmra.mrb[56].mxu1 %v2065_v25 }
 0x1de   : > { %5685 = vmatprep.mubr.msk.bf16.mxu1 %vm2153_vm6, %v2068_v44 }
 0x1e5   : > { %2271 = vmatmul.mubr.bf16.gmra.mrb[60].mxu1 %v2067_v18 }
 0x1e6   : > { %5718 = vmatprep.mubr.msk.bf16.mxu1 %vm2153_vm6, %v7915_v46  ;;  %v6915_v46 = vld [vmem:[%s9117_s4 + $0x5c] ss:$8 sps:$4 sm:$0xff]  }
 0x1e7   : > { %2621 = vmatprep.subr.bf16.mxu1 %v6915_v46 }
 0x1ed   : > { %2400 = vmatmul.mubr.bf16.vlgmr.msra.gmra.mrb[64].mxu1 %v7910_v57  ;;  %v6913_v57 = vld [vmem:[%s9117_s4 + $0x58] ss:$8 sps:$4 sm:$0xff]  }
 0x1ee   : > { %5719 = vmatprep.mubr.msk.bf16.mxu1 %vm2153_vm6, %v7947_v50  ;;  %2622 = vmatpush1.bf16.msra.mxu1 %v6913_v57  ;;  %v6918_v50 = vld [vmem:[%s9117_s4 + $0x6c] ss:$8 sps:$4 sm:$0xff]  }
 0x1ef   : > { %2623 = vmatprep.subr.bf16.mxu1 %v6918_v50  ;;  %v6930_v50 = vld [vmem:[%s9117_s4] ss:$8 sps:$4 sm:$0xff]  }
 0x1f5   : > { %2408 = vmatmul.mubr.bf16.gmra.mrb[68].mxu1 %v7942_v52  ;;  %v6916_v52 = vld [vmem:[%s9117_s4 + $0x68] ss:$8 sps:$4 sm:$0xff]  }
 0x1f6   : > { %5720 = vmatprep.mubr.msk.bf16.mxu1 %vm2153_vm6, %v7980_v61  ;;  %2624 = vmatpush1.bf16.msra.mxu1 %v6916_v52  ;;  %v6921_v61 = vld [vmem:[%s9117_s4 + $0x7c] ss:$8 sps:$4 sm:$0xff]  }
 0x1f7   : > { %2625 = vmatprep.subr.bf16.mxu1 %v6921_v61  ;;  %v6935_v61 = vld [vmem:[%s9117_s4 + $0x14] ss:$8 sps:$4 sm:$0xff]  }
 0x1fd   : > { %2416 = vmatmul.mubr.bf16.gmra.mrb[72].mxu1 %v7975_v10  ;;  %v6919_v10 = vld [vmem:[%s9117_s4 + $0x78] ss:$8 sps:$4 sm:$0xff]  }
 0x1fe   : > { %5721 = vmatprep.mubr.msk.bf16.mxu1 %vm2153_vm6, %v8013_v22  ;;  %2626 = vmatpush1.bf16.msra.mxu1 %v6919_v10  ;;  %v6924_v22 = vld [vmem:[%s9117_s4 + $0x8c] ss:$8 sps:$4 sm:$0xff]  }
 0x1ff   : > { %2627 = vmatprep.subr.bf16.mxu1 %v6924_v22 }
 0x205   : > { %2424 = vmatmul.mubr.bf16.gmra.mrb[76].mxu1 %v8008_v48  ;;  %v6922_v48 = vld [vmem:[%s9117_s4 + $0x88] ss:$8 sps:$4 sm:$0xff]  }
 0x206   : > { %5722 = vmatprep.mubr.msk.bf16.mxu1 %vm2153_vm6, %v8044_v53  ;;  %2628 = vmatpush1.bf16.msra.mxu1 %v6922_v48  ;;  %v6927_v53 = vld [vmem:[%s9117_s4 + $0x9c] ss:$8 sps:$4 sm:$0xff]  }
 0x207   : > { %2629 = vmatprep.subr.bf16.mxu1 %v6927_v53 }
 0x20d   : > { %2432 = vmatmul.mubr.bf16.gmra.mrb[80].mxu1 %v8041_v49  ;;  %v6925_v49 = vld [vmem:[%s9117_s4 + $0x98] ss:$8 sps:$4 sm:$0xff]  }
 0x20e   : > { %5723 = vmatprep.mubr.msk.bf16.mxu1 %vm2153_vm6, %v2064_v28  ;;  %2630 = vmatpush1.bf16.msra.mxu1 %v6925_v49 }
 0x20f   : > { %5749 = vmatprep.subr.msk.bf16.mxu1 %vm2614_vm7, %v5748_v20 }
 0x212   : > { %2632 = vmatpush1.bf16.msra.mxu1 %v2616_v35  ;;  %v6938_v35 = vld [vmem:[%s9117_s4 + $0x24] ss:$8 sps:$4 sm:$0xff]  }
 0x213   : > { %2817 = vmatprep.subr.bf16.mxu1 %v6932_v55 }
 0x215   : > { %2440 = vmatmul.mubr.bf16.gmra.mrb[84].mxu1 %v2063_v59 }
 0x216   : > { %5724 = vmatprep.mubr.msk.bf16.mxu1 %vm2153_vm6, %v2066_v39 }
 0x21d   : > { %2448 = vmatmul.mubr.bf16.gmra.mrb[88].mxu1 %v2065_v25 }
 0x21e   : > { %5725 = vmatprep.mubr.msk.bf16.mxu1 %vm2153_vm6, %v2068_v44 }
 0x225   : > { %2456 = vmatmul.mubr.bf16.gmra.mrb[92].mxu1 %v2067_v18 }
 0x226   : > { %2653 = vmatprep.mubr.bf16.mxu1 %v7121_v2 }
 0x280   : > { %v2216_v21 = vpop.f32.mrb[32].mxu1 }
 0x281   : > { %v2218_v27 = vpop.f32.mrb[33].mxu1 }
 0x282   : > { %v2219_v33 = vpop.f32.mrb[34].mxu1  ;;  %v6936_v27 = vld [vmem:[%s9117_s4 + $0x20] ss:$8 sps:$4 sm:$0xff]  }
 0x283   : > { %v2221_v60 = vpop.f32.mrb[35].mxu1 }
 0x284   : > { %v6941_v60 = vld [vmem:[%s9117_s4 + $0x34] ss:$8 sps:$4 sm:$0xff]  }
 0x288   : > { %v2224_v7 = vpop.f32.mrb[36].mxu1 }
 0x289   : > { %v2226_v47 = vpop.f32.mrb[37].mxu1 }
 0x28a   : > { %v2227_v29 = vpop.f32.mrb[38].mxu1 }
 0x28b   : > { %v2229_v30 = vpop.f32.mrb[39].mxu1 }
 0x290   : > { %v2232_v23 = vpop.f32.mrb[40].mxu1 }
 0x291   : > { %v2234_v3 = vpop.f32.mrb[41].mxu1 }
 0x292   : > { %v2235_v8 = vpop.f32.mrb[42].mxu1 }
 0x293   : > { %v2237_v1 = vpop.f32.mrb[43].mxu1 }
 0x294   : > { %v6944_v1 = vld [vmem:[%s9117_s4 + $0x44] ss:$8 sps:$4 sm:$0xff]  }
 0x298   : > { %v8139_v19 = vpop.f32.mrb[44].mxu1 }
 0x299   : > { %v2242_v16 = vpop.f32.mrb[45].mxu1 }
 0x29a   : > { %v8141_v32 = vpop.f32.mrb[46].mxu1  ;;  %v2498_v16 = vld [vmem:[%s9117_s4 + $0x50] sm:$0x33] }
 0x29b   : > { %v2245_v14 = vpop.f32.mrb[47].mxu1 }
 0x29c   : > { %v6942_v14 = vld [vmem:[%s9117_s4 + $0x40] ss:$8 sps:$4 sm:$0xff]  }
 0x2a0   : > { %v8143_v59 = vpop.f32.mrb[48].mxu1 }
 0x2a1   : > { %v2250_v12 = vpop.f32.mrb[49].mxu1 }
 0x2a2   : > { %v8145_v54 = vpop.f32.mrb[50].mxu1 }
 0x2a3   : > { %v2253_v28 = vpop.f32.mrb[51].mxu1 }
 0x2a4   : > { %v5769_v28 = vcombine.high %v2498_v16, %v2498_v16 }
 0x2a8   : > { %v8147_v11 = vpop.f32.mrb[52].mxu1 }
 0x2a9   : > { %v2258_v9 = vpop.f32.mrb[53].mxu1 }
 0x2aa   : > { %v8149_v40 = vpop.f32.mrb[54].mxu1  ;;  %v5768_v9 = vcombine.low %v2498_v16, %v2498_v16 }
 0x2ab   : > { %v2261_v45 = vpop.f32.mrb[55].mxu1 }
 0x2b0   : > { %v8151_v63 = vpop.f32.mrb[56].mxu1 }
 0x2b1   : > { %v2266_v31 = vpop.f32.mrb[57].mxu1 }
 0x2b2   : > { %v8153_v15 = vpop.f32.mrb[58].mxu1 }
 0x2b3   : > { %v2269_v41 = vpop.f32.mrb[59].mxu1 }
 0x2b8   : > { %v8155_v24 = vpop.f32.mrb[60].mxu1 }
 0x2b9   : > { %v2274_v0 = vpop.f32.mrb[61].mxu1 }
 0x2ba   : > { %v8157_v51 = vpop.f32.mrb[62].mxu1 }
 0x2bb   : > { %v2277_v26 = vpop.f32.mrb[63].mxu1 }
 0x2c0   : > { %v2401_v62 = vpop.f32.mrb[64].mxu1 }
 0x2c1   : > { %v2464_v6 = vmax.f32 %v2216_v21, %v2401_v62  ;;  %v2403_v34 = vpop.f32.mrb[65].mxu1 }
 0x2c2   : > { %v2404_v37 = vpop.f32.mrb[66].mxu1 }
 0x2c3   : > { %v2465_v58 = vmax.f32 %v2219_v33, %v2404_v37  ;;  %v2406_v56 = vpop.f32.mrb[67].mxu1 }
 0x2c5   : > { %v8159_v38 = vpack.c.bf16 %v2465_v58, %v2464_v6  ;;  %v2812_v6 = vsel %vm2614_vm7, %v5768_v9, 0  ;;  %v6969_v9 = vld [vmem:[%s9117_s4 + $0x11c] ss:$8 sps:$4 sm:$0xff]  }
 0x2c7   : > { %v2519_v46 = vrot.slane %v8159_v38, 1 }
 0x2c8   : > { %v2409_v25 = vpop.f32.mrb[68].mxu1 }
 0x2c9   : > { %v2466_v13 = vmax.f32 %v2224_v7, %v2409_v25  ;;  %v2411_v36 = vpop.f32.mrb[69].mxu1 }
 0x2ca   : > { %v2412_v39 = vpop.f32.mrb[70].mxu1 }
 0x2cb   : > { %v2467_v18 = vmax.f32 %v2227_v29, %v2412_v39  ;;  %v2414_v44 = vpop.f32.mrb[71].mxu1 }
 0x2cd   : > { %v8161_v57 = vpack.c.bf16 %v2467_v18, %v2466_v13 }
 0x2cf   : > { %v2520_v52 = vrot.slane %v8161_v57, 1 }
 0x2d0   : > { %v2417_v10 = vpop.f32.mrb[72].mxu1 }
 0x2d1   : > { %v2468_v48 = vmax.f32 %v2232_v23, %v2417_v10  ;;  %v2419_v22 = vpop.f32.mrb[73].mxu1  ;;  %v2521_v49 = vsel %vm1023_vm3, %v2519_v46, %v2520_v52 }
 0x2d2   : > { %v2420_v53 = vpop.f32.mrb[74].mxu1  ;;  %5750 = vmatmul.mubr.msk.bf16.vlgmr.msra.gmra.mrb[96].mxu1 %vm2589_vm8, %v2521_v49 }
 0x2d3   : > { %v2469_v42 = vmax.f32 %v2235_v8, %v2420_v53  ;;  %v2422_v20 = vpop.f32.mrb[75].mxu1  ;;  %2663 = vmatprep.mubr.bf16.mxu1 %v7121_v2  ;;  %2818 = vmatpush1.bf16.msra.mxu1 %v6930_v50  ;;  %v6939_v8 = vld [vmem:[%s9117_s4 + $0x30] ss:$8 sps:$4 sm:$0xff]  }
 0x2d4   : > { %2819 = vmatprep.subr.bf16.mxu1 %v6935_v61 }
 0x2d5   : > { %v8180_v55 = vpack.c.bf16 %v2469_v42, %v2468_v48 }
 0x2d7   : > { %v2522_v21 = vrot.slane %v8180_v55, 1  ;;  %2820 = vmatpush1.bf16.msra.mxu1 %v6933_v17 }
 0x2d8   : > { %v2425_v33 = vpop.f32.mrb[76].mxu1  ;;  %2821 = vmatprep.subr.bf16.mxu1 %v6938_v35 }
 0x2d9   : > { %v2470_v7 = vmax.f32 %v8139_v19, %v2425_v33  ;;  %v2427_v47 = vpop.f32.mrb[77].mxu1  ;;  %v2523_v29 = vsel %vm1023_vm3, %v2520_v52, %v2522_v21  ;;  %v6950_v33 = vld [vmem:[%s9117_s4 + $0xc0] ss:$8 sps:$4 sm:$0xff]  }
 0x2da   : > { %v2428_v30 = vpop.f32.mrb[78].mxu1  ;;  %5751 = vmatmul.mubr.msk.bf16.gmra.mrb[100].mxu1 %vm2589_vm8, %v2523_v29  ;;  %v6958_v47 = vld [vmem:[%s9117_s4 + $0xe4] ss:$8 sps:$4 sm:$0xff]   ;;  %v6956_v29 = vld [vmem:[%s9117_s4 + $0xe0] ss:$8 sps:$4 sm:$0xff]  }
 0x2db   : > { %v2471_v23 = vmax.f32 %v8141_v32, %v2428_v30  ;;  %v2430_v3 = vpop.f32.mrb[79].mxu1  ;;  %2673 = vmatprep.mubr.bf16.mxu1 %v7121_v2  ;;  %2822 = vmatpush1.bf16.msra.mxu1 %v6936_v27  ;;  %v6961_v30 = vld [vmem:[%s9117_s4 + $0xf4] ss:$8 sps:$4 sm:$0xff]  }
 0x2dc   : > { %2823 = vmatprep.subr.bf16.mxu1 %v6941_v60  ;;  %v6955_v60 = vld [vmem:[%s9117_s4 + $0xd4] ss:$8 sps:$4 sm:$0xff]   ;;  %v6959_v3 = vld [vmem:[%s9117_s4 + $0xf0] ss:$8 sps:$4 sm:$0xff]  }
 0x2dd   : > { %v8200_v19 = vpack.c.bf16 %v2471_v23, %v2470_v7  ;;  %v6953_v7 = vld [vmem:[%s9117_s4 + $0xd0] ss:$8 sps:$4 sm:$0xff]   ;;  %v5789_v23 = vld [vmem:[%s9117_s4 + $0x100] sm:$0x33] }
 0x2df   : > { %v2524_v32 = vrot.slane %v8200_v19, 1  ;;  %2824 = vmatpush1.bf16.msra.mxu1 %v6939_v8  ;;  %v5801_v8 = vcombine.high %v5789_v23, %v5789_v23 }
 0x2e0   : > { %v2433_v12 = vpop.f32.mrb[80].mxu1  ;;  %2825 = vmatprep.subr.bf16.mxu1 %v6944_v1  ;;  %v5800_v1 = vcombine.low %v5789_v23, %v5789_v23 }
 0x2e1   : > { %v2472_v45 = vmax.f32 %v8143_v59, %v2433_v12  ;;  %v2435_v31 = vpop.f32.mrb[81].mxu1  ;;  %v2525_v41 = vsel %vm1023_vm3, %v2522_v21, %v2524_v32  ;;  %v6949_v59 = vld [vmem:[%s9117_s4 + $0xb4] ss:$8 sps:$4 sm:$0xff]   ;;  %v2940_v12 = vrot.slane %v8159_v38, 2 }
 0x2e2   : > { %v2436_v0 = vpop.f32.mrb[82].mxu1  ;;  %5752 = vmatmul.mubr.msk.bf16.gmra.mrb[104].mxu1 %vm2589_vm8, %v2525_v41  ;;  %v3035_v16 = vsel %vm2614_vm7, %v5800_v1, 0  ;;  %v6967_v31 = vld [vmem:[%s9117_s4 + $0x118] ss:$8 sps:$4 sm:$0xff]   ;;  %v6972_v41 = vld [vmem:[%s9117_s4 + $0x12c] ss:$8 sps:$4 sm:$0xff]  }
 0x2e3   : > { %v2473_v26 = vmax.f32 %v8145_v54, %v2436_v0  ;;  %v2438_v62 = vpop.f32.mrb[83].mxu1  ;;  %2683 = vmatprep.mubr.bf16.mxu1 %v7121_v2  ;;  %2826 = vmatpush1.bf16.msra.mxu1 %v6942_v14  ;;  %v2941_v14 = vrot.slane %v8161_v57, 2  ;;  %v2943_v0 = vrot.slane %v8180_v55, 2 }
 0x2e4   : > { %5770 = vmatprep.subr.msk.bf16.mxu1 %vm2614_vm7, %v5769_v28  ;;  %v6964_v28 = vld [vmem:[%s9117_s4 + $0x108] ss:$8 sps:$4 sm:$0xff]   ;;  %v6975_v62 = vld [vmem:[%s9117_s4 + $0x13c] ss:$8 sps:$4 sm:$0xff]  }
 0x2e5   : > { %v8219_v34 = vpack.c.bf16 %v2473_v26, %v2472_v45  ;;  %v2942_v45 = vsel %vm1573_vm4, %v2940_v12, %v2941_v14  ;;  %v6970_v26 = vld [vmem:[%s9117_s4 + $0x128] ss:$8 sps:$4 sm:$0xff]  }
 0x2e7   : > { %v2526_v37 = vrot.slane %v8219_v34, 1  ;;  %2828 = vmatpush1.bf16.msra.mxu1 %v2812_v6  ;;  %v2944_v6 = vsel %vm1573_vm4, %v2941_v14, %v2943_v0  ;;  %v3201_v1 = vrot.slane %v8219_v34, 3 }
 0x2e8   : > { %v2441_v58 = vpop.f32.mrb[84].mxu1  ;;  %3040 = vmatprep.subr.bf16.mxu1 %v6949_v59  ;;  %v6973_v59 = vld [vmem:[%s9117_s4 + $0x138] ss:$8 sps:$4 sm:$0xff]  }
 0x2e9   : > { %v2474_v54 = vmax.f32 %v8147_v11, %v2441_v58  ;;  %v2443_v56 = vpop.f32.mrb[85].mxu1  ;;  %v2527_v25 = vsel %vm1023_vm3, %v2524_v32, %v2526_v37  ;;  %v6966_v32 = vld [vmem:[%s9117_s4 + $0x10c] ss:$8 sps:$4 sm:$0xff]   ;;  %v2945_v58 = vrot.slane %v8200_v19, 2 }
 0x2ea   : > { %v2444_v13 = vpop.f32.mrb[86].mxu1  ;;  %5753 = vmatmul.mubr.msk.bf16.gmra.mrb[108].mxu1 %vm2589_vm8, %v2527_v25  ;;  %v6976_v56 = vld [vmem:[%s9117_s4 + $0x148] ss:$8 sps:$4 sm:$0xff]  }
 0x2eb   : > { %v2475_v36 = vmax.f32 %v8149_v40, %v2444_v13  ;;  %v2446_v39 = vpop.f32.mrb[87].mxu1  ;;  %2693 = vmatprep.mubr.bf16.mxu1 %v7121_v2 }
 0x2ed   : > { %v8227_v18 = vpack.c.bf16 %v2475_v36, %v2474_v54  ;;  %v5821_v54 = vld [vmem:[%s9117_s4 + $0x158] sm:$0x33]  ;;  %v2946_v36 = vsel %vm1573_vm4, %v2943_v0, %v2945_v58 }
 0x2ee   : > { %v5833_v25 = vcombine.high %v5821_v54, %v5821_v54  ;;  %v5832_v13 = vcombine.low %v5821_v54, %v5821_v54 }
 0x2ef   : > { %v2528_v44 = vrot.slane %v8227_v18, 1 }
 0x2f0   : > { %v2449_v46 = vpop.f32.mrb[88].mxu1  ;;  %v3289_v39 = vsel %vm2614_vm7, %v5832_v13, 0  ;;  %v3457_v13 = vrot.slane %v8227_v18, 4 }
 0x2f1   : > { %v2476_v52 = vmax.f32 %v8151_v63, %v2449_v46  ;;  %v2451_v50 = vpop.f32.mrb[89].mxu1  ;;  %v2529_v11 = vsel %vm1023_vm3, %v2526_v37, %v2528_v44  ;;  %v6978_v37 = vld [vmem:[%s9117_s4 + $0x14c] ss:$8 sps:$4 sm:$0xff]   ;;  %v2947_v46 = vrot.slane %v8219_v34, 2 }
 0x2f2   : > { %v2452_v10 = vpop.f32.mrb[90].mxu1  ;;  %5754 = vmatmul.mubr.msk.bf16.gmra.mrb[112].mxu1 %vm2589_vm8, %v2529_v11  ;;  %v2949_v50 = vrot.slane %v8227_v18, 2 }
 0x2f3   : > { %v2477_v61 = vmax.f32 %v8153_v15, %v2452_v10  ;;  %v2454_v48 = vpop.f32.mrb[91].mxu1  ;;  %2703 = vmatprep.mubr.bf16.mxu1 %v7121_v2 }
 0x2f4   : > { %v2950_v11 = vsel %vm1573_vm4, %v2947_v46, %v2949_v50 }
 0x2f5   : > { %v8235_v40 = vpack.c.bf16 %v2477_v61, %v2476_v52  ;;  %v2948_v52 = vsel %vm1573_vm4, %v2945_v58, %v2947_v46  ;;  %v6998_v58 = vld [vmem:[%s9119_s6] sm:$0xff]  }
 0x2f6   : > { %4032 = vmatpush1.bf16.msra.mxu0 %v6998_v58 }
 0x2f7   : > { %v2530_v22 = vrot.slane %v8235_v40, 1  ;;  %v2951_v10 = vrot.slane %v8235_v40, 2  ;;  %v3205_v12 = vrot.slane %v8235_v40, 3  ;;  %4033 = vmatprep.subr.bf16.mxu0 %v7121_v2 }
 0x2f8   : > { %v2457_v49 = vpop.f32.mrb[92].mxu1 }
 0x2f9   : > { %v2478_v53 = vmax.f32 %v8155_v24, %v2457_v49  ;;  %v2459_v42 = vpop.f32.mrb[93].mxu1  ;;  %v2531_v63 = vsel %vm1023_vm3, %v2528_v44, %v2530_v22  ;;  %v6947_v24 = vld [vmem:[%s9117_s4 + $0xb0] ss:$8 sps:$4 sm:$0xff]   ;;  %v6983_v44 = vld [vmem:[%s9117_s4 + $0x164] ss:$8 sps:$4 sm:$0xff]   ;;  %v2952_v61 = vsel %vm1573_vm4, %v2949_v50, %v2951_v10  ;;  %v3195_v49 = vrot.slane %v8161_v57, 3 }
 0x2fa   : > { %v2460_v20 = vpop.f32.mrb[94].mxu1  ;;  %5755 = vmatmul.mubr.msk.bf16.gmra.mrb[116].mxu1 %vm2589_vm8, %v2531_v63  ;;  %v6981_v42 = vld [vmem:[%s9117_s4 + $0x160] ss:$8 sps:$4 sm:$0xff]   ;;  %v6986_v63 = vld [vmem:[%s9117_s4 + $0x174] ss:$8 sps:$4 sm:$0xff]  }
 0x2fb   : > { %v2479_v17 = vmax.f32 %v8157_v51, %v2460_v20  ;;  %v2462_v35 = vpop.f32.mrb[95].mxu1  ;;  %2713 = vmatprep.mubr.bf16.mxu1 %v7121_v2  ;;  %v6952_v51 = vld [vmem:[%s9117_s4 + $0xc4] ss:$8 sps:$4 sm:$0xff]  }
 0x2fc   : > { %v6989_v35 = vld [vmem:[%s9117_s4 + $0x184] ss:$8 sps:$4 sm:$0xff]  }
 0x2fd   : > { %v8243_v15 = vpack.c.bf16 %v2479_v17, %v2478_v53  ;;  %v3194_v53 = vrot.slane %v8159_v38, 3  ;;  %v6984_v17 = vld [vmem:[%s9117_s4 + $0x170] ss:$8 sps:$4 sm:$0xff]  }
 0x2ff   : > { %v2532_v21 = vrot.slane %v8243_v15, 1  ;;  %v2953_v48 = vrot.slane %v8243_v15, 2  ;;  %v3196_v20 = vsel %vm3193_vm9, %v3194_v53, %v3195_v49  ;;  %v7006_v53 = vld [vmem:[%s9119_s6 + $0x40] sm:$0xff]  }
 0x301   : > { %v2533_v27 = vsel %vm1023_vm3, %v2530_v22, %v2532_v21  ;;  %v2954_v22 = vsel %vm1573_vm4, %v2951_v10, %v2953_v48  ;;  %v7001_v10 = vld [vmem:[%s9119_s6 + $0x18] sm:$0xff]  }
 0x302   : > { %5756 = vmatmul.mubr.msk.bf16.gmra.mrb[120].mxu1 %vm2589_vm8, %v2533_v27  ;;  %v6987_v27 = vld [vmem:[%s9117_s4 + $0x180] ss:$8 sps:$4 sm:$0xff]  }
 0x303   : > { %2723 = vmatprep.mubr.bf16.mxu1 %v7121_v2 }
 0x30a   : > { %5757 = vmatmul.mubr.msk.bf16.gmra.mrb[124].mxu1 %vm2589_vm8, %v2532_v21  ;;  %v3197_v21 = vrot.slane %v8180_v55, 3 }
 0x30b   : > { %2849 = vmatprep.mubr.bf16.mxu1 %v7121_v2 }
 0x312   : > { %5771 = vmatmul.mubr.msk.bf16.vlgmr.msra.gmra.mrb[96].mxu1 %vm2589_vm8, %v8159_v38 }
 0x313   : > { %2859 = vmatprep.mubr.bf16.mxu1 %v7121_v2  ;;  %3041 = vmatpush1.bf16.msra.mxu1 %v6947_v24  ;;  %v6992_v24 = vld [vmem:[%s9117_s4 + $0x194] ss:$8 sps:$4 sm:$0xff]  }
 0x314   : > { %3042 = vmatprep.subr.bf16.mxu1 %v6952_v51  ;;  %v3198_v51 = vsel %vm3193_vm9, %v3195_v49, %v3197_v21  ;;  %v7005_v49 = vld [vmem:[%s9119_s6 + $0x38] sm:$0xff]  }
 0x317   : > { %3043 = vmatpush1.bf16.msra.mxu1 %v6950_v33  ;;  %v6990_v33 = vld [vmem:[%s9117_s4 + $0x190] ss:$8 sps:$4 sm:$0xff]  }
 0x318   : > { %3044 = vmatprep.subr.bf16.mxu1 %v6955_v60  ;;  %v6995_v60 = vld [vmem:[%s9117_s4 + $0x1a4] ss:$8 sps:$4 sm:$0xff]  }
 0x31a   : > { %5772 = vmatmul.mubr.msk.bf16.gmra.mrb[100].mxu1 %vm2589_vm8, %v8161_v57 }
 0x31b   : > { %2869 = vmatprep.mubr.bf16.mxu1 %v7121_v2  ;;  %3045 = vmatpush1.bf16.msra.mxu1 %v6953_v7  ;;  %v3199_v7 = vrot.slane %v8200_v19, 3 }
 0x31c   : > { %3046 = vmatprep.subr.bf16.mxu1 %v6958_v47  ;;  %v5853_v47 = vld [vmem:[%s9117_s4 + $0x1b0] sm:$0x33] }
 0x31d   : > { %v5864_v23 = vcombine.low %v5853_v47, %v5853_v47 }
 0x31f   : > { %3047 = vmatpush1.bf16.msra.mxu1 %v6956_v29  ;;  %v6993_v29 = vld [vmem:[%s9117_s4 + $0x1a0] ss:$8 sps:$4 sm:$0xff]  }
 0x320   : > { %3048 = vmatprep.subr.bf16.mxu1 %v6961_v30  ;;  %v5865_v30 = vcombine.high %v5853_v47, %v5853_v47  ;;  %v3689_v47 = vld [vmem:[%s9118_s5] sm:$0x3] }
 0x322   : > { %5773 = vmatmul.mubr.msk.bf16.gmra.mrb[104].mxu1 %vm2589_vm8, %v8180_v55 }
 0x323   : > { %2879 = vmatprep.mubr.bf16.mxu1 %v7121_v2  ;;  %3049 = vmatpush1.bf16.msra.mxu1 %v6959_v3  ;;  %v3200_v3 = vsel %vm3193_vm9, %v3197_v21, %v3199_v7 }
 0x324   : > { %5802 = vmatprep.subr.msk.bf16.mxu1 %vm2614_vm7, %v5801_v8  ;;  %v3543_v8 = vsel %vm2614_vm7, %v5864_v23, 0  ;;  %v8522_v23 = vrot.slane %v3689_v47, %v1826_v43 }
 0x327   : > { %3051 = vmatpush1.bf16.msra.mxu1 %v3035_v16  ;;  %v3202_v16 = vsel %vm3193_vm9, %v3199_v7, %v3201_v1 }
 0x328   : > { %3294 = vmatprep.subr.bf16.mxu1 %v6966_v32  ;;  %v3203_v32 = vrot.slane %v8227_v18, 3 }
 0x32a   : > { %5774 = vmatmul.mubr.msk.bf16.gmra.mrb[108].mxu1 %vm2589_vm8, %v8200_v19  ;;  %v3204_v14 = vsel %vm3193_vm9, %v3201_v1, %v3203_v32 }
 0x32b   : > { %2889 = vmatprep.mubr.bf16.mxu1 %v7121_v2 }
 0x332   : > { %5775 = vmatmul.mubr.msk.bf16.gmra.mrb[112].mxu1 %vm2589_vm8, %v8219_v34 }
 0x333   : > { %2899 = vmatprep.mubr.bf16.mxu1 %v7121_v2 }
 0x33a   : > { %5776 = vmatmul.mubr.msk.bf16.gmra.mrb[116].mxu1 %vm2589_vm8, %v8227_v18 }
 0x33b   : > { %2909 = vmatprep.mubr.bf16.mxu1 %v7121_v2 }
 0x342   : > { %5777 = vmatmul.mubr.msk.bf16.gmra.mrb[120].mxu1 %vm2589_vm8, %v8235_v40 }
 0x343   : > { %2919 = vmatprep.mubr.bf16.mxu1 %v7121_v2 }
 0x34a   : > { %5778 = vmatmul.mubr.msk.bf16.gmra.mrb[128].mxu1 %vm2589_vm8, %v8243_v15 }
 0x34b   : > { %3072 = vmatprep.mubr.bf16.mxu1 %v7121_v2 }
 0x352   : > { %5803 = vmatmul.mubr.msk.bf16.vlgmr.msra.gmra.mrb[96].mxu1 %vm2589_vm8, %v2942_v45 }
 0x353   : > { %3082 = vmatprep.mubr.bf16.mxu1 %v7121_v2  ;;  %3295 = vmatpush1.bf16.msra.mxu1 %v6964_v28  ;;  %v3206_v28 = vsel %vm3193_vm9, %v3203_v32, %v3205_v12 }
 0x354   : > { %3296 = vmatprep.subr.bf16.mxu1 %v6969_v9  ;;  %v3207_v9 = vrot.slane %v8243_v15, 3 }
 0x356   : > { %v3208_v45 = vsel %vm3193_vm9, %v3205_v12, %v3207_v9 }
 0x357   : > { %3297 = vmatpush1.bf16.msra.mxu1 %v6967_v31  ;;  %v3449_v31 = vrot.slane %v8161_v57, 4 }
 0x358   : > { %3298 = vmatprep.subr.bf16.mxu1 %v6972_v41  ;;  %v3448_v41 = vrot.slane %v8159_v38, 4 }
 0x35a   : > { %5804 = vmatmul.mubr.msk.bf16.gmra.mrb[100].mxu1 %vm2589_vm8, %v2944_v6  ;;  %v3450_v0 = vsel %vm2178_vm5, %v3448_v41, %v3449_v31 }
 0x35b   : > { %3092 = vmatprep.mubr.bf16.mxu1 %v7121_v2  ;;  %3299 = vmatpush1.bf16.msra.mxu1 %v6970_v26  ;;  %v3451_v26 = vrot.slane %v8180_v55, 4  ;;  %v6999_v55 = vld [vmem:[%s9119_s6 + $0x8] sm:$0xff]  }
 0x35c   : > { %3300 = vmatprep.subr.bf16.mxu1 %v6975_v62  ;;  %4034 = vmatpush1.bf16.msra.mxu0 %v6999_v55 }
 0x35d   : > { %v3452_v62 = vsel %vm2178_vm5, %v3449_v31, %v3451_v26  ;;  %4035 = vmatprep.subr.bf16.mxu0 %v7121_v2 }
 0x35f   : > { %3301 = vmatpush1.bf16.msra.mxu1 %v6973_v59  ;;  %v3453_v59 = vrot.slane %v8200_v19, 4  ;;  %v3455_v19 = vrot.slane %v8219_v34, 4 }
 0x360   : > { %3302 = vmatprep.subr.bf16.mxu1 %v6978_v37 }
 0x361   : > { %v3454_v54 = vsel %vm2178_vm5, %v3451_v26, %v3453_v59  ;;  %v3458_v34 = vsel %vm2178_vm5, %v3455_v19, %v3457_v13 }
 0x362   : > { %5805 = vmatmul.mubr.msk.bf16.gmra.mrb[104].mxu1 %vm2589_vm8, %v2946_v36  ;;  %v3459_v36 = vrot.slane %v8235_v40, 4 }
 0x363   : > { %3102 = vmatprep.mubr.bf16.mxu1 %v7121_v2  ;;  %3303 = vmatpush1.bf16.msra.mxu1 %v6976_v56  ;;  %v7000_v56 = vld [vmem:[%s9119_s6 + $0x10] sm:$0xff]  }
 0x364   : > { %5834 = vmatprep.subr.msk.bf16.mxu1 %vm2614_vm7, %v5833_v25  ;;  %v3456_v25 = vsel %vm2178_vm5, %v3453_v59, %v3455_v19  ;;  %4036 = vmatpush1.bf16.msra.mxu0 %v7000_v56 }
 0x365   : > { %4037 = vmatprep.subr.bf16.mxu0 %v7121_v2 }
 0x367   : > { %3305 = vmatpush1.bf16.msra.mxu1 %v3289_v39  ;;  %v3460_v39 = vsel %vm2178_vm5, %v3457_v13, %v3459_v36 }
 0x368   : > { %3548 = vmatprep.subr.bf16.mxu1 %v6983_v44  ;;  %v3461_v44 = vrot.slane %v8243_v15, 4  ;;  %4038 = vmatpush1.bf16.msra.mxu0 %v7001_v10  ;;  %v7002_v15 = vld [vmem:[%s9119_s6 + $0x20] sm:$0xff]  }
 0x369   : > { %4039 = vmatprep.subr.bf16.mxu0 %v7121_v2 }
 0x36a   : > { %5806 = vmatmul.mubr.msk.bf16.gmra.mrb[108].mxu1 %vm2589_vm8, %v2948_v52  ;;  %v3462_v46 = vsel %vm2178_vm5, %v3459_v36, %v3461_v44 }
 0x36b   : > { %3112 = vmatprep.mubr.bf16.mxu1 %v7121_v2 }
 0x36c   : > { %4040 = vmatpush1.bf16.msra.mxu0 %v7002_v15 }
 0x36d   : > { %4041 = vmatprep.subr.bf16.mxu0 %v7121_v2 }
 0x372   : > { %5807 = vmatmul.mubr.msk.bf16.gmra.mrb[112].mxu1 %vm2589_vm8, %v2950_v11 }
 0x373   : > { %3122 = vmatprep.mubr.bf16.mxu1 %v7121_v2 }
 0x37a   : > { %5808 = vmatmul.mubr.msk.bf16.gmra.mrb[116].mxu1 %vm2589_vm8, %v2952_v61 }
 0x37b   : > { %3132 = vmatprep.mubr.bf16.mxu1 %v7121_v2 }
 0x382   : > { %5809 = vmatmul.mubr.msk.bf16.gmra.mrb[120].mxu1 %vm2589_vm8, %v2954_v22  ;;  %v7004_v22 = vld [vmem:[%s9119_s6 + $0x30] sm:$0xff]  }
 0x383   : > { %3142 = vmatprep.mubr.bf16.mxu1 %v7121_v2 }
 0x38a   : > { %5810 = vmatmul.mubr.msk.bf16.gmra.mrb[132].mxu1 %vm2589_vm8, %v2953_v48  ;;  %v7003_v48 = vld [vmem:[%s9119_s6 + $0x28] sm:$0xff]  }
 0x38b   : > { %3326 = vmatprep.mubr.bf16.mxu1 %v7121_v2  ;;  %4042 = vmatpush1.bf16.msra.mxu0 %v7003_v48 }
 0x38c   : > { %4043 = vmatprep.subr.bf16.mxu0 %v7121_v2 }
 0x38f   : > { %4044 = vmatpush1.bf16.msra.mxu0 %v7004_v22 }
 0x390   : > { %4045 = vmatprep.subr.bf16.mxu0 %v7121_v2 }
 0x392   : > { %5835 = vmatmul.mubr.msk.bf16.vlgmr.msra.gmra.mrb[96].mxu1 %vm2589_vm8, %v3196_v20 }
 0x393   : > { %3336 = vmatprep.mubr.bf16.mxu1 %v7121_v2  ;;  %3549 = vmatpush1.bf16.msra.mxu1 %v6981_v42  ;;  %v7007_v42 = vld [vmem:[%s9119_s6 + $0x48] sm:$0xff]  }
 0x394   : > { %3550 = vmatprep.subr.bf16.mxu1 %v6986_v63  ;;  %4046 = vmatpush1.bf16.msra.mxu0 %v7005_v49 }
 0x395   : > { %4047 = vmatprep.subr.bf16.mxu0 %v7121_v2 }
 0x397   : > { %3551 = vmatpush1.bf16.msra.mxu1 %v6984_v17 }
 0x398   : > { %3552 = vmatprep.subr.bf16.mxu1 %v6989_v35  ;;  %4048 = vmatpush1.bf16.msra.mxu0 %v7006_v53 }
 0x399   : > { %4049 = vmatprep.subr.bf16.mxu0 %v7121_v2 }
 0x39a   : > { %5836 = vmatmul.mubr.msk.bf16.gmra.mrb[100].mxu1 %vm2589_vm8, %v3198_v51 }
 0x39b   : > { %3346 = vmatprep.mubr.bf16.mxu1 %v7121_v2  ;;  %3553 = vmatpush1.bf16.msra.mxu1 %v6987_v27 }
 0x39c   : > { %3554 = vmatprep.subr.bf16.mxu1 %v6992_v24  ;;  %4050 = vmatpush1.bf16.msra.mxu0 %v7007_v42 }
 0x39d   : > { %4208 = vmatprep.subr.bf16.mxu0 %v7121_v2 }
 0x39f   : > { %3555 = vmatpush1.bf16.msra.mxu1 %v6990_v33 }
 0x3a0   : > { %3556 = vmatprep.subr.bf16.mxu1 %v6995_v60 }
 0x3a2   : > { %5837 = vmatmul.mubr.msk.bf16.gmra.mrb[104].mxu1 %vm2589_vm8, %v3200_v3 }
 0x3a3   : > { %3356 = vmatprep.mubr.bf16.mxu1 %v7121_v2  ;;  %3557 = vmatpush1.bf16.msra.mxu1 %v6993_v29 }
 0x3a4   : > { %5866 = vmatprep.subr.msk.bf16.mxu1 %vm2614_vm7, %v5865_v30  ;;  %v8518_v30 = vrot.slane %v3689_v47, %v1822_v5 }
 0x3a7   : > { %3559 = vmatpush1.bf16.msra.mxu1 %v3543_v8 }
 0x3aa   : > { %5838 = vmatmul.mubr.msk.bf16.gmra.mrb[108].mxu1 %vm2589_vm8, %v3202_v16 }
 0x3ab   : > { %3366 = vmatprep.mubr.bf16.mxu1 %v7121_v2 }
 0x3b2   : > { %5839 = vmatmul.mubr.msk.bf16.gmra.mrb[112].mxu1 %vm2589_vm8, %v3204_v14 }
 0x3b3   : > { %3376 = vmatprep.mubr.bf16.mxu1 %v7121_v2 }
 0x3ba   : > { %5840 = vmatmul.mubr.msk.bf16.gmra.mrb[116].mxu1 %vm2589_vm8, %v3206_v28 }
 0x3bb   : > { %3386 = vmatprep.mubr.bf16.mxu1 %v7121_v2 }
 0x3c2   : > { %5841 = vmatmul.mubr.msk.bf16.gmra.mrb[120].mxu1 %vm2589_vm8, %v3208_v45 }
 0x3c3   : > { %3396 = vmatprep.mubr.bf16.mxu1 %v7121_v2 }
 0x3ca   : > { %5842 = vmatmul.mubr.msk.bf16.gmra.mrb[136].mxu1 %vm2589_vm8, %v3207_v9 }
 0x3cb   : > { %3580 = vmatprep.mubr.bf16.mxu1 %v7121_v2 }
 0x3d2   : > { %5867 = vmatmul.mubr.msk.bf16.vlgmr.msra.gmra.mrb[96].mxu1 %vm2589_vm8, %v3450_v0 }
 0x3d3   : > { %3590 = vmatprep.mubr.bf16.mxu1 %v7121_v2 }
 0x3da   : > { %5868 = vmatmul.mubr.msk.bf16.gmra.mrb[100].mxu1 %vm2589_vm8, %v3452_v62 }
 0x3db   : > { %3600 = vmatprep.mubr.bf16.mxu1 %v7121_v2 }
 0x3dd   : > { %v2725_v6 = vpop.f32.mrb[124].mxu1 }
 0x3de   : > { %v2727_v57 = vpop.f32.mrb[125].mxu1 }
 0x3df   : > { %v2729_v37 = vpop.f32.mrb[126].mxu1 }
 0x3e0   : > { %v2730_v38 = vpop.f32.mrb[127].mxu1 }
 0x3e2   : > { %5869 = vmatmul.mubr.msk.bf16.gmra.mrb[104].mxu1 %vm2589_vm8, %v3454_v54 }
 0x3e3   : > { %3610 = vmatprep.mubr.bf16.mxu1 %v7121_v2 }
 0x3ea   : > { %5870 = vmatmul.mubr.msk.bf16.gmra.mrb[108].mxu1 %vm2589_vm8, %v3456_v25 }
 0x3eb   : > { %3620 = vmatprep.mubr.bf16.mxu1 %v7121_v2 }
 0x3f2   : > { %5871 = vmatmul.mubr.msk.bf16.gmra.mrb[112].mxu1 %vm2589_vm8, %v3458_v34 }
 0x3f3   : > { %3630 = vmatprep.mubr.bf16.mxu1 %v7121_v2 }
 0x3fa   : > { %5872 = vmatmul.mubr.msk.bf16.gmra.mrb[116].mxu1 %vm2589_vm8, %v3460_v39 }
 0x3fb   : > { %3640 = vmatprep.mubr.bf16.mxu1 %v7121_v2 }
 0x402   : > { %5873 = vmatmul.mubr.msk.bf16.gmra.mrb[120].mxu1 %vm2589_vm8, %v3462_v46 }
 0x403   : > { %3650 = vmatprep.mubr.bf16.mxu1 %v7121_v2 }
 0x40a   : > { %5874 = vmatmul.mubr.msk.bf16.gmra.mrb[140].mxu1 %vm2589_vm8, %v3461_v44 }
 0x41d   : > { %v2921_v18 = vpop.f32.mrb[128].mxu1 }
 0x41e   : > { %v2922_v52 = vadd.f32 %v2921_v18, %v2725_v6  ;;  %v2923_v50 = vpop.f32.mrb[129].mxu1 }
 0x41f   : > { %v2924_v40 = vadd.f32 %v2923_v50, %v2727_v57  ;;  %v2925_v11 = vpop.f32.mrb[130].mxu1 }
 0x420   : > { %v2926_v61 = vpop.f32.mrb[131].mxu1 }
 0x45d   : > { %v3144_v63 = vpop.f32.mrb[132].mxu1 }
 0x45e   : > { %v3179_v20 = vadd.f32 %v3144_v63, %v2922_v52  ;;  %v3146_v17 = vpop.f32.mrb[133].mxu1 }
 0x45f   : > { %v3180_v35 = vadd.f32 %v3146_v17, %v2924_v40  ;;  %v3148_v21 = vpop.f32.mrb[134].mxu1 }
 0x460   : > { %v3149_v27 = vpop.f32.mrb[135].mxu1 }
 0x49d   : > { %v3398_v24 = vpop.f32.mrb[136].mxu1 }
 0x49e   : > { %v8509_v51 = vadd.f32 %v3398_v24, %v3179_v20  ;;  %v3400_v33 = vpop.f32.mrb[137].mxu1  ;;  %v7008_v24 = vld [vmem:[%s9119_s6 + $0x50] sm:$0xff]  }
 0x49f   : > { %v8511_v60 = vadd.f32 %v3400_v33, %v3180_v35  ;;  %v3402_v7 = vpop.f32.mrb[138].mxu1 }
 0x4a0   : > { %v3403_v29 = vpop.f32.mrb[139].mxu1 }
 0x4a5   : > { %v3582_v3 = vpop.f32.mrb[96].mxu1 }
 0x4a6   : > { %v3701_v8 = vadd.f32 %v8518_v30, %v3582_v3  ;;  %v3584_v1 = vpop.f32.mrb[97].mxu1 }
 0x4a7   : > { %v3702_v16 = vadd.f32 %v8522_v23, %v3584_v1  ;;  %v3586_v32 = vpop.f32.mrb[98].mxu1 }
 0x4a8   : > { %v3731_v14 = vmax.f32 %v3701_v8, 0.0  ;;  %v3703_v12 = vadd.f32 %v8518_v30, %v3586_v32  ;;  %v3588_v28 = vpop.f32.mrb[99].mxu1  ;;  %v7009_v32 = vld [vmem:[%s9119_s6 + $0x58] sm:$0xff]  }
 0x4a9   : > { %v3732_v9 = vmax.f32 %v3702_v16, 0.0  ;;  %v3704_v45 = vadd.f32 %v8522_v23, %v3588_v28 }
 0x4aa   : > { %v3733_v5 = vmax.f32 %v3703_v12, 0.0  ;;  %v3792_v41 = vrot.slane %v3731_v14, 2 }
 0x4ab   : > { %v3734_v31 = vmax.f32 %v3704_v45, 0.0  ;;  %v3795_v43 = vrot.slane %v3732_v9, 2 }
 0x4ac   : > { %v3793_v4 = vrot.slane %v3733_v5, 2 }
 0x4ad   : > { %v3796_v0 = vrot.slane %v3734_v31, 2  ;;  %v3592_v26 = vpop.f32.mrb[100].mxu1 }
 0x4ae   : > { %v3794_v62 = vsel %vm1573_vm4, %v3792_v41, %v3793_v4  ;;  %v3705_v6 = vadd.f32 %v8518_v30, %v3592_v26  ;;  %v3594_v59 = vpop.f32.mrb[101].mxu1 }
 0x4af   : > { %v3880_v57 = vmax.f32 %v3731_v14, %v3794_v62  ;;  %v3797_v37 = vsel %vm1573_vm4, %v3795_v43, %v3796_v0  ;;  %v3706_v38 = vadd.f32 %v8522_v23, %v3594_v59  ;;  %v3596_v58 = vpop.f32.mrb[102].mxu1 }
 0x4b0   : > { %v3881_v54 = vmax.f32 %v3732_v9, %v3797_v37  ;;  %v3735_v55 = vmax.f32 %v3705_v6, 0.0  ;;  %v3707_v19 = vadd.f32 %v8518_v30, %v3596_v58  ;;  %v3598_v56 = vpop.f32.mrb[103].mxu1  ;;  %v7010_v58 = vld [vmem:[%s9119_s6 + $0x60] sm:$0xff]  }
 0x4b1   : > { %v3736_v25 = vmax.f32 %v3706_v38, 0.0  ;;  %v3708_v13 = vadd.f32 %v8522_v23, %v3598_v56 }
 0x4b2   : > { %v3798_v34 = vrot.slane %v3735_v55, 2  ;;  %v3737_v36 = vmax.f32 %v3707_v19, 0.0 }
 0x4b3   : > { %v3800_v39 = vrot.slane %v3736_v25, 2  ;;  %v3738_v44 = vmax.f32 %v3708_v13, 0.0 }
 0x4b4   : > { %v3799_v46 = vsel %vm1573_vm4, %v3793_v4, %v3798_v34  ;;  %v3802_v18 = vrot.slane %v3737_v36, 2 }
 0x4b5   : > { %v3882_v52 = vmax.f32 %v3733_v5, %v3799_v46  ;;  %v3801_v50 = vsel %vm1573_vm4, %v3796_v0, %v3800_v39  ;;  %v3804_v40 = vrot.slane %v3738_v44, 2  ;;  %v3602_v11 = vpop.f32.mrb[104].mxu1 }
 0x4b6   : > { %v3883_v10 = vmax.f32 %v3734_v31, %v3801_v50  ;;  %v3709_v61 = vadd.f32 %v8518_v30, %v3602_v11  ;;  %v3604_v15 = vpop.f32.mrb[105].mxu1  ;;  %v3803_v48 = vsel %vm1573_vm4, %v3798_v34, %v3802_v18 }
 0x4b7   : > { %v8538_v22 = vpack.c.bf16 %v3882_v52, %v3880_v57  ;;  %v3805_v49 = vsel %vm1573_vm4, %v3800_v39, %v3804_v40  ;;  %v3710_v53 = vadd.f32 %v8522_v23, %v3604_v15  ;;  %v3606_v42 = vpop.f32.mrb[106].mxu1  ;;  %v3884_v63 = vmax.f32 %v3735_v55, %v3803_v48  ;;  %v7011_v39 = vld [vmem:[%s9119_s6 + $0x68] sm:$0xff]  }
 0x4b8   : > { %v3885_v20 = vmax.f32 %v3736_v25, %v3805_v49  ;;  %v3739_v17 = vmax.f32 %v3709_v61, 0.0  ;;  %v3711_v35 = vadd.f32 %v8518_v30, %v3606_v42  ;;  %v3608_v21 = vpop.f32.mrb[107].mxu1  ;;  %v8543_v27 = vpack.c.bf16 %v3883_v10, %v3881_v54 }
 0x4b9   : > { %v3740_v33 = vmax.f32 %v3710_v53, 0.0  ;;  %v3712_v7 = vadd.f32 %v8522_v23, %v3608_v21  ;;  %v7012_v21 = vld [vmem:[%s9119_s6 + $0x70] sm:$0xff]  }
 0x4ba   : > { %v3806_v47 = vrot.slane %v3739_v17, 2  ;;  %v3741_v29 = vmax.f32 %v3711_v35, 0.0  ;;  %5885 = vmatprep.mubr.msk.bf16.mxu0 %vm4006_vm10, %v8543_v27 }
 0x4bb   : > { %v3808_v3 = vrot.slane %v3740_v33, 2  ;;  %v3742_v8 = vmax.f32 %v3712_v7, 0.0  ;;  %4064 = vmatmul.mubr.bf16.vlgmr.msra.gmra.mrb[32].mxu0 %v8538_v22 }
 0x4bc   : > { %v3810_v1 = vrot.slane %v3741_v29, 2  ;;  %v3807_v16 = vsel %vm1573_vm4, %v3802_v18, %v3806_v47  ;;  %4209 = vmatpush1.bf16.msra.mxu0 %v7008_v24 }
 0x4bd   : > { %v3809_v14 = vsel %vm1573_vm4, %v3804_v40, %v3808_v3  ;;  %v3812_v12 = vrot.slane %v3742_v8, 2  ;;  %v3612_v28 = vpop.f32.mrb[108].mxu1  ;;  %v3886_v9 = vmax.f32 %v3737_v36, %v3807_v16  ;;  %4210 = vmatprep.subr.bf16.mxu0 %v7121_v2  ;;  %v7013_v16 = vld [vmem:[%s9119_s6 + $0x78] sm:$0xff]  }
 0x4be   : > { %v3887_v45 = vmax.f32 %v3738_v44, %v3809_v14  ;;  %v3713_v5 = vadd.f32 %v8518_v30, %v3612_v28  ;;  %v3614_v31 = vpop.f32.mrb[109].mxu1  ;;  %v3811_v41 = vsel %vm1573_vm4, %v3806_v47, %v3810_v1 }
 0x4bf   : > { %v3813_v4 = vsel %vm1573_vm4, %v3808_v3, %v3812_v12  ;;  %v3714_v43 = vadd.f32 %v8522_v23, %v3614_v31  ;;  %v3616_v0 = vpop.f32.mrb[110].mxu1  ;;  %v8562_v26 = vpack.c.bf16 %v3886_v9, %v3884_v63  ;;  %v3888_v62 = vmax.f32 %v3739_v17, %v3811_v41 }
 0x4c0   : > { %v3889_v6 = vmax.f32 %v3740_v33, %v3813_v4  ;;  %v3743_v59 = vmax.f32 %v3713_v5, 0.0  ;;  %v3715_v57 = vadd.f32 %v8518_v30, %v3616_v0  ;;  %v3618_v37 = vpop.f32.mrb[111].mxu1  ;;  %v8565_v38 = vpack.c.bf16 %v3887_v45, %v3885_v20  ;;  %4211 = vmatpush1.bf16.msra.mxu0 %v7009_v32 }
 0x4c1   : > { %v3744_v54 = vmax.f32 %v3714_v43, 0.0  ;;  %v3716_v55 = vadd.f32 %v8522_v23, %v3618_v37  ;;  %4212 = vmatprep.subr.bf16.mxu0 %v7121_v2 }
 0x4c2   : > { %v3814_v19 = vrot.slane %v3743_v59, 2  ;;  %v3745_v56 = vmax.f32 %v3715_v57, 0.0  ;;  %5886 = vmatprep.mubr.msk.bf16.mxu0 %vm4006_vm10, %v8565_v38 }
 0x4c3   : > { %v3816_v25 = vrot.slane %v3744_v54, 2  ;;  %v3746_v13 = vmax.f32 %v3716_v55, 0.0  ;;  %4072 = vmatmul.mubr.bf16.gmra.mrb[36].mxu0 %v8562_v26 }
 0x4c4   : > { %v3818_v34 = vrot.slane %v3745_v56, 2  ;;  %v3815_v36 = vsel %vm1573_vm4, %v3810_v1, %v3814_v19  ;;  %4213 = vmatpush1.bf16.msra.mxu0 %v7010_v58 }
 0x4c5   : > { %v3817_v44 = vsel %vm1573_vm4, %v3812_v12, %v3816_v25  ;;  %v3820_v46 = vrot.slane %v3746_v13, 2  ;;  %v3622_v18 = vpop.f32.mrb[112].mxu1  ;;  %v3890_v52 = vmax.f32 %v3741_v29, %v3815_v36  ;;  %4214 = vmatprep.subr.bf16.mxu0 %v7121_v2 }
 0x4c6   : > { %v3891_v50 = vmax.f32 %v3742_v8, %v3817_v44  ;;  %v3717_v40 = vadd.f32 %v8518_v30, %v3622_v18  ;;  %v3624_v11 = vpop.f32.mrb[113].mxu1  ;;  %v3819_v10 = vsel %vm1573_vm4, %v3814_v19, %v3818_v34  ;;  %v7015_v44 = vld [vmem:[%s9119_s6 + $0x88] sm:$0xff]  }
 0x4c7   : > { %v3821_v61 = vsel %vm1573_vm4, %v3816_v25, %v3820_v46  ;;  %v3718_v15 = vadd.f32 %v8522_v23, %v3624_v11  ;;  %v3626_v48 = vpop.f32.mrb[114].mxu1  ;;  %v8585_v49 = vpack.c.bf16 %v3890_v52, %v3888_v62  ;;  %v3892_v53 = vmax.f32 %v3743_v59, %v3819_v10 }
 0x4c8   : > { %v3893_v42 = vmax.f32 %v3744_v54, %v3821_v61  ;;  %v3747_v63 = vmax.f32 %v3717_v40, 0.0  ;;  %v3719_v20 = vadd.f32 %v8518_v30, %v3626_v48  ;;  %v3628_v17 = vpop.f32.mrb[115].mxu1  ;;  %v8588_v35 = vpack.c.bf16 %v3891_v50, %v3889_v6  ;;  %4215 = vmatpush1.bf16.msra.mxu0 %v7011_v39  ;;  %v7014_v54 = vld [vmem:[%s9119_s6 + $0x80] sm:$0xff]  }
 0x4c9   : > { %v3748_v24 = vmax.f32 %v3718_v15, 0.0  ;;  %v3720_v33 = vadd.f32 %v8522_v23, %v3628_v17  ;;  %4216 = vmatprep.subr.bf16.mxu0 %v7121_v2 }
 0x4ca   : > { %v3822_v7 = vrot.slane %v3747_v63, 2  ;;  %v3749_v47 = vmax.f32 %v3719_v20, 0.0  ;;  %5887 = vmatprep.mubr.msk.bf16.mxu0 %vm4006_vm10, %v8588_v35 }
 0x4cb   : > { %v3824_v29 = vrot.slane %v3748_v24, 2  ;;  %v3750_v3 = vmax.f32 %v3720_v33, 0.0  ;;  %4080 = vmatmul.mubr.bf16.gmra.mrb[40].mxu0 %v8585_v49 }
 0x4cc   : > { %v3826_v8 = vrot.slane %v3749_v47, 2  ;;  %v3823_v1 = vsel %vm1573_vm4, %v3818_v34, %v3822_v7  ;;  %4217 = vmatpush1.bf16.msra.mxu0 %v7012_v21 }
 0x4cd   : > { %v3825_v32 = vsel %vm1573_vm4, %v3820_v46, %v3824_v29  ;;  %v3828_v14 = vrot.slane %v3750_v3, 2  ;;  %v3632_v12 = vpop.f32.mrb[116].mxu1  ;;  %v3894_v28 = vmax.f32 %v3745_v56, %v3823_v1  ;;  %4218 = vmatprep.subr.bf16.mxu0 %v7121_v2 }
 0x4ce   : > { %v3895_v9 = vmax.f32 %v3746_v13, %v3825_v32  ;;  %v3721_v45 = vadd.f32 %v8518_v30, %v3632_v12  ;;  %v3634_v5 = vpop.f32.mrb[117].mxu1  ;;  %v3827_v31 = vsel %vm1573_vm4, %v3822_v7, %v3826_v8  ;;  %v7016_v7 = vld [vmem:[%s9119_s6 + $0x90] sm:$0xff]   ;;  %v7017_v12 = vld [vmem:[%s9119_s6 + $0x98] sm:$0xff]  }
 0x4cf   : > { %v3829_v41 = vsel %vm1573_vm4, %v3824_v29, %v3828_v14  ;;  %v3722_v4 = vadd.f32 %v8522_v23, %v3634_v5  ;;  %v3636_v43 = vpop.f32.mrb[118].mxu1  ;;  %v8608_v0 = vpack.c.bf16 %v3894_v28, %v3892_v53  ;;  %v3896_v62 = vmax.f32 %v3747_v63, %v3827_v31 }
 0x4d0   : > { %v3897_v6 = vmax.f32 %v3748_v24, %v3829_v41  ;;  %v3751_v59 = vmax.f32 %v3721_v45, 0.0  ;;  %v3723_v57 = vadd.f32 %v8518_v30, %v3636_v43  ;;  %v3638_v37 = vpop.f32.mrb[119].mxu1  ;;  %v8611_v58 = vpack.c.bf16 %v3895_v9, %v3893_v42  ;;  %4219 = vmatpush1.bf16.msra.mxu0 %v7013_v16 }
 0x4d1   : > { %v3752_v55 = vmax.f32 %v3722_v4, 0.0  ;;  %v3724_v19 = vadd.f32 %v8522_v23, %v3638_v37  ;;  %4220 = vmatprep.subr.bf16.mxu0 %v7121_v2 }
 0x4d2   : > { %v3830_v56 = vrot.slane %v3751_v59, 2  ;;  %v3753_v25 = vmax.f32 %v3723_v57, 0.0  ;;  %5888 = vmatprep.mubr.msk.bf16.mxu0 %vm4006_vm10, %v8611_v58 }
 0x4d3   : > { %v3832_v13 = vrot.slane %v3752_v55, 2  ;;  %v3754_v34 = vmax.f32 %v3724_v19, 0.0  ;;  %4088 = vmatmul.mubr.bf16.gmra.mrb[44].mxu0 %v8608_v0 }
 0x4d4   : > { %v3834_v36 = vrot.slane %v3753_v25, 2  ;;  %v3831_v39 = vsel %vm1573_vm4, %v3826_v8, %v3830_v56  ;;  %4221 = vmatpush1.bf16.msra.mxu0 %v7014_v54 }
 0x4d5   : > { %v3833_v46 = vsel %vm1573_vm4, %v3828_v14, %v3832_v13  ;;  %v3836_v18 = vrot.slane %v3754_v34, 2  ;;  %v3642_v52 = vpop.f32.mrb[120].mxu1  ;;  %v3898_v50 = vmax.f32 %v3749_v47, %v3831_v39  ;;  %4222 = vmatprep.subr.bf16.mxu0 %v7121_v2 }
 0x4d6   : > { %v3899_v40 = vmax.f32 %v3750_v3, %v3833_v46  ;;  %v3725_v11 = vadd.f32 %v8518_v30, %v3642_v52  ;;  %v3644_v10 = vpop.f32.mrb[121].mxu1  ;;  %v3835_v61 = vsel %vm1573_vm4, %v3830_v56, %v3834_v36 }
 0x4d7   : > { %v3837_v15 = vsel %vm1573_vm4, %v3832_v13, %v3836_v18  ;;  %v3726_v48 = vadd.f32 %v8522_v23, %v3644_v10  ;;  %v3646_v53 = vpop.f32.mrb[122].mxu1  ;;  %v8631_v42 = vpack.c.bf16 %v3898_v50, %v3896_v62  ;;  %v3900_v63 = vmax.f32 %v3751_v59, %v3835_v61 }
 0x4d8   : > { %v3901_v20 = vmax.f32 %v3752_v55, %v3837_v15  ;;  %v3755_v17 = vmax.f32 %v3725_v11, 0.0  ;;  %v3727_v21 = vadd.f32 %v8518_v30, %v3646_v53  ;;  %v3648_v24 = vpop.f32.mrb[123].mxu1  ;;  %v8634_v33 = vpack.c.bf16 %v3899_v40, %v3897_v6  ;;  %4223 = vmatpush1.bf16.msra.mxu0 %v7015_v44 }
 0x4d9   : > { %v3756_v47 = vmax.f32 %v3726_v48, 0.0  ;;  %v3728_v29 = vadd.f32 %v8522_v23, %v3648_v24  ;;  %4224 = vmatprep.subr.bf16.mxu0 %v7121_v2 }
 0x4da   : > { %v3838_v3 = vrot.slane %v3755_v17, 2  ;;  %v3757_v8 = vmax.f32 %v3727_v21, 0.0  ;;  %5889 = vmatprep.mubr.msk.bf16.mxu0 %vm4006_vm10, %v8634_v33 }
 0x4db   : > { %v3840_v1 = vrot.slane %v3756_v47, 2  ;;  %v3758_v16 = vmax.f32 %v3728_v29, 0.0  ;;  %4096 = vmatmul.mubr.bf16.gmra.mrb[48].mxu0 %v8631_v42 }
 0x4dc   : > { %v3842_v32 = vrot.slane %v3757_v8, 2  ;;  %v3839_v14 = vsel %vm1573_vm4, %v3834_v36, %v3838_v3  ;;  %4225 = vmatpush1.bf16.msra.mxu0 %v7016_v7 }
 0x4dd   : > { %v3841_v28 = vsel %vm1573_vm4, %v3836_v18, %v3840_v1  ;;  %v3844_v9 = vrot.slane %v3758_v16, 2  ;;  %v3652_v45 = vpop.f32.mrb[140].mxu1  ;;  %v3902_v5 = vmax.f32 %v3753_v25, %v3839_v14  ;;  %4226 = vmatprep.subr.bf16.mxu0 %v7121_v2 }
 0x4de   : > { %v3903_v31 = vmax.f32 %v3754_v34, %v3841_v28  ;;  %v3687_v41 = vadd.f32 %v3652_v45, %v8509_v51  ;;  %v3654_v4 = vpop.f32.mrb[141].mxu1  ;;  %v3843_v43 = vsel %vm1573_vm4, %v3838_v3, %v3842_v32 }
 0x4df   : > { %v3845_v62 = vsel %vm1573_vm4, %v3840_v1, %v3844_v9  ;;  %v3688_v6 = vadd.f32 %v3654_v4, %v8511_v60  ;;  %v3656_v59 = vpop.f32.mrb[142].mxu1  ;;  %v3920_v57 = vpack.c.bf16 %v3902_v5, %v3900_v63  ;;  %v3904_v37 = vmax.f32 %v3755_v17, %v3843_v43 }
 0x4e0   : > { %v3905_v54 = vmax.f32 %v3756_v47, %v3845_v62  ;;  %v3729_v55 = vadd.f32 %v8518_v30, %v3687_v41  ;;  %v3657_v19 = vpop.f32.mrb[143].mxu1  ;;  %v3921_v56 = vpack.c.bf16 %v3903_v31, %v3901_v20  ;;  %4227 = vmatpush1.bf16.msra.mxu0 %v7017_v12 }
 0x4e1   : > { %v3730_v25 = vadd.f32 %v8522_v23, %v3688_v6 }
 0x4e2   : > { %v3759_v13 = vmax.f32 %v3729_v55, 0.0  ;;  %5890 = vmatprep.mubr.msk.bf16.mxu0 %vm4006_vm10, %v3921_v56 }
 0x4e3   : > { %v3760_v51 = vmax.f32 %v3730_v25, 0.0  ;;  %4104 = vmatmul.mubr.bf16.gmra.mrb[52].mxu0 %v3920_v57 }
 0x4e4   : > { %v3846_v34 = vrot.slane %v3759_v13, 2 }
 0x4e5   : > { %v3848_v36 = vrot.slane %v3760_v51, 2 }
 0x4e6   : > { %v3847_v60 = vsel %vm1573_vm4, %v3842_v32, %v3846_v34  ;;  %v3908_v23 = vmax.f32 %v3759_v13, %v3846_v34 }
 0x4e7   : > { %v3849_v39 = vsel %vm1573_vm4, %v3844_v9, %v3848_v36  ;;  %v3906_v44 = vmax.f32 %v3757_v8, %v3847_v60  ;;  %v3909_v46 = vmax.f32 %v3760_v51, %v3848_v36 }
 0x4e8   : > { %v3907_v18 = vmax.f32 %v3758_v16, %v3849_v39  ;;  %v3924_v40 = vpack.c.bf16 %v3908_v23, %v3908_v23  ;;  %v7023_v39 = vld [vmem:[%s9120_s7] sm:$0xff]  }
 0x4e9   : > { %v3922_v30 = vpack.c.bf16 %v3906_v44, %v3904_v37  ;;  %v3925_v50 = vpack.c.bf16 %v3909_v46, %v3909_v46 }
 0x4ea   : > { %v3923_v52 = vpack.c.bf16 %v3907_v18, %v3905_v54 }
 0x4ec   : > { %5891 = vmatprep.mubr.msk.bf16.mxu0 %vm4006_vm10, %v3923_v52 }
 0x4ed   : > { %4112 = vmatmul.mubr.bf16.gmra.mrb[56].mxu0 %v3922_v30 }
 0x4ee   : > { %5892 = vmatprep.mubr.msk.bf16.mxu0 %vm4006_vm10, %v3925_v50 }
 0x4f5   : > { %4120 = vmatmul.mubr.bf16.gmra.mrb[60].mxu0 %v3924_v40 }
 0x4f6   : > { %5923 = vmatprep.mubr.msk.bf16.mxu0 %vm4006_vm10, %v8543_v27  ;;  %v7018_v27 = vld [vmem:[%s9120_s7 + $0x28] sm:$0xff]  }
 0x4fd   : > { %4241 = vmatmul.mubr.bf16.vlgmr.msra.gmra.mrb[64].mxu0 %v8538_v22  ;;  %v7122_v22 = vmov 0.0  }
 0x4fe   : > { %5924 = vmatprep.mubr.msk.bf16.mxu0 %vm4006_vm10, %v8565_v38  ;;  %6139 = vmatprep.subr.bf16.mxu0 %v7122_v22  ;;  %v7020_v38 = vld [vmem:[%s9120_s7 + $0x38] sm:$0xff]  }
 0x4ff   : > { %6329 = vmatprep.subr.bf16.mxu1 %v7122_v22  ;;  %6140 = vmatpush3.bf16.msra.mxu0 %v7018_v27 }
 0x500   : > { %6141 = vmatprep.subr.bf16.mxu0 %v7122_v22  ;;  %6343 = vmatprep.mubr.msk.bf16.mxu1 %vm7123_vm11, %v7122_v22 }
 0x505   : > { %4249 = vmatmul.mubr.bf16.gmra.mrb[68].mxu0 %v8562_v26  ;;  %v7019_v26 = vld [vmem:[%s9120_s7 + $0x30] sm:$0xff]  }
 0x506   : > { %5925 = vmatprep.mubr.msk.bf16.mxu0 %vm4006_vm10, %v8588_v35  ;;  %6142 = vmatpush3.bf16.msra.mxu0 %v7019_v26  ;;  %v7022_v35 = vld [vmem:[%s9120_s7 + $0x48] sm:$0xff]  }
 0x507   : > { %6143 = vmatprep.subr.bf16.mxu0 %v7122_v22 }
 0x50a   : > { %6144 = vmatpush3.bf16.msra.mxu0 %v7020_v38  ;;  %v7025_v38 = vld [vmem:[%s9120_s7 + $0x10] sm:$0xff]  }
 0x50b   : > { %6145 = vmatprep.subr.bf16.mxu0 %v7122_v22 }
 0x50d   : > { %4257 = vmatmul.mubr.bf16.gmra.mrb[72].mxu0 %v8585_v49  ;;  %v7021_v49 = vld [vmem:[%s9120_s7 + $0x40] sm:$0xff]  }
 0x50e   : > { %5926 = vmatprep.mubr.msk.bf16.mxu0 %vm4006_vm10, %v8611_v58  ;;  %6146 = vmatpush3.bf16.msra.mxu0 %v7021_v49 }
 0x50f   : > { %6147 = vmatprep.subr.bf16.mxu0 %v7122_v22 }
 0x512   : > { %6148 = vmatpush3.bf16.msra.mxu0 %v7022_v35 }
 0x513   : > { %6177 = vmatprep.subr.bf16.mxu0 %v7122_v22 }
 0x515   : > { %4265 = vmatmul.mubr.bf16.gmra.mrb[76].mxu0 %v8608_v0 }
 0x516   : > { %5927 = vmatprep.mubr.msk.bf16.mxu0 %vm4006_vm10, %v8634_v33 }
 0x51d   : > { %4273 = vmatmul.mubr.bf16.gmra.mrb[80].mxu0 %v8631_v42 }
 0x51e   : > { %5928 = vmatprep.mubr.msk.bf16.mxu0 %vm4006_vm10, %v3921_v56 }
 0x525   : > { %4281 = vmatmul.mubr.bf16.gmra.mrb[84].mxu0 %v3920_v57 }
 0x526   : > { %5929 = vmatprep.mubr.msk.bf16.mxu0 %vm4006_vm10, %v3923_v52 }
 0x52d   : > { %4289 = vmatmul.mubr.bf16.gmra.mrb[88].mxu0 %v3922_v30 }
 0x52e   : > { %5930 = vmatprep.mubr.msk.bf16.mxu0 %vm4006_vm10, %v3925_v50 }
 0x535   : > { %4297 = vmatmul.mubr.bf16.gmra.mrb[92].mxu0 %v3924_v40  ;;  %v7024_v40 = vld [vmem:[%s9120_s7 + $0x8] sm:$0xff]  }
 0x536   : > { %6149 = vmatprep.mubr.msk.bf16.mxu0 %vm7123_vm11, %v7122_v22 }
 0x58e   : > { %v4065_v0 = vpop.f32.mrb[32].mxu0 }
 0x58f   : > { %v4067_v58 = vpop.f32.mrb[33].mxu0 }
 0x590   : > { %v4068_v11 = vpop.f32.mrb[34].mxu0 }
 0x591   : > { %v4070_v10 = vpop.f32.mrb[35].mxu0 }
 0x596   : > { %v4073_v61 = vpop.f32.mrb[36].mxu0 }
 0x597   : > { %v4075_v15 = vpop.f32.mrb[37].mxu0 }
 0x598   : > { %v4076_v48 = vpop.f32.mrb[38].mxu0  ;;  %v7026_v15 = vld [vmem:[%s9120_s7 + $0x18] sm:$0xff]  }
 0x599   : > { %v4078_v53 = vpop.f32.mrb[39].mxu0 }
 0x59e   : > { %v4081_v42 = vpop.f32.mrb[40].mxu0 }
 0x59f   : > { %v4083_v63 = vpop.f32.mrb[41].mxu0 }
 0x5a0   : > { %v4084_v20 = vpop.f32.mrb[42].mxu0 }
 0x5a1   : > { %v4086_v17 = vpop.f32.mrb[43].mxu0 }
 0x5a6   : > { %v8705_v21 = vpop.f32.mrb[44].mxu0 }
 0x5a7   : > { %v4091_v24 = vpop.f32.mrb[45].mxu0 }
 0x5a8   : > { %v8707_v33 = vpop.f32.mrb[46].mxu0 }
 0x5a9   : > { %v4094_v7 = vpop.f32.mrb[47].mxu0 }
 0x5ae   : > { %v8709_v47 = vpop.f32.mrb[48].mxu0 }
 0x5af   : > { %v4099_v29 = vpop.f32.mrb[49].mxu0 }
 0x5b0   : > { %v8711_v3 = vpop.f32.mrb[50].mxu0 }
 0x5b1   : > { %v4102_v8 = vpop.f32.mrb[51].mxu0 }
 0x5b6   : > { %v8713_v1 = vpop.f32.mrb[52].mxu0 }
 0x5b7   : > { %v4107_v16 = vpop.f32.mrb[53].mxu0 }
 0x5b8   : > { %v8715_v32 = vpop.f32.mrb[54].mxu0 }
 0x5b9   : > { %v4110_v14 = vpop.f32.mrb[55].mxu0 }
 0x5c0   : > { %v8717_v12 = vpop.f32.mrb[56].mxu0 }
 0x5c1   : > { %v4115_v28 = vpop.f32.mrb[57].mxu0 }
 0x5c2   : > { %v8719_v9 = vpop.f32.mrb[58].mxu0 }
 0x5c3   : > { %v4118_v45 = vpop.f32.mrb[59].mxu0 }
 0x5c8   : > { %v8721_v5 = vpop.f32.mrb[60].mxu0 }
 0x5c9   : > { %v4123_v31 = vpop.f32.mrb[61].mxu0 }
 0x5ca   : > { %v4124_v41 = vpop.f32.mrb[62].mxu0 }
 0x5cb   : > { %v4125_v4 = vpop.f32.mrb[63].mxu0 }
 0x5d0   : > { %v4242_v43 = vpop.f32.mrb[64].mxu0 }
 0x5d1   : > { %v4304_v62 = vmax.f32 %v4065_v0, %v4242_v43  ;;  %v4244_v6 = vpop.f32.mrb[65].mxu0 }
 0x5d2   : > { %v4245_v59 = vpop.f32.mrb[66].mxu0 }
 0x5d3   : > { %v4305_v57 = vmax.f32 %v4068_v11, %v4245_v59  ;;  %v4247_v37 = vpop.f32.mrb[67].mxu0 }
 0x5d5   : > { %v8723_v54 = vpack.c.bf16 %v4305_v57, %v4304_v62 }
 0x5d7   : > { %v4355_v36 = vrot.slane %v8723_v54, 2 }
 0x5d8   : > { %v4250_v55 = vpop.f32.mrb[68].mxu0 }
 0x5d9   : > { %v4306_v19 = vmax.f32 %v4073_v61, %v4250_v55  ;;  %v4252_v56 = vpop.f32.mrb[69].mxu0 }
 0x5da   : > { %v4253_v25 = vpop.f32.mrb[70].mxu0 }
 0x5db   : > { %v4307_v13 = vmax.f32 %v4076_v48, %v4253_v25  ;;  %v4255_v51 = vpop.f32.mrb[71].mxu0 }
 0x5dd   : > { %v8725_v34 = vpack.c.bf16 %v4307_v13, %v4306_v19 }
 0x5df   : > { %v4356_v60 = vrot.slane %v8725_v34, 2 }
 0x5e0   : > { %v4258_v44 = vpop.f32.mrb[72].mxu0 }
 0x5e1   : > { %v4308_v46 = vmax.f32 %v4081_v42, %v4258_v44  ;;  %v4260_v18 = vpop.f32.mrb[73].mxu0  ;;  %v4357_v30 = vsel %vm1573_vm4, %v4355_v36, %v4356_v60  ;;  %v7027_v42 = vld [vmem:[%s9120_s7 + $0x20] sm:$0xff]   ;;  %v4659_v44 = vrot.slane %v8725_v34, 4 }
 0x5e2   : > { %v4261_v52 = vpop.f32.mrb[74].mxu0  ;;  %6150 = vmatmul.mubr.msk.bf16.vlgmr.msra.gmra.mrb[96].mxu0 %vm4398_vm12, %v4357_v30  ;;  %v7030_v36 = vld [vmem:[%s9120_s7 + $0x60] sm:$0xff]   ;;  %v7033_v18 = vld [vmem:[%s9120_s7 + $0x78] sm:$0xff]  }
 0x5e3   : > { %v4309_v50 = vmax.f32 %v4084_v20, %v4261_v52  ;;  %v4263_v23 = vpop.f32.mrb[75].mxu0  ;;  %6153 = vmatprep.mubr.msk.bf16.mxu0 %vm7123_vm11, %v7122_v22  ;;  %6178 = vmatpush3.bf16.msra.mxu0 %v7023_v39  ;;  %v7032_v39 = vld [vmem:[%s9120_s7 + $0x70] sm:$0xff]   ;;  %v7034_v52 = vld [vmem:[%s9120_s7 + $0x80] sm:$0xff]  }
 0x5e4   : > { %6179 = vmatprep.subr.bf16.mxu0 %v7122_v22  ;;  %v7035_v23 = vld [vmem:[%s9120_s7 + $0x88] sm:$0xff]  }
 0x5e5   : > { %v8740_v27 = vpack.c.bf16 %v4309_v50, %v4308_v46  ;;  %v4658_v46 = vrot.slane %v8723_v54, 4 }
 0x5e7   : > { %v4358_v26 = vrot.slane %v8740_v27, 2  ;;  %6180 = vmatpush3.bf16.msra.mxu0 %v7024_v40  ;;  %v4660_v30 = vsel %vm2178_vm5, %v4658_v46, %v4659_v44  ;;  %v4661_v50 = vrot.slane %v8740_v27, 4 }
 0x5e8   : > { %v4266_v49 = vpop.f32.mrb[76].mxu0  ;;  %6181 = vmatprep.subr.bf16.mxu0 %v7122_v22 }
 0x5e9   : > { %v4310_v35 = vmax.f32 %v8705_v21, %v4266_v49  ;;  %v4268_v0 = vpop.f32.mrb[77].mxu0  ;;  %v4359_v58 = vsel %vm1573_vm4, %v4356_v60, %v4358_v26  ;;  %v7031_v60 = vld [vmem:[%s9120_s7 + $0x68] sm:$0xff]   ;;  %v4662_v40 = vsel %vm2178_vm5, %v4659_v44, %v4661_v50  ;;  %v7037_v49 = vld [vmem:[%s9120_s7 + $0x98] sm:$0xff]  }
 0x5ea   : > { %v4269_v11 = vpop.f32.mrb[78].mxu0  ;;  %6154 = vmatmul.mubr.msk.bf16.gmra.mrb[100].mxu0 %vm4398_vm12, %v4359_v58 }
 0x5eb   : > { %v4311_v10 = vmax.f32 %v8707_v33, %v4269_v11  ;;  %v4271_v61 = vpop.f32.mrb[79].mxu0  ;;  %6157 = vmatprep.mubr.msk.bf16.mxu0 %vm7123_vm11, %v7122_v22  ;;  %6182 = vmatpush3.bf16.msra.mxu0 %v7025_v38 }
 0x5ec   : > { %6183 = vmatprep.subr.bf16.mxu0 %v7122_v22 }
 0x5ed   : > { %v8757_v48 = vpack.c.bf16 %v4311_v10, %v4310_v35 }
 0x5ef   : > { %v4360_v53 = vrot.slane %v8757_v48, 2  ;;  %6184 = vmatpush3.bf16.msra.mxu0 %v7026_v15  ;;  %v4663_v38 = vrot.slane %v8757_v48, 4 }
 0x5f0   : > { %v4274_v63 = vpop.f32.mrb[80].mxu0  ;;  %6185 = vmatprep.subr.bf16.mxu0 %v7122_v22 }
 0x5f1   : > { %v4312_v20 = vmax.f32 %v8709_v47, %v4274_v63  ;;  %v4276_v17 = vpop.f32.mrb[81].mxu0  ;;  %v4361_v21 = vsel %vm1573_vm4, %v4358_v26, %v4360_v53  ;;  %v7036_v26 = vld [vmem:[%s9120_s7 + $0x90] sm:$0xff]   ;;  %v4664_v35 = vsel %vm2178_vm5, %v4661_v50, %v4663_v38  ;;  %v7038_v63 = vld [vmem:[%s9120_s7 + $0xa0] sm:$0xff]  }
 0x5f2   : > { %v4277_v24 = vpop.f32.mrb[82].mxu0  ;;  %6158 = vmatmul.mubr.msk.bf16.gmra.mrb[104].mxu0 %vm4398_vm12, %v4361_v21  ;;  %v7039_v17 = vld [vmem:[%s9120_s7 + $0xa8] sm:$0xff]   ;;  %v7040_v21 = vld [vmem:[%s9120_s7 + $0xb0] sm:$0xff]  }
 0x5f3   : > { %v4313_v33 = vmax.f32 %v8711_v3, %v4277_v24  ;;  %v4279_v7 = vpop.f32.mrb[83].mxu0  ;;  %6161 = vmatprep.mubr.msk.bf16.mxu0 %vm7123_vm11, %v7122_v22  ;;  %6186 = vmatpush3.bf16.msra.mxu0 %v7027_v42  ;;  %v4835_v42 = vrot.slane %v8723_v54, 6 }
 0x5f4   : > { %6215 = vmatprep.subr.bf16.mxu0 %v7122_v22  ;;  %v4840_v7 = vrot.slane %v8757_v48, 6 }
 0x5f5   : > { %v8771_v29 = vpack.c.bf16 %v4313_v33, %v4312_v20  ;;  %v7041_v33 = vld [vmem:[%s9120_s7 + $0xb8] sm:$0xff]  }
 0x5f7   : > { %v4362_v8 = vrot.slane %v8771_v29, 2  ;;  %v4665_v0 = vrot.slane %v8771_v29, 4 }
 0x5f8   : > { %v4282_v47 = vpop.f32.mrb[84].mxu0 }
 0x5f9   : > { %v4314_v16 = vmax.f32 %v8713_v1, %v4282_v47  ;;  %v4284_v14 = vpop.f32.mrb[85].mxu0  ;;  %v4363_v28 = vsel %vm1573_vm4, %v4360_v53, %v4362_v8  ;;  %v4666_v58 = vsel %vm2178_vm5, %v4663_v38, %v4665_v0  ;;  %v4836_v53 = vrot.slane %v8725_v34, 6 }
 0x5fa   : > { %v4285_v45 = vpop.f32.mrb[86].mxu0  ;;  %6162 = vmatmul.mubr.msk.bf16.gmra.mrb[108].mxu0 %vm4398_vm12, %v4363_v28 }
 0x5fb   : > { %v4315_v3 = vmax.f32 %v8715_v32, %v4285_v45  ;;  %v4287_v31 = vpop.f32.mrb[87].mxu0  ;;  %6165 = vmatprep.mubr.msk.bf16.mxu0 %vm7123_vm11, %v7122_v22  ;;  %v4837_v20 = vsel %vm2614_vm7, %v4835_v42, %v4836_v53  ;;  %v7050_v42 = vld [vmem:[%s9122_s9 + $0x38] ss:$0 sps:$4 sm:$0xff]  }
 0x5fd   : > { %v8780_v41 = vpack.c.bf16 %v4315_v3, %v4314_v16  ;;  %v4842_v16 = vrot.slane %v8771_v29, 6 }
 0x5ff   : > { %v4364_v4 = vrot.slane %v8780_v41, 2  ;;  %v4667_v11 = vrot.slane %v8780_v41, 4  ;;  %v4843_v14 = vsel %vm2614_vm7, %v4840_v7, %v4842_v16  ;;  %v4844_v28 = vrot.slane %v8780_v41, 6 }
 0x600   : > { %v4290_v43 = vpop.f32.mrb[88].mxu0 }
 0x601   : > { %v4316_v62 = vmax.f32 %v8717_v12, %v4290_v43  ;;  %v4292_v1 = vpop.f32.mrb[89].mxu0  ;;  %v4365_v6 = vsel %vm1573_vm4, %v4362_v8, %v4364_v4  ;;  %v4668_v10 = vsel %vm2178_vm5, %v4665_v0, %v4667_v11  ;;  %v7042_v8 = vld [vmem:[%s9120_s7 + $0xc0] sm:$0xff]   ;;  %v4845_v45 = vsel %vm2614_vm7, %v4842_v16, %v4844_v28  ;;  %v7052_v16 = vld [vmem:[%s9124_s11 + $0x8] sm:$0xff]  }
 0x602   : > { %v4293_v59 = vpop.f32.mrb[90].mxu0  ;;  %6166 = vmatmul.mubr.msk.bf16.gmra.mrb[112].mxu0 %vm4398_vm12, %v4365_v6  ;;  %v5145_v0 = vld [vmem:[%s9126_s13] sm:$0x3] }
 0x603   : > { %v4317_v57 = vmax.f32 %v8719_v9, %v4293_v59  ;;  %v4295_v32 = vpop.f32.mrb[91].mxu0  ;;  %6169 = vmatprep.mubr.msk.bf16.mxu0 %vm7123_vm11, %v7122_v22  ;;  %v7028_v9 = vld [vmem:[%s9120_s7 + $0x50] sm:$0xff]  }
 0x605   : > { %v8789_v37 = vpack.c.bf16 %v4317_v57, %v4316_v62 }
 0x607   : > { %v4366_v55 = vrot.slane %v8789_v37, 2  ;;  %v4669_v61 = vrot.slane %v8789_v37, 4  ;;  %v4846_v3 = vrot.slane %v8789_v37, 6 }
 0x608   : > { %v4298_v19 = vpop.f32.mrb[92].mxu0 }
 0x609   : > { %v8793_v56 = vmax.f32 %v8721_v5, %v4298_v19  ;;  %v4300_v12 = vpop.f32.mrb[93].mxu0  ;;  %v4367_v25 = vsel %vm1573_vm4, %v4364_v4, %v4366_v55  ;;  %v7029_v5 = vld [vmem:[%s9120_s7 + $0x58] sm:$0xff]   ;;  %v4670_v15 = vsel %vm2178_vm5, %v4667_v11, %v4669_v61  ;;  %v4847_v31 = vsel %vm2614_vm7, %v4844_v28, %v4846_v3  ;;  %v7045_v11 = vld [vmem:[%s9122_s9 + $0x10] sm:$0xff]  }
 0x60a   : > { %v4301_v13 = vpop.f32.mrb[94].mxu0  ;;  %6170 = vmatmul.mubr.msk.bf16.gmra.mrb[116].mxu0 %vm4398_vm12, %v4367_v25  ;;  %v7054_v28 = vld [vmem:[%s9124_s11 + $0x18] sm:$0xff]  }
 0x60b   : > { %v4302_v51 = vpop.f32.mrb[95].mxu0  ;;  %6173 = vmatprep.mubr.msk.bf16.mxu0 %vm7123_vm11, %v7122_v22 }
 0x612   : > { %6174 = vmatmul.mubr.msk.bf16.gmra.mrb[120].mxu0 %vm4398_vm12, %v4366_v55 }
 0x613   : > { %6187 = vmatprep.mubr.msk.bf16.mxu0 %vm7123_vm11, %v7122_v22 }
 0x61a   : > { %6188 = vmatmul.mubr.msk.bf16.vlgmr.msra.gmra.mrb[96].mxu0 %vm4398_vm12, %v8723_v54  ;;  %v4838_v54 = vrot.slane %v8740_v27, 6 }
 0x61b   : > { %6191 = vmatprep.mubr.msk.bf16.mxu0 %vm7123_vm11, %v7122_v22  ;;  %6216 = vmatpush3.bf16.msra.mxu0 %v7028_v9 }
 0x61c   : > { %6217 = vmatprep.subr.bf16.mxu0 %v7122_v22  ;;  %v4839_v24 = vsel %vm2614_vm7, %v4836_v53, %v4838_v54  ;;  %v4841_v47 = vsel %vm2614_vm7, %v4838_v54, %v4840_v7  ;;  %v7049_v53 = vld [vmem:[%s9122_s9 + $0x30] sm:$0xff]  }
 0x61f   : > { %6218 = vmatpush3.bf16.msra.mxu0 %v7029_v5 }
 0x620   : > { %6219 = vmatprep.subr.bf16.mxu0 %v7122_v22 }
 0x622   : > { %6192 = vmatmul.mubr.msk.bf16.gmra.mrb[100].mxu0 %vm4398_vm12, %v8725_v34 }
 0x623   : > { %6195 = vmatprep.mubr.msk.bf16.mxu0 %vm7123_vm11, %v7122_v22  ;;  %6220 = vmatpush3.bf16.msra.mxu0 %v7030_v36 }
 0x624   : > { %6221 = vmatprep.subr.bf16.mxu0 %v7122_v22 }
 0x627   : > { %6222 = vmatpush3.bf16.msra.mxu0 %v7031_v60 }
 0x628   : > { %6223 = vmatprep.subr.bf16.mxu0 %v7122_v22 }
 0x62a   : > { %6196 = vmatmul.mubr.msk.bf16.gmra.mrb[104].mxu0 %vm4398_vm12, %v8740_v27 }
 0x62b   : > { %6199 = vmatprep.mubr.msk.bf16.mxu0 %vm7123_vm11, %v7122_v22  ;;  %6224 = vmatpush3.bf16.msra.mxu0 %v7032_v39 }
 0x62c   : > { %6253 = vmatprep.subr.bf16.mxu0 %v7122_v22 }
 0x632   : > { %6200 = vmatmul.mubr.msk.bf16.gmra.mrb[108].mxu0 %vm4398_vm12, %v8757_v48 }
 0x633   : > { %6203 = vmatprep.mubr.msk.bf16.mxu0 %vm7123_vm11, %v7122_v22 }
 0x63a   : > { %6204 = vmatmul.mubr.msk.bf16.gmra.mrb[112].mxu0 %vm4398_vm12, %v8771_v29 }
 0x63b   : > { %6207 = vmatprep.mubr.msk.bf16.mxu0 %vm7123_vm11, %v7122_v22 }
 0x642   : > { %6208 = vmatmul.mubr.msk.bf16.gmra.mrb[116].mxu0 %vm4398_vm12, %v8780_v41 }
 0x643   : > { %6211 = vmatprep.mubr.msk.bf16.mxu0 %vm7123_vm11, %v7122_v22 }
 0x64a   : > { %6212 = vmatmul.mubr.msk.bf16.gmra.mrb[120].mxu0 %vm4398_vm12, %v8789_v37 }
 0x64b   : > { %6225 = vmatprep.mubr.msk.bf16.mxu0 %vm7123_vm11, %v7122_v22 }
 0x652   : > { %6226 = vmatmul.mubr.msk.bf16.vlgmr.msra.gmra.mrb[96].mxu0 %vm4398_vm12, %v4660_v30 }
 0x653   : > { %6229 = vmatprep.mubr.msk.bf16.mxu0 %vm7123_vm11, %v7122_v22  ;;  %6254 = vmatpush3.bf16.msra.mxu0 %v7033_v18 }
 0x654   : > { %6255 = vmatprep.subr.bf16.mxu0 %v7122_v22 }
 0x657   : > { %6256 = vmatpush3.bf16.msra.mxu0 %v7034_v52 }
 0x658   : > { %6257 = vmatprep.subr.bf16.mxu0 %v7122_v22 }
 0x65a   : > { %6230 = vmatmul.mubr.msk.bf16.gmra.mrb[100].mxu0 %vm4398_vm12, %v4662_v40 }
 0x65b   : > { %6233 = vmatprep.mubr.msk.bf16.mxu0 %vm7123_vm11, %v7122_v22  ;;  %6258 = vmatpush3.bf16.msra.mxu0 %v7035_v23  ;;  %v5166_v23 = vsel %vm5164_vm13, 65535, %v7121_v2  ;;  %v7044_v2 = vld [vmem:[%s9122_s9 + $0x8] sm:$0xff]  }
 0x65c   : > { %6259 = vmatprep.subr.bf16.mxu0 %v7122_v22 }
 0x65f   : > { %6260 = vmatpush3.bf16.msra.mxu0 %v7036_v26 }
 0x660   : > { %6261 = vmatprep.subr.bf16.mxu0 %v7122_v22 }
 0x662   : > { %6234 = vmatmul.mubr.msk.bf16.gmra.mrb[104].mxu0 %vm4398_vm12, %v4664_v35 }
 0x663   : > { %6237 = vmatprep.mubr.msk.bf16.mxu0 %vm7123_vm11, %v7122_v22  ;;  %6262 = vmatpush3.bf16.msra.mxu0 %v7037_v49 }
 0x664   : > { %6291 = vmatprep.subr.bf16.mxu0 %v7122_v22 }
 0x66a   : > { %6238 = vmatmul.mubr.msk.bf16.gmra.mrb[108].mxu0 %vm4398_vm12, %v4666_v58  ;;  %v7043_v58 = vld [vmem:[%s9122_s9] sm:$0xff]  }
 0x66b   : > { %6241 = vmatprep.mubr.msk.bf16.mxu0 %vm7123_vm11, %v7122_v22 }
 0x672   : > { %6242 = vmatmul.mubr.msk.bf16.gmra.mrb[112].mxu0 %vm4398_vm12, %v4668_v10  ;;  %v7046_v10 = vld [vmem:[%s9122_s9 + $0x18] sm:$0xff]  }
 0x673   : > { %6245 = vmatprep.mubr.msk.bf16.mxu0 %vm7123_vm11, %v7122_v22 }
 0x67a   : > { %6246 = vmatmul.mubr.msk.bf16.gmra.mrb[116].mxu0 %vm4398_vm12, %v4670_v15  ;;  %v7048_v15 = vld [vmem:[%s9122_s9 + $0x28] sm:$0xff]  }
 0x67b   : > { %6249 = vmatprep.mubr.msk.bf16.mxu0 %vm7123_vm11, %v7122_v22 }
 0x682   : > { %6250 = vmatmul.mubr.msk.bf16.gmra.mrb[120].mxu0 %vm4398_vm12, %v4669_v61  ;;  %v7047_v61 = vld [vmem:[%s9122_s9 + $0x20] sm:$0xff]  }
 0x683   : > { %6263 = vmatprep.mubr.msk.bf16.mxu0 %vm7123_vm11, %v7122_v22 }
 0x68a   : > { %6264 = vmatmul.mubr.msk.bf16.vlgmr.msra.gmra.mrb[96].mxu0 %vm4398_vm12, %v4837_v20  ;;  %v6031_v20 = vld [vmem:[%s9121_s8] ss:$0 sm:$0xff] }
 0x68b   : > { %6267 = vmatprep.mubr.msk.bf16.mxu0 %vm7123_vm11, %v7122_v22  ;;  %6292 = vmatpush3.bf16.msra.mxu0 %v7038_v63  ;;  %v5284_v63 = vsel %vm2178_vm5, %v7050_v42, 0 }
 0x68c   : > { %6293 = vmatprep.subr.bf16.mxu0 %v7122_v22 }
 0x68f   : > { %6294 = vmatpush3.bf16.msra.mxu0 %v7039_v17 }
 0x690   : > { %6295 = vmatprep.subr.bf16.mxu0 %v7122_v22 }
 0x692   : > { %6268 = vmatmul.mubr.msk.bf16.gmra.mrb[100].mxu0 %vm4398_vm12, %v4839_v24 }
 0x693   : > { %6271 = vmatprep.mubr.msk.bf16.mxu0 %vm7123_vm11, %v7122_v22  ;;  %6296 = vmatpush3.bf16.msra.mxu0 %v7040_v21 }
 0x694   : > { %6297 = vmatprep.subr.bf16.mxu0 %v7122_v22 }
 0x697   : > { %6298 = vmatpush3.bf16.msra.mxu0 %v7041_v33 }
 0x698   : > { %6299 = vmatprep.subr.bf16.mxu0 %v7122_v22 }
 0x69a   : > { %6272 = vmatmul.mubr.msk.bf16.gmra.mrb[104].mxu0 %vm4398_vm12, %v4841_v47 }
 0x69b   : > { %6275 = vmatprep.mubr.msk.bf16.mxu0 %vm7123_vm11, %v7122_v22  ;;  %6300 = vmatpush3.bf16.msra.mxu0 %v7042_v8  ;;  %v7051_v8 = vld [vmem:[%s9124_s11] sm:$0xff]  }
 0x6a2   : > { %6276 = vmatmul.mubr.msk.bf16.gmra.mrb[108].mxu0 %vm4398_vm12, %v4843_v14  ;;  %v7053_v14 = vld [vmem:[%s9124_s11 + $0x10] sm:$0xff]  }
 0x6a3   : > { %6279 = vmatprep.mubr.msk.bf16.mxu0 %vm7123_vm11, %v7122_v22 }
 0x6aa   : > { %6280 = vmatmul.mubr.msk.bf16.gmra.mrb[112].mxu0 %vm4398_vm12, %v4845_v45  ;;  %v7055_v45 = vld [vmem:[%s9124_s11 + $0x20] sm:$0xff]  }
 0x6ab   : > { %6283 = vmatprep.mubr.msk.bf16.mxu0 %vm7123_vm11, %v7122_v22 }
 0x6b2   : > { %6284 = vmatmul.mubr.msk.bf16.gmra.mrb[116].mxu0 %vm4398_vm12, %v4847_v31 }
 0x6b3   : > { %6287 = vmatprep.mubr.msk.bf16.mxu0 %vm7123_vm11, %v7122_v22 }
 0x6ba   : > { %6288 = vmatmul.mubr.msk.bf16.gmra.mrb[120].mxu0 %vm4398_vm12, %v4846_v3  ;;  %v7056_v3 = vld [vmem:[%s9124_s11 + $0x28] ss:$0 sps:$4 sm:$0x33]  }
 0x6bb   : > { %6301 = vmatprep.mubr.msk.bf16.mxu0 %vm7123_vm11, %v7122_v22  ;;  %v5383_v31 = vsel %vm2614_vm7, %v7056_v3, 0 }
 0x6c2   : > { %6302 = vmatmul.mubr.msk.bf16.vlgmr.msra.gmra.mrb[96].mxu0 %vm4398_vm12, %v8725_v34  ;;  %v4326_v34 = vpack.c.bf16 %v8793_v56, %v8793_v56 }
 0x6c3   : > { %6305 = vmatprep.mubr.msk.bf16.mxu0 %vm7123_vm11, %v7122_v22 }
 0x6ca   : > { %6306 = vmatmul.mubr.msk.bf16.gmra.mrb[100].mxu0 %vm4398_vm12, %v8740_v27 }
 0x6cb   : > { %6309 = vmatprep.mubr.msk.bf16.mxu0 %vm7123_vm11, %v7122_v22 }
 0x6d2   : > { %6310 = vmatmul.mubr.msk.bf16.gmra.mrb[104].mxu0 %vm4398_vm12, %v8757_v48 }
 0x6d3   : > { %6313 = vmatprep.mubr.msk.bf16.mxu0 %vm7123_vm11, %v7122_v22 }
 0x6da   : > { %6314 = vmatmul.mubr.msk.bf16.gmra.mrb[108].mxu0 %vm4398_vm12, %v8771_v29 }
 0x6db   : > { %6317 = vmatprep.mubr.msk.bf16.mxu0 %vm7123_vm11, %v7122_v22 }
 0x6e2   : > { %6318 = vmatmul.mubr.msk.bf16.gmra.mrb[112].mxu0 %vm4398_vm12, %v8780_v41 }
 0x6e3   : > { %6321 = vmatprep.mubr.msk.bf16.mxu0 %vm7123_vm11, %v7122_v22 }
 0x6ea   : > { %6322 = vmatmul.mubr.msk.bf16.gmra.mrb[116].mxu0 %vm4398_vm12, %v8789_v37 }
 0x6eb   : > { %6325 = vmatprep.mubr.msk.bf16.mxu0 %vm7123_vm11, %v7122_v22 }
 0x6f2   : > { %6326 = vmatmul.mubr.msk.bf16.gmra.mrb[120].mxu0 %vm4398_vm12, %v4326_v34  ;;  %v6033_v34 = vld [vmem:[%s9123_s10] ss:$0 sm:$0xff] }
 0x795   : > { %v5078_v27 = vpop.f32.mrb[96].mxu0 }
 0x796   : > { %v6303_v48 = vpop.f32.mrb[97].mxu0 }
 0x797   : > { %v5081_v29 = vpop.f32.mrb[98].mxu0 }
 0x798   : > { %v5146_v4 = vpack.c.bf16 %v5081_v29, %v5078_v27  ;;  %v6304_v43 = vpop.f32.mrb[99].mxu0 }
 0x79a   : > { %6330 = vmatpush3.bf16.msra.mxu1 %v5146_v4 }
 0x79b   : > { %6331 = vmatprep.subr.bf16.mxu1 %v7122_v22 }
 0x79d   : > { %v5086_v41 = vpop.f32.mrb[100].mxu0 }
 0x79e   : > { %v6307_v62 = vpop.f32.mrb[101].mxu0 }
 0x79f   : > { %v5089_v1 = vpop.f32.mrb[102].mxu0 }
 0x7a0   : > { %v5147_v6 = vpack.c.bf16 %v5089_v1, %v5086_v41  ;;  %v6308_v59 = vpop.f32.mrb[103].mxu0 }
 0x7a2   : > { %6332 = vmatpush3.bf16.msra.mxu1 %v5147_v6 }
 0x7a3   : > { %6333 = vmatprep.subr.bf16.mxu1 %v7122_v22 }
 0x7a5   : > { %v5094_v57 = vpop.f32.mrb[104].mxu0 }
 0x7a6   : > { %v6311_v32 = vpop.f32.mrb[105].mxu0 }
 0x7a7   : > { %v5097_v37 = vpop.f32.mrb[106].mxu0 }
 0x7a8   : > { %v5148_v55 = vpack.c.bf16 %v5097_v37, %v5094_v57  ;;  %v6312_v19 = vpop.f32.mrb[107].mxu0 }
 0x7aa   : > { %6334 = vmatpush3.bf16.msra.mxu1 %v5148_v55 }
 0x7ab   : > { %6335 = vmatprep.subr.bf16.mxu1 %v7122_v22 }
 0x7ad   : > { %v5102_v56 = vpop.f32.mrb[108].mxu0 }
 0x7ae   : > { %v6315_v12 = vpop.f32.mrb[109].mxu0 }
 0x7af   : > { %v5105_v25 = vpop.f32.mrb[110].mxu0 }
 0x7b0   : > { %v5149_v13 = vpack.c.bf16 %v5105_v25, %v5102_v56  ;;  %v6316_v51 = vpop.f32.mrb[111].mxu0 }
 0x7b2   : > { %6336 = vmatpush3.bf16.msra.mxu1 %v5149_v13 }
 0x7b3   : > { %6337 = vmatprep.subr.bf16.mxu1 %v7122_v22 }
 0x7b5   : > { %v5110_v9 = vpop.f32.mrb[112].mxu0 }
 0x7b6   : > { %v6319_v5 = vpop.f32.mrb[113].mxu0 }
 0x7b7   : > { %v5113_v36 = vpop.f32.mrb[114].mxu0 }
 0x7b8   : > { %v5150_v60 = vpack.c.bf16 %v5113_v36, %v5110_v9  ;;  %v6320_v39 = vpop.f32.mrb[115].mxu0 }
 0x7ba   : > { %6338 = vmatpush3.bf16.msra.mxu1 %v5150_v60 }
 0x7bb   : > { %6339 = vmatprep.subr.bf16.mxu1 %v7122_v22 }
 0x7bd   : > { %v5118_v44 = vpop.f32.mrb[116].mxu0 }
 0x7be   : > { %v6323_v46 = vpop.f32.mrb[117].mxu0 }
 0x7bf   : > { %v5121_v18 = vpop.f32.mrb[118].mxu0 }
 0x7c0   : > { %v5151_v30 = vpack.c.bf16 %v5121_v18, %v5118_v44  ;;  %v6324_v52 = vpop.f32.mrb[119].mxu0 }
 0x7c2   : > { %6340 = vmatpush3.bf16.msra.mxu1 %v5151_v30 }
 0x7c3   : > { %6341 = vmatprep.subr.bf16.mxu1 %v7122_v22 }
 0x7c5   : > { %v5126_v50 = vpop.f32.mrb[120].mxu0 }
 0x7c6   : > { %v5152_v40 = vpack.c.bf16 %v5126_v50, %v5126_v50  ;;  %v6327_v26 = vpop.f32.mrb[121].mxu0 }
 0x7c7   : > { %v5129_v38 = vpop.f32.mrb[122].mxu0 }
 0x7c8   : > { %v5168_v49 = vand.u32 %v5166_v23, %v5152_v40  ;;  %v6328_v35 = vpop.f32.mrb[123].mxu0 }
 0x7ca   : > { %6342 = vmatpush3.bf16.msra.mxu1 %v5168_v49 }
 0x7cb   : > { %6347 = vmatprep.subr.bf16.mxu1 %v7122_v22 }
 0x7cd   : > { %6344 = vmatmul.mubr.msk.bf16.vlgmr.msra.gmra.mrb[144].mxu1 %vm5160_vm14, %v5145_v0 }
 0x7ce   : > { %6348 = vmatpush3.bf16.msra.mxu1 %v7043_v58  ;;  %6363 = vmatprep.mubr.msk.bf16.mxu1 %vm7123_vm11, %v7122_v22 }
 0x7cf   : > { %6349 = vmatprep.subr.bf16.mxu1 %v7122_v22 }
 0x7d2   : > { %6350 = vmatpush3.bf16.msra.mxu1 %v7044_v2 }
 0x7d3   : > { %6351 = vmatprep.subr.bf16.mxu1 %v7122_v22 }
 0x7d6   : > { %6352 = vmatpush3.bf16.msra.mxu1 %v7045_v11 }
 0x7d7   : > { %6353 = vmatprep.subr.bf16.mxu1 %v7122_v22 }
 0x7da   : > { %6354 = vmatpush3.bf16.msra.mxu1 %v7046_v10 }
 0x7db   : > { %6355 = vmatprep.subr.bf16.mxu1 %v7122_v22 }
 0x7de   : > { %6356 = vmatpush3.bf16.msra.mxu1 %v7047_v61 }
 0x7df   : > { %6357 = vmatprep.subr.bf16.mxu1 %v7122_v22 }
 0x7e2   : > { %6358 = vmatpush3.bf16.msra.mxu1 %v7048_v15 }
 0x7e3   : > { %6359 = vmatprep.subr.bf16.mxu1 %v7122_v22 }
 0x7e6   : > { %6360 = vmatpush3.bf16.msra.mxu1 %v7049_v53 }
 0x7e7   : > { %6361 = vmatprep.subr.bf16.mxu1 %v7122_v22 }
 0x7ea   : > { %6362 = vmatpush3.bf16.msra.mxu1 %v5284_v63 }
 0x7eb   : > { %6367 = vmatprep.subr.bf16.mxu1 %v7122_v22 }
 0x8a0   : > { %v5204_v17 = vpop.f32.mrb[144].mxu1 }
 0x8a1   : > { %v5205_v54 = vadd.f32 %v6031_v20, %v5204_v17  ;;  %v6345_v21 = vpop.f32.mrb[145].mxu1 }
 0x8a2   : > { %v5207_v24 = vpop.f32.mrb[146].mxu1 }
 0x8a3   : > { %v5210_v33 = vmax.f32 %v5205_v54, 0.0  ;;  %v6346_v7 = vpop.f32.mrb[147].mxu1 }
 0x8a5   : > { %v5211_v47 = vpack.c.bf16 %v5210_v33, %v5210_v33 }
 0x8a7   : > { %6364 = vmatmul.mubr.msk.bf16.vlgmr.msra.gmra.mrb[148].mxu1 %vm5279_vm15, %v5211_v47 }
 0x8a8   : > { %6368 = vmatpush3.bf16.msra.mxu1 %v7051_v8  ;;  %6379 = vmatprep.mubr.msk.bf16.mxu1 %vm7123_vm11, %v7122_v22 }
 0x8a9   : > { %6369 = vmatprep.subr.bf16.mxu1 %v7122_v22 }
 0x8ac   : > { %6370 = vmatpush3.bf16.msra.mxu1 %v7052_v16 }
 0x8ad   : > { %6371 = vmatprep.subr.bf16.mxu1 %v7122_v22 }
 0x8b0   : > { %6372 = vmatpush3.bf16.msra.mxu1 %v7053_v14 }
 0x8b1   : > { %6373 = vmatprep.subr.bf16.mxu1 %v7122_v22 }
 0x8b4   : > { %6374 = vmatpush3.bf16.msra.mxu1 %v7054_v28 }
 0x8b5   : > { %6375 = vmatprep.subr.bf16.mxu1 %v7122_v22 }
 0x8b8   : > { %6376 = vmatpush3.bf16.msra.mxu1 %v7055_v45 }
 0x8b9   : > { %6377 = vmatprep.subr.bf16.mxu1 %v7122_v22  ;;  %v6043_v22 = vld [vmem:[%s9125_s12] ss:$0 sm:$0xff] }
 0x8bc   : > { %6378 = vmatpush3.bf16.msra.mxu1 %v5383_v31 }
 0x97a   : > { %v5320_v27 = vpop.f32.mrb[148].mxu1 }
 0x97b   : > { %v5321_v48 = vadd.f32 %v6033_v34, %v5320_v27  ;;  %v6365_v29 = vpop.f32.mrb[149].mxu1 }
 0x97c   : > { %v5323_v4 = vpop.f32.mrb[150].mxu1 }
 0x97d   : > { %v5326_v43 = vmax.f32 %v5321_v48, 0.0  ;;  %v6366_v41 = vpop.f32.mrb[151].mxu1 }
 0x97f   : > { %v5327_v62 = vpack.c.bf16 %v5326_v43, %v5326_v43 }
 0x981   : > { %6380 = vmatmul.mubr.msk.bf16.vlgmr.msra.gmra.mrb[152].mxu1 %vm2589_vm8, %v5327_v62 }
 0xa54   : > { %v5419_v1 = vpop.f32.mrb[152].mxu1 }
 0xa55   : > { %v5420_v6 = vadd.f32 %v6043_v22, %v5419_v1  ;;  %v6381_v59 = vpop.f32.mrb[153].mxu1 }
 0xa56   : > { %v5422_v57 = vpop.f32.mrb[154].mxu1 }
 0xa57   : > { %v6382_v32 = vpop.f32.mrb[155].mxu1  ;;  %5426 = vst.msk [vmem:[%s461_s25] sm:$0xf] %vm5425_vm0, %v5420_v6 }
 0xa58   : > { %7070 = shalt.err (!%p7067_p3)
}
 0xa59   : > { %s7071_s15 = scalar_lea.hbm %s9071_s18, 64  ;;  %s7075_s28 = scalar_lea.hbm %s9127_s14, 128 }
 0xa5a   : > { %p7072_p4 = scmp.ne.s32.totalorder %s9071_s18, %s7071_s15  ;;  %p7076_p9 = scmp.lt.u32.totalorder %s9071_s18, %s9127_s14 }
 0xa5b   : > { %p7077_p10 = scmp.lt.u32.totalorder %s7075_s28, %s7071_s15  ;;  %p7079_p12 = scmp.lt.u32.totalorder %s7071_s15, %s9071_s18 }
 0xa5c   : > { %p7073_p7 = pnand %p7072_p4, %p7238_p5 }
 0xa5d   : > { %p7078_p11 = por %p7077_p10, %p7076_p9 }
 0xa5e   : > { %p7074_p8 = pneg %p7073_p7 }
 0xa5f   : > { %p7080_p13 = por %p7079_p12, %p7078_p11 }
 0xa61   : > { %p7081_p0 = pnand %p7080_p13, %p7074_p8 }
 0xa63   : > { %7084 = shalt.err (!%p7081_p0)
}
 0xa64   : > { %6747 = dma.vmem_to_hbm [thread:$0]  (%p7238_p5), %s9073_s0, 64, %s9071_s18, %s5428_s17  }
 0xa65 PF: > { %p6753_p1 = scmp.ge.s32.totalorder %s7119_s16, 2  ;;  %s5453_s22 = sand.u32 1, %s7107_s29  }
 0xa66   : > { %s5454_s26 = scalar_lea.sflag [#allocation3], %s5453_s22 }
 0xa67   : > { %p6750_p2 = pnand %p6753_p1, %p7242_p6 }
 0xa69   : > { %7102 = dma.done.wait (!%p6750_p2), %s5454_s26, 64  }
 0xa6a   : > { %7104 = vsyncadd (!%p6750_p2), %s5454_s26, 4294967232  ;;  %s9135_s15 = sld [smem:[#allocation5_spill]]  ;;  %s9136_s20 = sld [smem:[#allocation6_spill]] }
 0xa6b   : > { %p24_p3 = scmp.ge.s32.totalorder %s7225_s19, 4   ;;  %s9137_s29 = smov %s7111_s30 }
 0xa6c   : > { %s9140_s16 = smov %s7225_s19 }
 0xa6d   :  { %26 = sbr.rel (!%p24_p3) target bundleno = 5 (0x5), region = 125 }
 0xa70   : > { %s9138_s30 = smov %s9135_s15  ;;  %s9139_s15 = smov %s9136_s20 }
 0xa74   :  { %5459 = vsyncpa [#allocation3], 1 }
 0xa75   :  { %5461 = vsyncpa [#allocation3 + $0x1], 1 }

</bundles_post_ra>
